<compile_context>
chip_gen: v6e
topology: v6e:2x2x1
jax: 0.10.0
libtpu: 0.0.40
codegen_flags: <defaults>
</compile_context>

<pallas_src>
import jax
import jax.numpy as jnp
from jax.experimental import pallas as pl
from jax.experimental.pallas import tpu as pltpu

EPS = 1e-5
LANE = 128
STATS_BLOCK_TARGET = 2 * 1024 * 1024     # ~2 MB input block per stats grid step


def _round_up(x, m):
    return (x + m - 1) // m * m


def _vmem_limit(block_bytes, margin=4 << 20, cap=56 << 20):
    """Scoped-VMEM budget derived from the actual block working set (+ margin)."""
    return int(min(max(block_bytes + margin, 8 << 20), cap))


# ----------------------------------------------------------------------------- kernels
def bn_stats_kernel(x_ref, sum_ref, sumsq_ref):
    """Per-block partial channel sums / sums-of-squares (no shared accumulator).

    x_ref:     (R, Cp)    f32  block of the flattened NHWC activation
    sum_ref:   (1, 8, Cp) f32  partial sum, broadcast over 8 sublanes (row 0 used)
    sumsq_ref: (1, 8, Cp) f32  partial sum of squares, same layout
    """
    x = x_ref[...]
    s = jnp.sum(x, axis=0, keepdims=True)            # (1, Cp)
    ss = jnp.sum(x * x, axis=0, keepdims=True)       # (1, Cp)
    sum_ref[0] = jnp.broadcast_to(s, sum_ref.shape[1:])
    sumsq_ref[0] = jnp.broadcast_to(ss, sumsq_ref.shape[1:])


def _make_fused_kernel(H, W, Cp, Cop):
    """Fused BN(scale/shift) + ReLU + 3x3 conv for one image, flat-layout conv."""
    Wp = W + 2
    HWp = H * Wp       # extended output rows (2 garbage columns per image row)

    def kernel(x_ref, scale_ref, shift_ref, w_ref, b_ref, o_ref, y_ref):
        # x_ref:     (1, H*W, Cp)   bf16  unpadded image, spatially flattened
        # scale_ref: (1, Cp)        f32   gamma / sqrt(var + eps)
        # shift_ref: (1, Cp)        f32   beta - mean * scale
        # w_ref:     (9, Cp, Cop)   bf16  conv taps, (kh*3 + kw) major
        # b_ref:     (1, Cop)       f32   conv bias
        # o_ref:     (1, H*Wp, Cop) f32   extended output (cols 0..W-1 of each Wp row valid)
        # y_ref:     (R, Cp)        bf16  flat spatially-padded normalized activation

        # Zero the scratch each step: gives the zero halo ring (top/bottom pad rows and
        # the 2 pad columns between image rows) with no HBM-side jnp.pad.
        y_ref[...] = jnp.zeros_like(y_ref)

        # BN + affine + ReLU in f32 on the VPU; bf16 only at the MXU boundary.
        x = x_ref[0].astype(jnp.float32)                                   # (H*W, Cp)
        y = jnp.maximum(x * scale_ref[...] + shift_ref[...], 0.0).astype(jnp.bfloat16)

        # Scatter image rows into the flat W-padded layout (interior of the halo).
        for h in range(H):
            y_ref[pl.ds((h + 1) * Wp + 1, W), :] = y[h * W:(h + 1) * W, :]

        # 3x3 conv as 9 shifted *contiguous* windows, single accumulation chain
        # (bf16 in, f32 accumulate on the MXU); bias folded into the one final store.
        acc = jnp.dot(y_ref[pl.ds(0, HWp), :], w_ref[0],
                      preferred_element_type=jnp.float32)
        for t in range(1, 9):
            off = (t // 3) * Wp + (t % 3)
            acc = acc + jnp.dot(y_ref[pl.ds(off, HWp), :], w_ref[t],
                                preferred_element_type=jnp.float32)
        o_ref[0] = acc + b_ref[...]

    return kernel


# ----------------------------------------------------------------------------- wrapper
def res_block_forward(x_nchw, gamma, beta, conv_w, conv_b):
    """ResBlock forward: conv1(relu1(bn1(x))), BN in training mode.  x_nchw: [N,C,H,W]."""
    N, C_in, H, W = x_nchw.shape
    C_out, _, KH, KW = conv_w.shape
    assert (KH, KW) == (3, 3)
    Cp, Cop = _round_up(C_in, LANE), _round_up(C_out, LANE)
    Hp, Wp = H + 2, W + 2
    HW, HWp = H * W, H * Wp

    # ---- layout glue: NCHW -> NHWC, channel pad to lane width (NO spatial pad) ----
    x_nhwc = jnp.transpose(x_nchw, (0, 2, 3, 1)).astype(jnp.float32)
    x_flat = jnp.pad(x_nhwc, ((0, 0), (0, 0), (0, 0), (0, Cp - C_in))).reshape(N, HW, Cp)

    # ---- Kernel 1: per-block partial channel sums (parallel, multi-image blocks) ----
    img_bytes = HW * Cp * 4
    nb = max(1, min(N, STATS_BLOCK_TARGET // max(img_bytes, 1)))
    while N % nb:
        nb -= 1
    if (nb * HW) % 8 and nb != N:        # keep the sublane block dim a multiple of 8
        nb = N
    g = N // nb
    x2d = x_flat.reshape(N * HW, Cp)

    psum, psumsq = pl.pallas_call(
        bn_stats_kernel,
        out_shape=(jax.ShapeDtypeStruct((g, 8, Cp), jnp.float32),
                   jax.ShapeDtypeStruct((g, 8, Cp), jnp.float32)),
        grid=(g,),
        in_specs=[pl.BlockSpec((nb * HW, Cp), lambda i: (i, 0))],
        out_specs=(pl.BlockSpec((1, 8, Cp), lambda i: (i, 0, 0)),
                   pl.BlockSpec((1, 8, Cp), lambda i: (i, 0, 0))),
        compiler_params=pltpu.CompilerParams(
            dimension_semantics=("parallel",),          # no shared accumulator
            vmem_limit_bytes=_vmem_limit(2 * nb * HW * Cp * 4 + 4 * 8 * Cp * 4)),
    )(x2d)
    sum_ = psum[:, 0, :].sum(axis=0)            # (Cp,)
    sumsq = psumsq[:, 0, :].sum(axis=0)

    # ---- fold training-mode batch stats into per-channel scale / shift ----
    # NOTE: one-pass E[x^2]-E[x]^2 in f32; fine at these sizes — switch to a two-pass /
    # mean-offset form for very large N*H*W.
    count = float(N * HW)
    mean = sum_ / count
    var = jnp.maximum(sumsq / count - mean * mean, 0.0)   # biased var (train-mode BN)
    inv_std = jax.lax.rsqrt(var + EPS)
    gamma_p = jnp.pad(gamma.astype(jnp.float32), (0, Cp - C_in))
    beta_p = jnp.pad(beta.astype(jnp.float32), (0, Cp - C_in))
    scale = (gamma_p * inv_std).reshape(1, Cp)
    shift = (beta_p - mean * gamma_p * inv_std).reshape(1, Cp)

    # conv weights: OIHW -> (kh*3+kw, Cp, Cop) bf16 taps; bias -> (1, Cop) f32
    w_hwio = jnp.transpose(conv_w.astype(jnp.float32), (2, 3, 1, 0))     # (3,3,Ci,Co)
    w_hwio = jnp.pad(w_hwio, ((0, 0), (0, 0), (0, Cp - C_in), (0, Cop - C_out)))
    w_taps = w_hwio.reshape(KH * KW, Cp, Cop).astype(jnp.bfloat16)
    bias_p = jnp.pad(conv_b.astype(jnp.float32), (0, Cop - C_out)).reshape(1, Cop)

    # Kernel 2 reads the activation in bf16; BN math upcasts to f32 in-kernel.
    x_bf16 = x_flat.astype(jnp.bfloat16)

    scratch_rows = _round_up(Hp * Wp + 2, 16)   # +2: last taps over-read into garbage rows
    kernel2 = _make_fused_kernel(H, W, Cp, Cop)
    k2_bytes = (2 * HW * Cp * 2                 # x block, double-buffered
                + 2 * HWp * Cop * 4             # out block, double-buffered
                + 2 * 9 * Cp * Cop * 2          # weight taps
                + scratch_rows * Cp * 2         # scratch
                + 4 * (Cp + Cop) * 4)           # scale / shift / bias

    out_ext = pl.pallas_call(
        kernel2,
        out_shape=jax.ShapeDtypeStruct((N, HWp, Cop), jnp.float32),
        grid=(N,),
        in_specs=[
            pl.BlockSpec((1, HW, Cp), lambda n: (n, 0, 0)),
            pl.BlockSpec((1, Cp), lambda n: (0, 0)),          # constant block -> resident
            pl.BlockSpec((1, Cp), lambda n: (0, 0)),
            pl.BlockSpec((9, Cp, Cop), lambda n: (0, 0, 0)),
            pl.BlockSpec((1, Cop), lambda n: (0, 0)),
        ],
        out_specs=pl.BlockSpec((1, HWp, Cop), lambda n: (n, 0, 0)),
        scratch_shapes=[pltpu.VMEM((scratch_rows, Cp), jnp.bfloat16)],
        compiler_params=pltpu.CompilerParams(
            dimension_semantics=("parallel",),    # shard images across TCs (v7x)
            vmem_limit_bytes=_vmem_limit(k2_bytes)),
    )(x_bf16, scale, shift, w_taps, bias_p)

    # TODO(synk): for large H*W add a second "parallel" grid axis tiling H (halo handled
    # via the flat-layout slicing) for pipeline depth and tighter v7x VMEM budgeting.

    # ---- drop the 2 garbage columns / channel padding, back to PyTorch NCHW ----
    out = out_ext.reshape(N, H, Wp, Cop)[:, :, :W, :C_out]
    return jnp.transpose(out, (0, 3, 1, 2))


# --------------------------------------------------------------------------- reference
def reference_forward(x, gamma, beta, conv_w, conv_b):
    """Pure-JAX reference matching PyTorch training-mode BN -> ReLU -> Conv2d."""
    mean = jnp.mean(x, axis=(0, 2, 3), keepdims=True)
    var = jnp.mean((x - mean) ** 2, axis=(0, 2, 3), keepdims=True)
    y = (x - mean) / jnp.sqrt(var + EPS)
    y = y * gamma.reshape(1, -1, 1, 1) + beta.reshape(1, -1, 1, 1)
    y = jnp.maximum(y, 0.0)
    out = jax.lax.conv_general_dilated(
        y, conv_w, window_strides=(1, 1), padding=[(1, 1), (1, 1)],
        dimension_numbers=("NCHW", "OIHW", "NCHW"))
    return out + conv_b.reshape(1, -1, 1, 1)


if __name__ == "__main__":
    # Small shapes consistent with the module: batch=2, in_ch=4, out_ch=8, spatial=16
    N, C_in, C_out, H, W = 2, 4, 8, 16, 16

    key = jax.random.PRNGKey(0)
    kx, kw, kb, kg, kbe = jax.random.split(key, 5)

    x = jax.random.normal(kx, (N, C_in, H, W), dtype=jnp.float32)
    conv_w = 0.1 * jax.random.normal(kw, (C_out, C_in, 3, 3), dtype=jnp.float32)
    conv_b = 0.1 * jax.random.normal(kb, (C_out,), dtype=jnp.float32)
    gamma = 1.0 + 0.1 * jax.random.normal(kg, (C_in,), dtype=jnp.float32)
    beta = 0.1 * jax.random.normal(kbe, (C_in,), dtype=jnp.float32)

    out = jax.jit(res_block_forward)(x, gamma, beta, conv_w, conv_b)
    out = jax.block_until_ready(out)

    ref = reference_forward(x, gamma, beta, conv_w, conv_b)
    assert out.shape == (N, C_out, H, W), out.shape
    # bf16 activations/weights on the MXU (f32 accumulation) -> compare against the f32
    # reference with a bf16-appropriate tolerance.
    assert jnp.allclose(out, ref, rtol=5e-2, atol=5e-2), float(jnp.max(jnp.abs(out - ref)))

    print("KERNEL_OK")
</pallas_src>

<mosaic_0001>
module attributes {stable_mosaic.version = 11 : i64} {
  func.func @bn_stats_kernel(%arg0: i32, %arg1: memref<512x128xf32, #tpu.memory_space<vmem>>, %arg2: memref<1x8x128xf32, #tpu.memory_space<vmem>>, %arg3: memref<1x8x128xf32, #tpu.memory_space<vmem>>) attributes {dimension_semantics = [#tpu.dimension_semantics<parallel>], iteration_bounds = array<i64: 1>, scalar_prefetch = 0 : i64, scratch_operands = 0 : i64, tpu.core_type = #tpu.core_type<tc>, window_params = [{transform_indices = @transform_0, window_bounds = array<i64: 512, 128>}, {transform_indices = @transform_1, window_bounds = array<i64: 1, 8, 128>}, {transform_indices = @transform_2, window_bounds = array<i64: 1, 8, 128>}]} {
    %c0 = arith.constant 0 : index
    %c0_0 = arith.constant 0 : index
    %0 = vector.load %arg1[%c0, %c0_0] : memref<512x128xf32, #tpu.memory_space<vmem>>, vector<512x128xf32>
    %cst = arith.constant dense<0.000000e+00> : vector<128xf32>
    %1 = vector.multi_reduction <add>, %0, %cst [0] : vector<512x128xf32> to vector<128xf32>
    %2 = vector.shape_cast %1 : vector<128xf32> to vector<1x128xf32>
    %3 = arith.mulf %0, %0 : vector<512x128xf32>
    %cst_1 = arith.constant dense<0.000000e+00> : vector<128xf32>
    %4 = vector.multi_reduction <add>, %3, %cst_1 [0] : vector<512x128xf32> to vector<128xf32>
    %5 = vector.shape_cast %4 : vector<128xf32> to vector<1x128xf32>
    %6 = vector.shape_cast %2 : vector<1x128xf32> to vector<1x128xf32>
    %7 = vector.broadcast %6 : vector<1x128xf32> to vector<8x128xf32>
    %c0_2 = arith.constant 0 : index
    %c0_3 = arith.constant 0 : index
    %c0_4 = arith.constant 0 : index
    %8 = vector.load %arg2[%c0_2, %c0_3, %c0_4] : memref<1x8x128xf32, #tpu.memory_space<vmem>>, vector<1x8x128xf32>
    %9 = vector.shape_cast %8 : vector<1x8x128xf32> to vector<8x128xf32>
    %10 = vector.shape_cast %7 : vector<8x128xf32> to vector<1x8x128xf32>
    tpu.vector_store %arg2[%c0_2, %c0_3, %c0_4], %10 {strides = array<i32>} : memref<1x8x128xf32, #tpu.memory_space<vmem>>, vector<1x8x128xf32>,
    %11 = vector.shape_cast %5 : vector<1x128xf32> to vector<1x128xf32>
    %12 = vector.broadcast %11 : vector<1x128xf32> to vector<8x128xf32>
    %c0_5 = arith.constant 0 : index
    %c0_6 = arith.constant 0 : index
    %c0_7 = arith.constant 0 : index
    %13 = vector.load %arg3[%c0_5, %c0_6, %c0_7] : memref<1x8x128xf32, #tpu.memory_space<vmem>>, vector<1x8x128xf32>
    %14 = vector.shape_cast %13 : vector<1x8x128xf32> to vector<8x128xf32>
    %15 = vector.shape_cast %12 : vector<8x128xf32> to vector<1x8x128xf32>
    tpu.vector_store %arg3[%c0_5, %c0_6, %c0_7], %15 {strides = array<i32>} : memref<1x8x128xf32, #tpu.memory_space<vmem>>, vector<1x8x128xf32>,
    return
  }
  func.func @transform_0(%arg0: i32) -> (i32, i32) {
    %c0_i32 = arith.constant 0 : i32
    %c0_i32_0 = arith.constant 0 : i32
    return %arg0, %c0_i32 : i32, i32
  }
  func.func @transform_1(%arg0: i32) -> (i32, i32, i32) {
    %c0_i32 = arith.constant 0 : i32
    %c0_i32_0 = arith.constant 0 : i32
    %c0_i32_1 = arith.constant 0 : i32
    return %arg0, %c0_i32, %c0_i32_0 : i32, i32, i32
  }
  func.func @transform_2(%arg0: i32) -> (i32, i32, i32) {
    %c0_i32 = arith.constant 0 : i32
    %c0_i32_0 = arith.constant 0 : i32
    %c0_i32_1 = arith.constant 0 : i32
    return %arg0, %c0_i32, %c0_i32_0 : i32, i32, i32
  }
}

module attributes {stable_mosaic.version = 11 : i64} {
  func.func @kernel(%arg0: i32, %arg1: memref<1x256x128xbf16, #tpu.memory_space<vmem>>, %arg2: memref<1x128xf32, #tpu.memory_space<vmem>>, %arg3: memref<1x128xf32, #tpu.memory_space<vmem>>, %arg4: memref<9x128x128xbf16, #tpu.memory_space<vmem>>, %arg5: memref<1x128xf32, #tpu.memory_space<vmem>>, %arg6: memref<1x288x128xf32, #tpu.memory_space<vmem>>, %arg7: memref<336x128xbf16, #tpu.memory_space<vmem>>) attributes {dimension_semantics = [#tpu.dimension_semantics<parallel>], iteration_bounds = array<i64: 2>, scalar_prefetch = 0 : i64, scratch_operands = 1 : i64, tpu.core_type = #tpu.core_type<tc>, window_params = [{transform_indices = @transform_0, window_bounds = array<i64: 1, 256, 128>}, {pipeline_mode = #tpu.pipeline_mode<synchronous>, transform_indices = @transform_1, window_bounds = array<i64: 1, 128>}, {pipeline_mode = #tpu.pipeline_mode<synchronous>, transform_indices = @transform_2, window_bounds = array<i64: 1, 128>}, {pipeline_mode = #tpu.pipeline_mode<synchronous>, transform_indices = @transform_3, window_bounds = array<i64: 9, 128, 128>}, {pipeline_mode = #tpu.pipeline_mode<synchronous>, transform_indices = @transform_4, window_bounds = array<i64: 1, 128>}, {transform_indices = @transform_5, window_bounds = array<i64: 1, 288, 128>}]} {
    %cst = arith.constant 0.000000e+00 : bf16
    %0 = vector.broadcast %cst : bf16 to vector<336x128xbf16>
    %c0 = arith.constant 0 : index
    %c0_0 = arith.constant 0 : index
    %1 = vector.load %arg7[%c0, %c0_0] : memref<336x128xbf16, #tpu.memory_space<vmem>>, vector<336x128xbf16>
    tpu.vector_store %arg7[%c0, %c0_0], %0 {strides = array<i32>} : memref<336x128xbf16, #tpu.memory_space<vmem>>, vector<336x128xbf16>,
    %c0_1 = arith.constant 0 : index
    %c0_2 = arith.constant 0 : index
    %c0_3 = arith.constant 0 : index
    %2 = vector.load %arg1[%c0_1, %c0_2, %c0_3] : memref<1x256x128xbf16, #tpu.memory_space<vmem>>, vector<1x256x128xbf16>
    %3 = vector.shape_cast %2 : vector<1x256x128xbf16> to vector<256x128xbf16>
    %4 = arith.extf %3 : vector<256x128xbf16> to vector<256x128xf32>
    %c0_4 = arith.constant 0 : index
    %c0_5 = arith.constant 0 : index
    %5 = vector.load %arg2[%c0_4, %c0_5] : memref<1x128xf32, #tpu.memory_space<vmem>>, vector<1x128xf32>
    %6 = vector.broadcast %5 : vector<1x128xf32> to vector<256x128xf32>
    %7 = arith.mulf %4, %6 : vector<256x128xf32>
    %c0_6 = arith.constant 0 : index
    %c0_7 = arith.constant 0 : index
    %8 = vector.load %arg3[%c0_6, %c0_7] : memref<1x128xf32, #tpu.memory_space<vmem>>, vector<1x128xf32>
    %9 = vector.broadcast %8 : vector<1x128xf32> to vector<256x128xf32>
    %10 = arith.addf %7, %9 : vector<256x128xf32>
    %cst_8 = arith.constant 0.000000e+00 : f32
    %11 = vector.broadcast %cst_8 : f32 to vector<256x128xf32>
    %12 = arith.maximumf %10, %11 : vector<256x128xf32>
    %13 = arith.truncf %12 : vector<256x128xf32> to vector<256x128xbf16>
    %14 = vector.extract_strided_slice %13 {offsets = [0, 0], sizes = [16, 128], strides = [1, 1]} : vector<256x128xbf16> to vector<16x128xbf16>
    %c19 = arith.constant 19 : index
    %c0_9 = arith.constant 0 : index
    %15 = vector.load %arg7[%c19, %c0_9] : memref<336x128xbf16, #tpu.memory_space<vmem>>, vector<16x128xbf16>
    tpu.vector_store %arg7[%c19, %c0_9], %14 {strides = array<i32>} : memref<336x128xbf16, #tpu.memory_space<vmem>>, vector<16x128xbf16>,
    %16 = vector.extract_strided_slice %13 {offsets = [16, 0], sizes = [16, 128], strides = [1, 1]} : vector<256x128xbf16> to vector<16x128xbf16>
    %c37 = arith.constant 37 : index
    %c0_10 = arith.constant 0 : index
    %17 = vector.load %arg7[%c37, %c0_10] : memref<336x128xbf16, #tpu.memory_space<vmem>>, vector<16x128xbf16>
    tpu.vector_store %arg7[%c37, %c0_10], %16 {strides = array<i32>} : memref<336x128xbf16, #tpu.memory_space<vmem>>, vector<16x128xbf16>,
    %18 = vector.extract_strided_slice %13 {offsets = [32, 0], sizes = [16, 128], strides = [1, 1]} : vector<256x128xbf16> to vector<16x128xbf16>
    %c55 = arith.constant 55 : index
    %c0_11 = arith.constant 0 : index
    %19 = vector.load %arg7[%c55, %c0_11] : memref<336x128xbf16, #tpu.memory_space<vmem>>, vector<16x128xbf16>
    tpu.vector_store %arg7[%c55, %c0_11], %18 {strides = array<i32>} : memref<336x128xbf16, #tpu.memory_space<vmem>>, vector<16x128xbf16>,
    %20 = vector.extract_strided_slice %13 {offsets = [48, 0], sizes = [16, 128], strides = [1, 1]} : vector<256x128xbf16> to vector<16x128xbf16>
    %c73 = arith.constant 73 : index
    %c0_12 = arith.constant 0 : index
    %21 = vector.load %arg7[%c73, %c0_12] : memref<336x128xbf16, #tpu.memory_space<vmem>>, vector<16x128xbf16>
    tpu.vector_store %arg7[%c73, %c0_12], %20 {strides = array<i32>} : memref<336x128xbf16, #tpu.memory_space<vmem>>, vector<16x128xbf16>,
    %22 = vector.extract_strided_slice %13 {offsets = [64, 0], sizes = [16, 128], strides = [1, 1]} : vector<256x128xbf16> to vector<16x128xbf16>
    %c91 = arith.constant 91 : index
    %c0_13 = arith.constant 0 : index
    %23 = vector.load %arg7[%c91, %c0_13] : memref<336x128xbf16, #tpu.memory_space<vmem>>, vector<16x128xbf16>
    tpu.vector_store %arg7[%c91, %c0_13], %22 {strides = array<i32>} : memref<336x128xbf16, #tpu.memory_space<vmem>>, vector<16x128xbf16>,
    %24 = vector.extract_strided_slice %13 {offsets = [80, 0], sizes = [16, 128], strides = [1, 1]} : vector<256x128xbf16> to vector<16x128xbf16>
    %c109 = arith.constant 109 : index
    %c0_14 = arith.constant 0 : index
    %25 = vector.load %arg7[%c109, %c0_14] : memref<336x128xbf16, #tpu.memory_space<vmem>>, vector<16x128xbf16>
    tpu.vector_store %arg7[%c109, %c0_14], %24 {strides = array<i32>} : memref<336x128xbf16, #tpu.memory_space<vmem>>, vector<16x128xbf16>,
    %26 = vector.extract_strided_slice %13 {offsets = [96, 0], sizes = [16, 128], strides = [1, 1]} : vector<256x128xbf16> to vector<16x128xbf16>
    %c127 = arith.constant 127 : index
    %c0_15 = arith.constant 0 : index
    %27 = vector.load %arg7[%c127, %c0_15] : memref<336x128xbf16, #tpu.memory_space<vmem>>, vector<16x128xbf16>
    tpu.vector_store %arg7[%c127, %c0_15], %26 {strides = array<i32>} : memref<336x128xbf16, #tpu.memory_space<vmem>>, vector<16x128xbf16>,
    %28 = vector.extract_strided_slice %13 {offsets = [112, 0], sizes = [16, 128], strides = [1, 1]} : vector<256x128xbf16> to vector<16x128xbf16>
    %c145 = arith.constant 145 : index
    %c0_16 = arith.constant 0 : index
    %29 = vector.load %arg7[%c145, %c0_16] : memref<336x128xbf16, #tpu.memory_space<vmem>>, vector<16x128xbf16>
    tpu.vector_store %arg7[%c145, %c0_16], %28 {strides = array<i32>} : memref<336x128xbf16, #tpu.memory_space<vmem>>, vector<16x128xbf16>,
    %30 = vector.extract_strided_slice %13 {offsets = [128, 0], sizes = [16, 128], strides = [1, 1]} : vector<256x128xbf16> to vector<16x128xbf16>
    %c163 = arith.constant 163 : index
    %c0_17 = arith.constant 0 : index
    %31 = vector.load %arg7[%c163, %c0_17] : memref<336x128xbf16, #tpu.memory_space<vmem>>, vector<16x128xbf16>
    tpu.vector_store %arg7[%c163, %c0_17], %30 {strides = array<i32>} : memref<336x128xbf16, #tpu.memory_space<vmem>>, vector<16x128xbf16>,
    %32 = vector.extract_strided_slice %13 {offsets = [144, 0], sizes = [16, 128], strides = [1, 1]} : vector<256x128xbf16> to vector<16x128xbf16>
    %c181 = arith.constant 181 : index
    %c0_18 = arith.constant 0 : index
    %33 = vector.load %arg7[%c181, %c0_18] : memref<336x128xbf16, #tpu.memory_space<vmem>>, vector<16x128xbf16>
    tpu.vector_store %arg7[%c181, %c0_18], %32 {strides = array<i32>} : memref<336x128xbf16, #tpu.memory_space<vmem>>, vector<16x128xbf16>,
    %34 = vector.extract_strided_slice %13 {offsets = [160, 0], sizes = [16, 128], strides = [1, 1]} : vector<256x128xbf16> to vector<16x128xbf16>
    %c199 = arith.constant 199 : index
    %c0_19 = arith.constant 0 : index
    %35 = vector.load %arg7[%c199, %c0_19] : memref<336x128xbf16, #tpu.memory_space<vmem>>, vector<16x128xbf16>
    tpu.vector_store %arg7[%c199, %c0_19], %34 {strides = array<i32>} : memref<336x128xbf16, #tpu.memory_space<vmem>>, vector<16x128xbf16>,
    %36 = vector.extract_strided_slice %13 {offsets = [176, 0], sizes = [16, 128], strides = [1, 1]} : vector<256x128xbf16> to vector<16x128xbf16>
    %c217 = arith.constant 217 : index
    %c0_20 = arith.constant 0 : index
    %37 = vector.load %arg7[%c217, %c0_20] : memref<336x128xbf16, #tpu.memory_space<vmem>>, vector<16x128xbf16>
    tpu.vector_store %arg7[%c217, %c0_20], %36 {strides = array<i32>} : memref<336x128xbf16, #tpu.memory_space<vmem>>, vector<16x128xbf16>,
    %38 = vector.extract_strided_slice %13 {offsets = [192, 0], sizes = [16, 128], strides = [1, 1]} : vector<256x128xbf16> to vector<16x128xbf16>
    %c235 = arith.constant 235 : index
    %c0_21 = arith.constant 0 : index
    %39 = vector.load %arg7[%c235, %c0_21] : memref<336x128xbf16, #tpu.memory_space<vmem>>, vector<16x128xbf16>
    tpu.vector_store %arg7[%c235, %c0_21], %38 {strides = array<i32>} : memref<336x128xbf16, #tpu.memory_space<vmem>>, vector<16x128xbf16>,
    %40 = vector.extract_strided_slice %13 {offsets = [208, 0], sizes = [16, 128], strides = [1, 1]} : vector<256x128xbf16> to vector<16x128xbf16>
    %c253 = arith.constant 253 : index
    %c0_22 = arith.constant 0 : index
    %41 = vector.load %arg7[%c253, %c0_22] : memref<336x128xbf16, #tpu.memory_space<vmem>>, vector<16x128xbf16>
    tpu.vector_store %arg7[%c253, %c0_22], %40 {strides = array<i32>} : memref<336x128xbf16, #tpu.memory_space<vmem>>, vector<16x128xbf16>,
    %42 = vector.extract_strided_slice %13 {offsets = [224, 0], sizes = [16, 128], strides = [1, 1]} : vector<256x128xbf16> to vector<16x128xbf16>
    %c271 = arith.constant 271 : index
    %c0_23 = arith.constant 0 : index
    %43 = vector.load %arg7[%c271, %c0_23] : memref<336x128xbf16, #tpu.memory_space<vmem>>, vector<16x128xbf16>
    tpu.vector_store %arg7[%c271, %c0_23], %42 {strides = array<i32>} : memref<336x128xbf16, #tpu.memory_space<vmem>>, vector<16x128xbf16>,
    %44 = vector.extract_strided_slice %13 {offsets = [240, 0], sizes = [16, 128], strides = [1, 1]} : vector<256x128xbf16> to vector<16x128xbf16>
    %c289 = arith.constant 289 : index
    %c0_24 = arith.constant 0 : index
    %45 = vector.load %arg7[%c289, %c0_24] : memref<336x128xbf16, #tpu.memory_space<vmem>>, vector<16x128xbf16>
    tpu.vector_store %arg7[%c289, %c0_24], %44 {strides = array<i32>} : memref<336x128xbf16, #tpu.memory_space<vmem>>, vector<16x128xbf16>,
    %c0_25 = arith.constant 0 : index
    %c0_26 = arith.constant 0 : index
    %46 = vector.load %arg7[%c0_25, %c0_26] : memref<336x128xbf16, #tpu.memory_space<vmem>>, vector<288x128xbf16>
    %c0_27 = arith.constant 0 : index
    %c0_28 = arith.constant 0 : index
    %c0_29 = arith.constant 0 : index
    %47 = vector.load %arg4[%c0_27, %c0_28, %c0_29] : memref<9x128x128xbf16, #tpu.memory_space<vmem>>, vector<1x128x128xbf16>
    %48 = vector.shape_cast %47 : vector<1x128x128xbf16> to vector<128x128xbf16>
    %cst_30 = arith.constant dense<0.000000e+00> : vector<288x128xf32>
    %49 = tpu.matmul %46, %48, %cst_30 {dimension_numbers = #tpu.dot_dimension_numbers<[1], [0], [0], [1], [0, 0, 1, 1], [], []>} : vector<288x128xbf16>, vector<128x128xbf16>, vector<288x128xf32> -> vector<288x128xf32>
    %c1 = arith.constant 1 : index
    %c0_31 = arith.constant 0 : index
    %50 = vector.load %arg7[%c1, %c0_31] : memref<336x128xbf16, #tpu.memory_space<vmem>>, vector<288x128xbf16>
    %c1_32 = arith.constant 1 : index
    %c0_33 = arith.constant 0 : index
    %c0_34 = arith.constant 0 : index
    %51 = vector.load %arg4[%c1_32, %c0_33, %c0_34] : memref<9x128x128xbf16, #tpu.memory_space<vmem>>, vector<1x128x128xbf16>
    %52 = vector.shape_cast %51 : vector<1x128x128xbf16> to vector<128x128xbf16>
    %cst_35 = arith.constant dense<0.000000e+00> : vector<288x128xf32>
    %53 = tpu.matmul %50, %52, %cst_35 {dimension_numbers = #tpu.dot_dimension_numbers<[1], [0], [0], [1], [0, 0, 1, 1], [], []>} : vector<288x128xbf16>, vector<128x128xbf16>, vector<288x128xf32> -> vector<288x128xf32>
    %54 = arith.addf %49, %53 : vector<288x128xf32>
    %c2 = arith.constant 2 : index
    %c0_36 = arith.constant 0 : index
    %55 = vector.load %arg7[%c2, %c0_36] : memref<336x128xbf16, #tpu.memory_space<vmem>>, vector<288x128xbf16>
    %c2_37 = arith.constant 2 : index
    %c0_38 = arith.constant 0 : index
    %c0_39 = arith.constant 0 : index
    %56 = vector.load %arg4[%c2_37, %c0_38, %c0_39] : memref<9x128x128xbf16, #tpu.memory_space<vmem>>, vector<1x128x128xbf16>
    %57 = vector.shape_cast %56 : vector<1x128x128xbf16> to vector<128x128xbf16>
    %cst_40 = arith.constant dense<0.000000e+00> : vector<288x128xf32>
    %58 = tpu.matmul %55, %57, %cst_40 {dimension_numbers = #tpu.dot_dimension_numbers<[1], [0], [0], [1], [0, 0, 1, 1], [], []>} : vector<288x128xbf16>, vector<128x128xbf16>, vector<288x128xf32> -> vector<288x128xf32>
    %59 = arith.addf %54, %58 : vector<288x128xf32>
    %c18 = arith.constant 18 : index
    %c0_41 = arith.constant 0 : index
    %60 = vector.load %arg7[%c18, %c0_41] : memref<336x128xbf16, #tpu.memory_space<vmem>>, vector<288x128xbf16>
    %c3 = arith.constant 3 : index
    %c0_42 = arith.constant 0 : index
    %c0_43 = arith.constant 0 : index
    %61 = vector.load %arg4[%c3, %c0_42, %c0_43] : memref<9x128x128xbf16, #tpu.memory_space<vmem>>, vector<1x128x128xbf16>
    %62 = vector.shape_cast %61 : vector<1x128x128xbf16> to vector<128x128xbf16>
    %cst_44 = arith.constant dense<0.000000e+00> : vector<288x128xf32>
    %63 = tpu.matmul %60, %62, %cst_44 {dimension_numbers = #tpu.dot_dimension_numbers<[1], [0], [0], [1], [0, 0, 1, 1], [], []>} : vector<288x128xbf16>, vector<128x128xbf16>, vector<288x128xf32> -> vector<288x128xf32>
    %64 = arith.addf %59, %63 : vector<288x128xf32>
    %c19_45 = arith.constant 19 : index
    %c0_46 = arith.constant 0 : index
    %65 = vector.load %arg7[%c19_45, %c0_46] : memref<336x128xbf16, #tpu.memory_space<vmem>>, vector<288x128xbf16>
    %c4 = arith.constant 4 : index
    %c0_47 = arith.constant 0 : index
    %c0_48 = arith.constant 0 : index
    %66 = vector.load %arg4[%c4, %c0_47, %c0_48] : memref<9x128x128xbf16, #tpu.memory_space<vmem>>, vector<1x128x128xbf16>
    %67 = vector.shape_cast %66 : vector<1x128x128xbf16> to vector<128x128xbf16>
    %cst_49 = arith.constant dense<0.000000e+00> : vector<288x128xf32>
    %68 = tpu.matmul %65, %67, %cst_49 {dimension_numbers = #tpu.dot_dimension_numbers<[1], [0], [0], [1], [0, 0, 1, 1], [], []>} : vector<288x128xbf16>, vector<128x128xbf16>, vector<288x128xf32> -> vector<288x128xf32>
    %69 = arith.addf %64, %68 : vector<288x128xf32>
    %c20 = arith.constant 20 : index
    %c0_50 = arith.constant 0 : index
    %70 = vector.load %arg7[%c20, %c0_50] : memref<336x128xbf16, #tpu.memory_space<vmem>>, vector<288x128xbf16>
    %c5 = arith.constant 5 : index
    %c0_51 = arith.constant 0 : index
    %c0_52 = arith.constant 0 : index
    %71 = vector.load %arg4[%c5, %c0_51, %c0_52] : memref<9x128x128xbf16, #tpu.memory_space<vmem>>, vector<1x128x128xbf16>
    %72 = vector.shape_cast %71 : vector<1x128x128xbf16> to vector<128x128xbf16>
    %cst_53 = arith.constant dense<0.000000e+00> : vector<288x128xf32>
    %73 = tpu.matmul %70, %72, %cst_53 {dimension_numbers = #tpu.dot_dimension_numbers<[1], [0], [0], [1], [0, 0, 1, 1], [], []>} : vector<288x128xbf16>, vector<128x128xbf16>, vector<288x128xf32> -> vector<288x128xf32>
    %74 = arith.addf %69, %73 : vector<288x128xf32>
    %c36 = arith.constant 36 : index
    %c0_54 = arith.constant 0 : index
    %75 = vector.load %arg7[%c36, %c0_54] : memref<336x128xbf16, #tpu.memory_space<vmem>>, vector<288x128xbf16>
    %c6 = arith.constant 6 : index
    %c0_55 = arith.constant 0 : index
    %c0_56 = arith.constant 0 : index
    %76 = vector.load %arg4[%c6, %c0_55, %c0_56] : memref<9x128x128xbf16, #tpu.memory_space<vmem>>, vector<1x128x128xbf16>
    %77 = vector.shape_cast %76 : vector<1x128x128xbf16> to vector<128x128xbf16>
    %cst_57 = arith.constant dense<0.000000e+00> : vector<288x128xf32>
    %78 = tpu.matmul %75, %77, %cst_57 {dimension_numbers = #tpu.dot_dimension_numbers<[1], [0], [0], [1], [0, 0, 1, 1], [], []>} : vector<288x128xbf16>, vector<128x128xbf16>, vector<288x128xf32> -> vector<288x128xf32>
    %79 = arith.addf %74, %78 : vector<288x128xf32>
    %c37_58 = arith.constant 37 : index
    %c0_59 = arith.constant 0 : index
    %80 = vector.load %arg7[%c37_58, %c0_59] : memref<336x128xbf16, #tpu.memory_space<vmem>>, vector<288x128xbf16>
    %c7 = arith.constant 7 : index
    %c0_60 = arith.constant 0 : index
    %c0_61 = arith.constant 0 : index
    %81 = vector.load %arg4[%c7, %c0_60, %c0_61] : memref<9x128x128xbf16, #tpu.memory_space<vmem>>, vector<1x128x128xbf16>
    %82 = vector.shape_cast %81 : vector<1x128x128xbf16> to vector<128x128xbf16>
    %cst_62 = arith.constant dense<0.000000e+00> : vector<288x128xf32>
    %83 = tpu.matmul %80, %82, %cst_62 {dimension_numbers = #tpu.dot_dimension_numbers<[1], [0], [0], [1], [0, 0, 1, 1], [], []>} : vector<288x128xbf16>, vector<128x128xbf16>, vector<288x128xf32> -> vector<288x128xf32>
    %84 = arith.addf %79, %83 : vector<288x128xf32>
    %c38 = arith.constant 38 : index
    %c0_63 = arith.constant 0 : index
    %85 = vector.load %arg7[%c38, %c0_63] : memref<336x128xbf16, #tpu.memory_space<vmem>>, vector<288x128xbf16>
    %c8 = arith.constant 8 : index
    %c0_64 = arith.constant 0 : index
    %c0_65 = arith.constant 0 : index
    %86 = vector.load %arg4[%c8, %c0_64, %c0_65] : memref<9x128x128xbf16, #tpu.memory_space<vmem>>, vector<1x128x128xbf16>
    %87 = vector.shape_cast %86 : vector<1x128x128xbf16> to vector<128x128xbf16>
    %cst_66 = arith.constant dense<0.000000e+00> : vector<288x128xf32>
    %88 = tpu.matmul %85, %87, %cst_66 {dimension_numbers = #tpu.dot_dimension_numbers<[1], [0], [0], [1], [0, 0, 1, 1], [], []>} : vector<288x128xbf16>, vector<128x128xbf16>, vector<288x128xf32> -> vector<288x128xf32>
    %89 = arith.addf %84, %88 : vector<288x128xf32>
    %c0_67 = arith.constant 0 : index
    %c0_68 = arith.constant 0 : index
    %90 = vector.load %arg5[%c0_67, %c0_68] : memref<1x128xf32, #tpu.memory_space<vmem>>, vector<1x128xf32>
    %91 = vector.broadcast %90 : vector<1x128xf32> to vector<288x128xf32>
    %92 = arith.addf %89, %91 : vector<288x128xf32>
    %c0_69 = arith.constant 0 : index
    %c0_70 = arith.constant 0 : index
    %c0_71 = arith.constant 0 : index
    %93 = vector.load %arg6[%c0_69, %c0_70, %c0_71] : memref<1x288x128xf32, #tpu.memory_space<vmem>>, vector<1x288x128xf32>
    %94 = vector.shape_cast %93 : vector<1x288x128xf32> to vector<288x128xf32>
    %95 = vector.shape_cast %92 : vector<288x128xf32> to vector<1x288x128xf32>
    tpu.vector_store %arg6[%c0_69, %c0_70, %c0_71], %95 {strides = array<i32>} : memref<1x288x128xf32, #tpu.memory_space<vmem>>, vector<1x288x128xf32>,
    return
  }
  func.func @transform_0(%arg0: i32) -> (i32, i32, i32) {
    %c0_i32 = arith.constant 0 : i32
    %c0_i32_0 = arith.constant 0 : i32
    %c0_i32_1 = arith.constant 0 : i32
    return %arg0, %c0_i32, %c0_i32_0 : i32, i32, i32
  }
  func.func @transform_1(%arg0: i32) -> (i32, i32) {
    %c0_i32 = arith.constant 0 : i32
    %c0_i32_0 = arith.constant 0 : i32
    %c0_i32_1 = arith.constant 0 : i32
    return %c0_i32, %c0_i32_0 : i32, i32
  }
  func.func @transform_2(%arg0: i32) -> (i32, i32) {
    %c0_i32 = arith.constant 0 : i32
    %c0_i32_0 = arith.constant 0 : i32
    %c0_i32_1 = arith.constant 0 : i32
    return %c0_i32, %c0_i32_0 : i32, i32
  }
  func.func @transform_3(%arg0: i32) -> (i32, i32, i32) {
    %c0_i32 = arith.constant 0 : i32
    %c0_i32_0 = arith.constant 0 : i32
    %c0_i32_1 = arith.constant 0 : i32
    %c0_i32_2 = arith.constant 0 : i32
    return %c0_i32, %c0_i32_0, %c0_i32_1 : i32, i32, i32
  }
  func.func @transform_4(%arg0: i32) -> (i32, i32) {
    %c0_i32 = arith.constant 0 : i32
    %c0_i32_0 = arith.constant 0 : i32
    %c0_i32_1 = arith.constant 0 : i32
    return %c0_i32, %c0_i32_0 : i32, i32
  }
  func.func @transform_5(%arg0: i32) -> (i32, i32, i32) {
    %c0_i32 = arith.constant 0 : i32
    %c0_i32_0 = arith.constant 0 : i32
    %c0_i32_1 = arith.constant 0 : i32
    return %arg0, %c0_i32, %c0_i32_0 : i32, i32, i32
  }
}

</mosaic_0001>

<bundles_post_ra>
// kernel: res_block_forward.2
= control target key start
LH: loop header
LB: loop body
LE: loop exit
PB: predicated region body
PF: predicated region fallthrough
CT: control target
= control target key end

     0   :  { %s499_s0 = inlined_call_operand.vmem [shape: f32[512,128], index: 0, kind: input, shape index: {}]   ;;  %s500_s1 = inlined_call_operand.vmem [shape: f32[1,8,128], index: 1, kind: output, shape index: {0}]   ;;  %s501_s2 = inlined_call_operand.vmem [shape: f32[1,8,128], index: 2, kind: output, shape index: {1}]  }
   0x1   :  { %v10_v0 = vld [vmem:[%s499_s0] sm:$0xff]  ;;  %v11_v1 = vld [vmem:[%s499_s0 + $0x8] sm:$0xff]  ;;  %v12_v2 = vld [vmem:[%s499_s0 + $0x10] sm:$0xff] }
   0x2   :  { %v13_v3 = vld [vmem:[%s499_s0 + $0x18] sm:$0xff]  ;;  %v74_v4 = vadd.f32 %v11_v1, %v10_v0  ;;  %v143_v5 = vmul.f32 %v10_v0, %v10_v0  ;;  %v144_v6 = vmul.f32 %v11_v1, %v11_v1  ;;  %v145_v7 = vmul.f32 %v12_v2, %v12_v2  ;;  %v14_v8 = vld [vmem:[%s499_s0 + $0x20] sm:$0xff]  ;;  %v15_v12 = vld [vmem:[%s499_s0 + $0x28] sm:$0xff] }
   0x3   :  { %v146_v10 = vmul.f32 %v13_v3, %v13_v3  ;;  %v147_v14 = vmul.f32 %v14_v8, %v14_v8  ;;  %v16_v16 = vld [vmem:[%s499_s0 + $0x30] sm:$0xff]  ;;  %v148_v18 = vmul.f32 %v15_v12, %v15_v12  ;;  %v17_v20 = vld [vmem:[%s499_s0 + $0x38] sm:$0xff]  ;;  %v18_v24 = vld [vmem:[%s499_s0 + $0x40] sm:$0xff] }
   0x4   :  { %v75_v9 = vadd.f32 %v74_v4, %v12_v2  ;;  %v207_v11 = vadd.f32 %v144_v6, %v143_v5  ;;  %v149_v22 = vmul.f32 %v16_v16, %v16_v16  ;;  %v150_v26 = vmul.f32 %v17_v20, %v17_v20  ;;  %v19_v28 = vld [vmem:[%s499_s0 + $0x48] sm:$0xff]  ;;  %v20_v32 = vld [vmem:[%s499_s0 + $0x50] sm:$0xff]  ;;  %v21_v36 = vld [vmem:[%s499_s0 + $0x58] sm:$0xff] }
   0x5   :  { %v151_v30 = vmul.f32 %v18_v24, %v18_v24  ;;  %v152_v34 = vmul.f32 %v19_v28, %v19_v28  ;;  %v153_v38 = vmul.f32 %v20_v32, %v20_v32  ;;  %v22_v40 = vld [vmem:[%s499_s0 + $0x60] sm:$0xff]  ;;  %v154_v42 = vmul.f32 %v21_v36, %v21_v36  ;;  %v23_v44 = vld [vmem:[%s499_s0 + $0x68] sm:$0xff]  ;;  %v24_v48 = vld [vmem:[%s499_s0 + $0x70] sm:$0xff] }
   0x6   :  { %v76_v13 = vadd.f32 %v75_v9, %v13_v3  ;;  %v208_v15 = vadd.f32 %v207_v11, %v145_v7  ;;  %v155_v46 = vmul.f32 %v22_v40, %v22_v40  ;;  %v156_v50 = vmul.f32 %v23_v44, %v23_v44  ;;  %v25_v52 = vld [vmem:[%s499_s0 + $0x78] sm:$0xff]  ;;  %v26_v56 = vld [vmem:[%s499_s0 + $0x80] sm:$0xff]  ;;  %v27_v60 = vld [vmem:[%s499_s0 + $0x88] sm:$0xff] }
   0x7   :  { %v157_v54 = vmul.f32 %v24_v48, %v24_v48  ;;  %v158_v58 = vmul.f32 %v25_v52, %v25_v52  ;;  %v159_v62 = vmul.f32 %v26_v56, %v26_v56  ;;  %v28_v0 = vld [vmem:[%s499_s0 + $0x90] sm:$0xff]  ;;  %v160_v2 = vmul.f32 %v27_v60, %v27_v60  ;;  %v29_v4 = vld [vmem:[%s499_s0 + $0x98] sm:$0xff] }
   0x8   :  { %v77_v17 = vadd.f32 %v76_v13, %v14_v8  ;;  %v209_v19 = vadd.f32 %v208_v15, %v146_v10  ;;  %v161_v6 = vmul.f32 %v28_v0, %v28_v0  ;;  %v30_v8 = vld [vmem:[%s499_s0 + $0xa0] sm:$0xff]  ;;  %v162_v10 = vmul.f32 %v29_v4, %v29_v4 }
   0xa   :  { %v78_v21 = vadd.f32 %v77_v17, %v15_v12  ;;  %v210_v23 = vadd.f32 %v209_v19, %v147_v14  ;;  %v31_v12 = vld [vmem:[%s499_s0 + $0xa8] sm:$0xff]  ;;  %v163_v14 = vmul.f32 %v30_v8, %v30_v8 }
   0xc   :  { %v79_v25 = vadd.f32 %v78_v21, %v16_v16  ;;  %v211_v27 = vadd.f32 %v210_v23, %v148_v18  ;;  %v32_v16 = vld [vmem:[%s499_s0 + $0xb0] sm:$0xff]  ;;  %v164_v18 = vmul.f32 %v31_v12, %v31_v12 }
   0xe   :  { %v80_v29 = vadd.f32 %v79_v25, %v17_v20  ;;  %v212_v31 = vadd.f32 %v211_v27, %v149_v22  ;;  %v33_v20 = vld [vmem:[%s499_s0 + $0xb8] sm:$0xff]  ;;  %v165_v22 = vmul.f32 %v32_v16, %v32_v16 }
  0x10   :  { %v81_v33 = vadd.f32 %v80_v29, %v18_v24  ;;  %v213_v35 = vadd.f32 %v212_v31, %v150_v26  ;;  %v34_v24 = vld [vmem:[%s499_s0 + $0xc0] sm:$0xff]  ;;  %v166_v26 = vmul.f32 %v33_v20, %v33_v20 }
  0x12   :  { %v82_v37 = vadd.f32 %v81_v33, %v19_v28  ;;  %v214_v39 = vadd.f32 %v213_v35, %v151_v30  ;;  %v35_v28 = vld [vmem:[%s499_s0 + $0xc8] sm:$0xff]  ;;  %v167_v30 = vmul.f32 %v34_v24, %v34_v24 }
  0x14   :  { %v83_v41 = vadd.f32 %v82_v37, %v20_v32  ;;  %v215_v43 = vadd.f32 %v214_v39, %v152_v34  ;;  %v36_v32 = vld [vmem:[%s499_s0 + $0xd0] sm:$0xff]  ;;  %v168_v34 = vmul.f32 %v35_v28, %v35_v28 }
  0x16   :  { %v84_v45 = vadd.f32 %v83_v41, %v21_v36  ;;  %v216_v47 = vadd.f32 %v215_v43, %v153_v38  ;;  %v37_v36 = vld [vmem:[%s499_s0 + $0xd8] sm:$0xff]  ;;  %v169_v38 = vmul.f32 %v36_v32, %v36_v32 }
  0x18   :  { %v85_v49 = vadd.f32 %v84_v45, %v22_v40  ;;  %v217_v51 = vadd.f32 %v216_v47, %v154_v42  ;;  %v38_v40 = vld [vmem:[%s499_s0 + $0xe0] sm:$0xff]  ;;  %v170_v42 = vmul.f32 %v37_v36, %v37_v36 }
  0x1a   :  { %v86_v53 = vadd.f32 %v85_v49, %v23_v44  ;;  %v218_v55 = vadd.f32 %v217_v51, %v155_v46  ;;  %v39_v44 = vld [vmem:[%s499_s0 + $0xe8] sm:$0xff]  ;;  %v171_v46 = vmul.f32 %v38_v40, %v38_v40 }
  0x1c   :  { %v87_v57 = vadd.f32 %v86_v53, %v24_v48  ;;  %v219_v59 = vadd.f32 %v218_v55, %v156_v50  ;;  %v40_v48 = vld [vmem:[%s499_s0 + $0xf0] sm:$0xff]  ;;  %v172_v50 = vmul.f32 %v39_v44, %v39_v44 }
  0x1e   :  { %v88_v61 = vadd.f32 %v87_v57, %v25_v52  ;;  %v220_v63 = vadd.f32 %v219_v59, %v157_v54  ;;  %v41_v52 = vld [vmem:[%s499_s0 + $0xf8] sm:$0xff]  ;;  %v173_v54 = vmul.f32 %v40_v48, %v40_v48 }
  0x20   :  { %v89_v1 = vadd.f32 %v88_v61, %v26_v56  ;;  %v221_v3 = vadd.f32 %v220_v63, %v158_v58  ;;  %v42_v56 = vld [vmem:[%s499_s0 + $0x100] sm:$0xff]  ;;  %v174_v58 = vmul.f32 %v41_v52, %v41_v52 }
  0x22   :  { %v90_v5 = vadd.f32 %v89_v1, %v27_v60  ;;  %v222_v7 = vadd.f32 %v221_v3, %v159_v62  ;;  %v43_v60 = vld [vmem:[%s499_s0 + $0x108] sm:$0xff]  ;;  %v175_v62 = vmul.f32 %v42_v56, %v42_v56 }
  0x24   :  { %v91_v9 = vadd.f32 %v90_v5, %v28_v0  ;;  %v223_v11 = vadd.f32 %v222_v7, %v160_v2  ;;  %v44_v0 = vld [vmem:[%s499_s0 + $0x110] sm:$0xff]  ;;  %v176_v2 = vmul.f32 %v43_v60, %v43_v60 }
  0x26   :  { %v92_v13 = vadd.f32 %v91_v9, %v29_v4  ;;  %v224_v15 = vadd.f32 %v223_v11, %v161_v6  ;;  %v45_v4 = vld [vmem:[%s499_s0 + $0x118] sm:$0xff]  ;;  %v177_v6 = vmul.f32 %v44_v0, %v44_v0 }
  0x28   :  { %v93_v17 = vadd.f32 %v92_v13, %v30_v8  ;;  %v225_v19 = vadd.f32 %v224_v15, %v162_v10  ;;  %v46_v8 = vld [vmem:[%s499_s0 + $0x120] sm:$0xff]  ;;  %v178_v10 = vmul.f32 %v45_v4, %v45_v4 }
  0x2a   :  { %v94_v21 = vadd.f32 %v93_v17, %v31_v12  ;;  %v226_v23 = vadd.f32 %v225_v19, %v163_v14  ;;  %v47_v12 = vld [vmem:[%s499_s0 + $0x128] sm:$0xff]  ;;  %v179_v14 = vmul.f32 %v46_v8, %v46_v8 }
  0x2c   :  { %v95_v25 = vadd.f32 %v94_v21, %v32_v16  ;;  %v227_v27 = vadd.f32 %v226_v23, %v164_v18  ;;  %v48_v16 = vld [vmem:[%s499_s0 + $0x130] sm:$0xff]  ;;  %v180_v18 = vmul.f32 %v47_v12, %v47_v12 }
  0x2e   :  { %v96_v29 = vadd.f32 %v95_v25, %v33_v20  ;;  %v228_v31 = vadd.f32 %v227_v27, %v165_v22  ;;  %v49_v20 = vld [vmem:[%s499_s0 + $0x138] sm:$0xff]  ;;  %v181_v22 = vmul.f32 %v48_v16, %v48_v16 }
  0x30   :  { %v97_v33 = vadd.f32 %v96_v29, %v34_v24  ;;  %v229_v35 = vadd.f32 %v228_v31, %v166_v26  ;;  %v50_v24 = vld [vmem:[%s499_s0 + $0x140] sm:$0xff]  ;;  %v182_v26 = vmul.f32 %v49_v20, %v49_v20 }
  0x32   :  { %v98_v37 = vadd.f32 %v97_v33, %v35_v28  ;;  %v230_v39 = vadd.f32 %v229_v35, %v167_v30  ;;  %v51_v28 = vld [vmem:[%s499_s0 + $0x148] sm:$0xff]  ;;  %v183_v30 = vmul.f32 %v50_v24, %v50_v24 }
  0x34   :  { %v99_v41 = vadd.f32 %v98_v37, %v36_v32  ;;  %v231_v43 = vadd.f32 %v230_v39, %v168_v34  ;;  %v52_v32 = vld [vmem:[%s499_s0 + $0x150] sm:$0xff]  ;;  %v184_v34 = vmul.f32 %v51_v28, %v51_v28 }
  0x36   :  { %v100_v45 = vadd.f32 %v99_v41, %v37_v36  ;;  %v232_v47 = vadd.f32 %v231_v43, %v169_v38  ;;  %v53_v36 = vld [vmem:[%s499_s0 + $0x158] sm:$0xff]  ;;  %v185_v38 = vmul.f32 %v52_v32, %v52_v32 }
  0x38   :  { %v101_v49 = vadd.f32 %v100_v45, %v38_v40  ;;  %v233_v51 = vadd.f32 %v232_v47, %v170_v42  ;;  %v54_v40 = vld [vmem:[%s499_s0 + $0x160] sm:$0xff]  ;;  %v186_v42 = vmul.f32 %v53_v36, %v53_v36 }
  0x3a   :  { %v102_v53 = vadd.f32 %v101_v49, %v39_v44  ;;  %v234_v55 = vadd.f32 %v233_v51, %v171_v46  ;;  %v55_v44 = vld [vmem:[%s499_s0 + $0x168] sm:$0xff]  ;;  %v187_v46 = vmul.f32 %v54_v40, %v54_v40 }
  0x3c   :  { %v103_v57 = vadd.f32 %v102_v53, %v40_v48  ;;  %v235_v59 = vadd.f32 %v234_v55, %v172_v50  ;;  %v56_v48 = vld [vmem:[%s499_s0 + $0x170] sm:$0xff]  ;;  %v188_v50 = vmul.f32 %v55_v44, %v55_v44 }
  0x3e   :  { %v104_v61 = vadd.f32 %v103_v57, %v41_v52  ;;  %v236_v63 = vadd.f32 %v235_v59, %v173_v54  ;;  %v57_v52 = vld [vmem:[%s499_s0 + $0x178] sm:$0xff]  ;;  %v189_v54 = vmul.f32 %v56_v48, %v56_v48 }
  0x40   :  { %v105_v1 = vadd.f32 %v104_v61, %v42_v56  ;;  %v237_v3 = vadd.f32 %v236_v63, %v174_v58  ;;  %v58_v56 = vld [vmem:[%s499_s0 + $0x180] sm:$0xff]  ;;  %v190_v58 = vmul.f32 %v57_v52, %v57_v52 }
  0x42   :  { %v106_v5 = vadd.f32 %v105_v1, %v43_v60  ;;  %v238_v7 = vadd.f32 %v237_v3, %v175_v62  ;;  %v59_v60 = vld [vmem:[%s499_s0 + $0x188] sm:$0xff]  ;;  %v191_v62 = vmul.f32 %v58_v56, %v58_v56 }
  0x44   :  { %v107_v9 = vadd.f32 %v106_v5, %v44_v0  ;;  %v239_v11 = vadd.f32 %v238_v7, %v176_v2  ;;  %v60_v0 = vld [vmem:[%s499_s0 + $0x190] sm:$0xff]  ;;  %v192_v2 = vmul.f32 %v59_v60, %v59_v60 }
  0x46   :  { %v108_v13 = vadd.f32 %v107_v9, %v45_v4  ;;  %v240_v15 = vadd.f32 %v239_v11, %v177_v6  ;;  %v61_v4 = vld [vmem:[%s499_s0 + $0x198] sm:$0xff]  ;;  %v193_v6 = vmul.f32 %v60_v0, %v60_v0 }
  0x48   :  { %v109_v17 = vadd.f32 %v108_v13, %v46_v8  ;;  %v241_v19 = vadd.f32 %v240_v15, %v178_v10  ;;  %v62_v8 = vld [vmem:[%s499_s0 + $0x1a0] sm:$0xff]  ;;  %v194_v10 = vmul.f32 %v61_v4, %v61_v4 }
  0x4a   :  { %v110_v21 = vadd.f32 %v109_v17, %v47_v12  ;;  %v242_v23 = vadd.f32 %v241_v19, %v179_v14  ;;  %v63_v12 = vld [vmem:[%s499_s0 + $0x1a8] sm:$0xff]  ;;  %v195_v14 = vmul.f32 %v62_v8, %v62_v8 }
  0x4c   :  { %v111_v25 = vadd.f32 %v110_v21, %v48_v16  ;;  %v243_v27 = vadd.f32 %v242_v23, %v180_v18  ;;  %v64_v16 = vld [vmem:[%s499_s0 + $0x1b0] sm:$0xff]  ;;  %v196_v18 = vmul.f32 %v63_v12, %v63_v12 }
  0x4e   :  { %v112_v29 = vadd.f32 %v111_v25, %v49_v20  ;;  %v244_v31 = vadd.f32 %v243_v27, %v181_v22  ;;  %v65_v20 = vld [vmem:[%s499_s0 + $0x1b8] sm:$0xff]  ;;  %v197_v22 = vmul.f32 %v64_v16, %v64_v16 }
  0x50   :  { %v113_v33 = vadd.f32 %v112_v29, %v50_v24  ;;  %v245_v35 = vadd.f32 %v244_v31, %v182_v26  ;;  %v66_v24 = vld [vmem:[%s499_s0 + $0x1c0] sm:$0xff]  ;;  %v198_v26 = vmul.f32 %v65_v20, %v65_v20 }
  0x52   :  { %v114_v37 = vadd.f32 %v113_v33, %v51_v28  ;;  %v246_v39 = vadd.f32 %v245_v35, %v183_v30  ;;  %v67_v28 = vld [vmem:[%s499_s0 + $0x1c8] sm:$0xff]  ;;  %v199_v30 = vmul.f32 %v66_v24, %v66_v24 }
  0x54   :  { %v115_v41 = vadd.f32 %v114_v37, %v52_v32  ;;  %v247_v43 = vadd.f32 %v246_v39, %v184_v34  ;;  %v68_v32 = vld [vmem:[%s499_s0 + $0x1d0] sm:$0xff]  ;;  %v200_v34 = vmul.f32 %v67_v28, %v67_v28 }
  0x56   :  { %v116_v45 = vadd.f32 %v115_v41, %v53_v36  ;;  %v248_v47 = vadd.f32 %v247_v43, %v185_v38  ;;  %v69_v36 = vld [vmem:[%s499_s0 + $0x1d8] sm:$0xff]  ;;  %v201_v38 = vmul.f32 %v68_v32, %v68_v32 }
  0x58   :  { %v117_v49 = vadd.f32 %v116_v45, %v54_v40  ;;  %v249_v51 = vadd.f32 %v248_v47, %v186_v42  ;;  %v70_v40 = vld [vmem:[%s499_s0 + $0x1e0] sm:$0xff]  ;;  %v202_v42 = vmul.f32 %v69_v36, %v69_v36 }
  0x5a   :  { %v118_v53 = vadd.f32 %v117_v49, %v55_v44  ;;  %v250_v55 = vadd.f32 %v249_v51, %v187_v46  ;;  %v71_v44 = vld [vmem:[%s499_s0 + $0x1e8] sm:$0xff]  ;;  %v203_v46 = vmul.f32 %v70_v40, %v70_v40 }
  0x5c   :  { %v119_v57 = vadd.f32 %v118_v53, %v56_v48  ;;  %v251_v59 = vadd.f32 %v250_v55, %v188_v50  ;;  %v72_v48 = vld [vmem:[%s499_s0 + $0x1f0] sm:$0xff]  ;;  %v204_v50 = vmul.f32 %v71_v44, %v71_v44 }
  0x5e   :  { %v120_v61 = vadd.f32 %v119_v57, %v57_v52  ;;  %v252_v63 = vadd.f32 %v251_v59, %v189_v54  ;;  %v73_v52 = vld [vmem:[%s499_s0 + $0x1f8] sm:$0xff]  ;;  %v205_v54 = vmul.f32 %v72_v48, %v72_v48 }
  0x5f   :  { %v206_v57 = vmul.f32 %v73_v52, %v73_v52 }
  0x60   :  { %v121_v1 = vadd.f32 %v120_v61, %v58_v56  ;;  %v253_v3 = vadd.f32 %v252_v63, %v190_v58 }
  0x62   :  { %v122_v5 = vadd.f32 %v121_v1, %v59_v60  ;;  %v254_v7 = vadd.f32 %v253_v3, %v191_v62 }
  0x64   :  { %v123_v9 = vadd.f32 %v122_v5, %v60_v0  ;;  %v255_v11 = vadd.f32 %v254_v7, %v192_v2 }
  0x66   :  { %v124_v13 = vadd.f32 %v123_v9, %v61_v4  ;;  %v256_v15 = vadd.f32 %v255_v11, %v193_v6 }
  0x68   :  { %v125_v17 = vadd.f32 %v124_v13, %v62_v8  ;;  %v257_v19 = vadd.f32 %v256_v15, %v194_v10 }
  0x6a   :  { %v126_v21 = vadd.f32 %v125_v17, %v63_v12  ;;  %v258_v23 = vadd.f32 %v257_v19, %v195_v14 }
  0x6c   :  { %v127_v25 = vadd.f32 %v126_v21, %v64_v16  ;;  %v259_v27 = vadd.f32 %v258_v23, %v196_v18 }
  0x6e   :  { %v128_v29 = vadd.f32 %v127_v25, %v65_v20  ;;  %v260_v31 = vadd.f32 %v259_v27, %v197_v22 }
  0x70   :  { %v129_v33 = vadd.f32 %v128_v29, %v66_v24  ;;  %v261_v35 = vadd.f32 %v260_v31, %v198_v26 }
  0x72   :  { %v130_v37 = vadd.f32 %v129_v33, %v67_v28  ;;  %v262_v39 = vadd.f32 %v261_v35, %v199_v30 }
  0x74   :  { %v131_v41 = vadd.f32 %v130_v37, %v68_v32  ;;  %v263_v43 = vadd.f32 %v262_v39, %v200_v34 }
  0x76   :  { %v132_v45 = vadd.f32 %v131_v41, %v69_v36  ;;  %v264_v47 = vadd.f32 %v263_v43, %v201_v38 }
  0x78   :  { %v133_v49 = vadd.f32 %v132_v45, %v70_v40  ;;  %v265_v51 = vadd.f32 %v264_v47, %v202_v42 }
  0x7a   :  { %v134_v53 = vadd.f32 %v133_v49, %v71_v44  ;;  %v266_v55 = vadd.f32 %v265_v51, %v203_v46 }
  0x7c   :  { %v135_v56 = vadd.f32 %v134_v53, %v72_v48  ;;  %v267_v58 = vadd.f32 %v266_v55, %v204_v50 }
  0x7e   :  { %v136_v59 = vadd.f32 %v135_v56, %v73_v52  ;;  %v268_v60 = vadd.f32 %v267_v58, %v205_v54 }
  0x80   :  { %v137_v61 = vrot.slane %v136_v59, 4  ;;  %v269_v62 = vadd.f32 %v268_v60, %v206_v57 }
  0x82   :  { %v138_v63 = vadd.f32 %v137_v61, %v136_v59  ;;  %v270_v0 = vrot.slane %v269_v62, 4 }
  0x84   :  { %v139_v1 = vrot.slane %v138_v63, 2  ;;  %v271_v2 = vadd.f32 %v270_v0, %v269_v62 }
  0x86   :  { %v140_v3 = vadd.f32 %v139_v1, %v138_v63  ;;  %v272_v4 = vrot.slane %v271_v2, 2 }
  0x88   :  { %v141_v5 = vrot.slane %v140_v3, 1  ;;  %v273_v6 = vadd.f32 %v272_v4, %v271_v2 }
  0x8a   :  { %v142_v7 = vadd.f32 %v141_v5, %v140_v3  ;;  %v274_v8 = vrot.slane %v273_v6, 1 }
  0x8c   :  { %276 = vst [vmem:[%s500_s1] sm:$0xff] %v142_v7  ;;  %v275_v9 = vadd.f32 %v274_v8, %v273_v6 }
  0x8e   :  { %277 = vst [vmem:[%s501_s2] sm:$0xff] %v275_v9 }

// kernel: res_block_forward.3
= control target key start
LH: loop header
LB: loop body
LE: loop exit
PB: predicated region body
PF: predicated region fallthrough
CT: control target
= control target key end

     0   :  { %s6170_s18 = smov 0   ;;  %s7895_s0 = inlined_call_operand.vmem [shape: bf16[2,256,128], index: 0, kind: input, shape index: {}]   ;;  %s7896_s1 = inlined_call_operand.vmem [shape: f32[1,128], index: 1, kind: input, shape index: {}]   ;;  %s7897_s2 = inlined_call_operand.vmem [shape: f32[1,128], index: 2, kind: input, shape index: {}]   ;;  %s7898_s3 = inlined_call_operand.vmem [shape: bf16[9,128,128], index: 3, kind: input, shape index: {}]   ;;  %s7899_s4 = inlined_call_operand.vmem [shape: f32[1,128], index: 4, kind: input, shape index: {}]   ;;  %s7900_s5 = inlined_call_operand.vmem [shape: f32[2,288,128], index: 5, kind: output, shape index: {}]  }
   0x1 LB: > { %s4839_s19 = sadd.s32 4294967295, %s6137_s18   ;;  %p4843_p0 = scmp.ge.s32.totalorder %s6137_s18, 1  ;;  %s6137_s18 = sphi %s6170_s18, %s15_s18  }
   0x2   : > { %p187_p1 = scmp.lt.s32.totalorder %s6137_s18, 3 }
   0x4   : > { %p188_p2 = pnand %p4843_p0, %p187_p1 }
   0x6   : > { %191 = sbr.rel (%p188_p2) target bundleno = 652 (0x28c), region = 40 }
   0xb   : > { %v5986_v0 = vld [vmem:[%s7898_s3 + $0x78] sm:$0xff]   ;;  %p215_p3 = scmp.lt.s32.totalorder %s4839_s19, 1  ;;  %v5987_v1 = vld [vmem:[%s7898_s3 + $0x70] sm:$0xff]   ;;  %v6139_v2 = vmov 0   ;;  %v5988_v3 = vld [vmem:[%s7898_s3 + $0x68] sm:$0xff]   ;;  %vm579_vm0 = vcmask 1043456  }
   0xc   : > { %5960 = vmatprep.subr.bf16.mxu1 %v5986_v0  ;;  %5492 = vmatprep.subr.bf16.mxu0 %v5986_v0  ;;  %242 = vst [vmem:[#allocation2 + $0x40] sm:$0xf] %v6139_v2  ;;  %243 = vst [vmem:[#allocation2 + $0x44] sm:$0xf] %v6139_v2  ;;  %v5989_v4 = vld [vmem:[%s7898_s3 + $0x60] sm:$0xff]   ;;  %v5990_v16 = vld [vmem:[%s7898_s3 + $0x58] sm:$0xff]  }
   0xd   : > { %s7999_s19 = smov (!%p215_p3, %s4839_s19), 1  ;;  %244 = vst [vmem:[#allocation2 + $0x48] sm:$0xf] %v6139_v2  ;;  %245 = vst [vmem:[#allocation2 + $0x4c] sm:$0xf] %v6139_v2  ;;  %5968 = vmatpush3.bf16.msra.mxu1 %v5986_v0  ;;  %5493 = vmatpush3.bf16.msra.mxu0 %v5986_v0  ;;  %vm618_vm2 = vcmask 1040384  }
   0xe   : > { %226 = vst [vmem:[#allocation2] sm:$0xf] %v6139_v2  ;;  %227 = vst [vmem:[#allocation2 + $0x4] sm:$0xf] %v6139_v2  ;;  %5961 = vmatprep.subr.bf16.mxu1 %v5987_v1  ;;  %5494 = vmatprep.subr.bf16.mxu0 %v5987_v1  ;;  %s5146_s26 = sshll.u32 %s7999_s19, 7  ;;  %v5991_v29 = vld [vmem:[%s7898_s3 + $0x50] sm:$0xff]  }
   0xf   : > { %228 = vst [vmem:[#allocation2 + $0x8] sm:$0xf] %v6139_v2  ;;  %229 = vst [vmem:[#allocation2 + $0xc] sm:$0xf] %v6139_v2  ;;  %s6193_s29 = scalar_lea.vmem %s7895_s0, %s5146_s26  ;;  %v6203_v7 = vld [vmem:[%s7896_s1] ss:$0 sm:$0xff] }
  0x10   : > { %230 = vst [vmem:[#allocation2 + $0x10] sm:$0xf] %v6139_v2  ;;  %231 = vst [vmem:[#allocation2 + $0x14] sm:$0xf] %v6139_v2  ;;  %v5248_v5 = vld [vmem:[%s6193_s29 + $0x30] sm:$0xff]   ;;  %v5249_v6 = vld [vmem:[%s6193_s29 + $0x38] sm:$0xff]  }
  0x11   : > { %232 = vst [vmem:[#allocation2 + $0x18] sm:$0xf] %v6139_v2  ;;  %233 = vst [vmem:[#allocation2 + $0x1c] sm:$0xf] %v6139_v2  ;;  %5969 = vmatpush3.bf16.msra.mxu1 %v5987_v1  ;;  %5495 = vmatpush3.bf16.msra.mxu0 %v5987_v1  ;;  %v5205_v8 = vunpack.c.l.bf16 %v5248_v5  ;;  %v5206_v9 = vunpack.c.h.bf16 %v5248_v5  ;;  %v5209_v10 = vunpack.c.l.bf16 %v5249_v6  ;;  %v5210_v11 = vunpack.c.h.bf16 %v5249_v6  ;;  %v6208_v12 = vld [vmem:[%s7897_s2] ss:$0 sm:$0xff] }
  0x12   : > { %234 = vst [vmem:[#allocation2 + $0x20] sm:$0xf] %v6139_v2  ;;  %235 = vst [vmem:[#allocation2 + $0x24] sm:$0xf] %v6139_v2  ;;  %5962 = vmatprep.subr.bf16.mxu1 %v5988_v3  ;;  %5496 = vmatprep.subr.bf16.mxu0 %v5988_v3  ;;  %vm547_vm1 = vsmask.f32 3328 }
  0x13   : > { %236 = vst [vmem:[#allocation2 + $0x28] sm:$0xf] %v6139_v2  ;;  %237 = vst [vmem:[#allocation2 + $0x2c] sm:$0xf] %v6139_v2  ;;  %v351_v13 = vmul.f32 %v5205_v8, %v6203_v7  ;;  %v352_v14 = vmul.f32 %v5206_v9, %v6203_v7  ;;  %v353_v15 = vmul.f32 %v5209_v10, %v6203_v7  ;;  %vm548_vm3 = vsmask.f32 7440 }
  0x14   : > { %238 = vst [vmem:[#allocation2 + $0x30] sm:$0xf] %v6139_v2  ;;  %239 = vst [vmem:[#allocation2 + $0x34] sm:$0xf] %v6139_v2  ;;  %v354_v17 = vmul.f32 %v5210_v11, %v6203_v7  ;;  %vm589_vm4 = vsmask.f32 256 }
  0x15   : > { %240 = vst [vmem:[#allocation2 + $0x38] sm:$0xf] %v6139_v2  ;;  %241 = vst [vmem:[#allocation2 + $0x3c] sm:$0xf] %v6139_v2  ;;  %5970 = vmatpush3.bf16.msra.mxu1 %v5988_v3  ;;  %5497 = vmatpush3.bf16.msra.mxu0 %v5988_v3  ;;  %v390_v18 = vadd.f32 %v6208_v12, %v351_v13  ;;  %v391_v19 = vadd.f32 %v6208_v12, %v352_v14  ;;  %v5250_v21 = vld [vmem:[%s6193_s29 + $0x40] sm:$0xff]   ;;  %v5992_v42 = vld [vmem:[%s7898_s3 + $0x48] sm:$0xff]  }
  0x16   : > { %246 = vst [vmem:[#allocation2 + $0x50] sm:$0xf] %v6139_v2  ;;  %247 = vst [vmem:[#allocation2 + $0x54] sm:$0xf] %v6139_v2  ;;  %5963 = vmatprep.subr.bf16.mxu1 %v5989_v4  ;;  %5498 = vmatprep.subr.bf16.mxu0 %v5989_v4  ;;  %v392_v20 = vadd.f32 %v6208_v12, %v353_v15  ;;  %v393_v22 = vadd.f32 %v6208_v12, %v354_v17  ;;  %vm590_vm5 = vsmask.f32 4368  ;;  %v5213_v23 = vunpack.c.l.bf16 %v5250_v21 }
  0x17   : > { %248 = vst [vmem:[#allocation2 + $0x58] sm:$0xf] %v6139_v2  ;;  %249 = vst [vmem:[#allocation2 + $0x5c] sm:$0xf] %v6139_v2  ;;  %v5214_v24 = vunpack.c.h.bf16 %v5250_v21  ;;  %v5180_v25 = vld [vmem:[%s6193_s29] sm:$0xff]   ;;  %v422_v26 = vmax.f32 %v390_v18, 0.0 }
  0x18   : > { %250 = vst [vmem:[#allocation2 + $0x60] sm:$0xf] %v6139_v2  ;;  %251 = vst [vmem:[#allocation2 + $0x64] sm:$0xf] %v6139_v2  ;;  %v423_v27 = vmax.f32 %v391_v19, 0.0  ;;  %v424_v28 = vmax.f32 %v392_v20, 0.0  ;;  %v355_v31 = vmul.f32 %v5213_v23, %v6203_v7  ;;  %v5181_v33 = vunpack.c.l.bf16 %v5180_v25 }
  0x19   : > { %252 = vst [vmem:[#allocation2 + $0x68] sm:$0xf] %v6139_v2  ;;  %253 = vst [vmem:[#allocation2 + $0x6c] sm:$0xf] %v6139_v2  ;;  %5971 = vmatpush3.bf16.msra.mxu1 %v5989_v4  ;;  %5499 = vmatpush3.bf16.msra.mxu0 %v5989_v4  ;;  %vm612_vm6 = vsmask.f32 7938  ;;  %v356_v32 = vmul.f32 %v5214_v24, %v6203_v7  ;;  %v5159_v34 = vpack.c.bf16 %v422_v26, %v422_v26  ;;  %v5182_v37 = vunpack.c.h.bf16 %v5180_v25 }
  0x1a   : > { %254 = vst [vmem:[#allocation2 + $0x70] sm:$0xf] %v6139_v2  ;;  %255 = vst [vmem:[#allocation2 + $0x74] sm:$0xf] %v6139_v2  ;;  %5964 = vmatprep.subr.bf16.mxu1 %v5990_v16  ;;  %5500 = vmatprep.subr.bf16.mxu0 %v5990_v16  ;;  %v425_v30 = vmax.f32 %v393_v22, 0.0  ;;  %v5160_v35 = vpack.c.bf16 %v423_v27, %v423_v27  ;;  %v5161_v36 = vpack.c.bf16 %v424_v28, %v424_v28  ;;  %vm488_vm7 = vcmask 1043457  }
  0x1b   : > { %256 = vst [vmem:[#allocation2 + $0x78] sm:$0xf] %v6139_v2  ;;  %257 = vst [vmem:[#allocation2 + $0x7c] sm:$0xf] %v6139_v2  ;;  %v394_v39 = vadd.f32 %v6208_v12, %v355_v31  ;;  %v395_v40 = vadd.f32 %v6208_v12, %v356_v32  ;;  %v339_v41 = vmul.f32 %v5181_v33, %v6203_v7  ;;  %v697_v43 = vshll.u32 %v5159_v34, 16  ;;  %v6235_v47 = vld [vmem:[%s6193_s29 + $0x8] sm:$0xff]  }
  0x1c   : > { %258 = vst [vmem:[#allocation2 + $0x80] sm:$0xf] %v6139_v2  ;;  %259 = vst [vmem:[#allocation2 + $0x84] sm:$0xf] %v6139_v2  ;;  %v5162_v38 = vpack.c.bf16 %v425_v30, %v425_v30  ;;  %v700_v44 = vshrl.u32 %v5159_v34, 16  ;;  %v706_v45 = vshll.u32 %v5160_v35, 16  ;;  %v340_v5 = vmul.f32 %v5182_v37, %v6203_v7 }
  0x1d   : > { %260 = vst [vmem:[#allocation2 + $0x88] sm:$0xf] %v6139_v2  ;;  %261 = vst [vmem:[#allocation2 + $0x8c] sm:$0xf] %v6139_v2  ;;  %5972 = vmatpush3.bf16.msra.mxu1 %v5990_v16  ;;  %5501 = vmatpush3.bf16.msra.mxu0 %v5990_v16  ;;  %v710_v46 = vshrl.u32 %v5160_v35, 16  ;;  %v731_v49 = vshrl.u32 %v5161_v36, 16  ;;  %v5185_v6 = vunpack.c.l.bf16 %v6235_v47  ;;  %v378_v23 = vadd.f32 %v6208_v12, %v339_v41 }
  0x1e   : > { %262 = vst [vmem:[#allocation2 + $0x90] sm:$0xf] %v6139_v2  ;;  %263 = vst [vmem:[#allocation2 + $0x94] sm:$0xf] %v6139_v2  ;;  %vm489_vm8 = vsmask.f32 7942  ;;  %5965 = vmatprep.subr.bf16.mxu1 %v5991_v29  ;;  %5502 = vmatprep.subr.bf16.mxu0 %v5991_v29  ;;  %v379_v32 = vadd.f32 %v6208_v12, %v340_v5 }
  0x1f   : > { %264 = vst [vmem:[#allocation2 + $0x98] sm:$0xf] %v6139_v2  ;;  %265 = vst [vmem:[#allocation2 + $0x9c] sm:$0xf] %v6139_v2  ;;  %v734_v50 = vshll.u32 %v5161_v36, 16  ;;  %v739_v51 = vshrl.u32 %v5162_v38, 16 }
  0x20   : > { %266 = vst [vmem:[#allocation2 + $0xa0] sm:$0xf] %v6139_v2  ;;  %vm6239_vm9 = vmand %vm579_vm0, %vm547_vm1  ;;  %v742_v52 = vshll.u32 %v5162_v38, 16  ;;  %v6249_v54 = vrot.slane %v697_v43, 5  ;;  %v702_v55 = vrot.slane %v700_v44, 4  ;;  %v708_v56 = vrot.slane %v706_v45, 5 }
  0x21   : > { %vm6245_vm10 = vmor %vm589_vm4, %vm590_vm5  ;;  %v712_v57 = vrot.slane %v710_v46, 4  ;;  %vm463_vm11 = vsmask.f32 1280  ;;  %vm464_vm12 = vsmask.f32 5392  ;;  %v6254_v58 = vld [vmem:[%s7898_s3 + $0x40] sm:$0xff]   ;;  %5973 = vmatpush3.bf16.msra.mxu1 %v5991_v29  ;;  %5503 = vmatpush3.bf16.msra.mxu0 %v5991_v29 }
  0x22   : > { %vm6258_vm13 = vmand %vm579_vm0, %vm612_vm6  ;;  %v733_v60 = vrot.slane %v731_v49, 7  ;;  %v741_v61 = vrot.slane %v739_v51, 7  ;;  %v426_v62 = vmax.f32 %v394_v39, 0.0  ;;  %v427_v63 = vmax.f32 %v395_v40, 0.0  ;;  %v750_v3 = vld [vmem:[#allocation2 + $0x48] sm:$0xf]  ;;  %5966 = vmatprep.subr.bf16.mxu1 %v5992_v42  ;;  %5504 = vmatprep.subr.bf16.mxu0 %v5992_v42 }
  0x23   : > { %vm6264_vm14 = vmand %vm618_vm2, %vm589_vm4  ;;  %v703_v1 = vor.u32 %v702_v55, %v6249_v54  ;;  %v713_v2 = vor.u32 %v712_v57, %v708_v56  ;;  %v754_v4 = vld [vmem:[#allocation2 + $0x50] sm:$0x1]  ;;  %v722_v9 = vld [vmem:[#allocation2 + $0x44] sm:$0xf]  ;;  %v410_v33 = vmax.f32 %v378_v23, 0.0  ;;  %v5186_v39 = vunpack.c.h.bf16 %v6235_v47 }
  0x24   : > { %vm6273_vm15 = vmor %vm547_vm1, %vm548_vm3  ;;  %v736_v10 = vor.u32 %v734_v50, %v733_v60  ;;  %v737_v11 = vrot.slane %v733_v60, 4  ;;  %v744_v13 = vor.u32 %v742_v52, %v741_v61  ;;  %v746_v14 = vrot.slane %v741_v61, 4  ;;  %v1025_v19 = vld [vmem:[#allocation2] sm:$0xf]  ;;  %v1026_v24 = vld [vmem:[#allocation2 + $0x4] sm:$0xf] }
  0x25   : > { %v704_v15 = vrot.slane %v703_v1, 4  ;;  %v714_v16 = vrot.slane %v713_v2, 4  ;;  %v5163_v17 = vpack.c.bf16 %v426_v62, %v426_v62  ;;  %v5164_v18 = vpack.c.bf16 %v427_v63, %v427_v63  ;;  %5974 = vmatpush3.bf16.msra.mxu1 %v5992_v42  ;;  %5505 = vmatpush3.bf16.msra.mxu0 %v5992_v42  ;;  %v6292_v29 = vld [vmem:[%s7898_s3 + $0x38] sm:$0xff]   ;;  %v784_v37 = vld [vmem:[#allocation2 + $0x50] sm:$0xe]  ;;  %vm6306_vm0 = vmand %vm488_vm7, %vm489_vm8 }
  0x26   : > { %v745_v20 = vsel %vm6245_vm10, %v737_v11, %v744_v13  ;;  %v751_v21 = vsel %vm6258_vm13, %v736_v10, %v750_v3  ;;  %v755_v22 = vsel %vm6264_vm14, %v746_v14, %v754_v4  ;;  %5967 = vmatprep.subr.bf16.mxu1 %v6254_v58  ;;  %5506 = vmatprep.subr.bf16.mxu0 %v6254_v58  ;;  %v6299_v34 = vld [vmem:[%s7898_s3 + $0xb8] sm:$0xff]   ;;  %v411_v43 = vmax.f32 %v379_v32, 0.0  ;;  %v6311_v45 = vld [vmem:[%s6193_s29 + $0x48] sm:$0xff]   ;;  %vm6321_vm3 = vmor %vm463_vm11, %vm464_vm12 }
  0x27   : > { %v709_v25 = vsel %vm6273_vm15, %v704_v15, %v708_v56  ;;  %v723_v26 = vsel %vm6239_vm9, %v714_v16, %v722_v9  ;;  %752 = vst [vmem:[#allocation2 + $0x48] sm:$0xf] %v751_v21  ;;  %753 = vst [vmem:[#allocation2 + $0x4c] sm:$0xf] %v745_v20  ;;  %v763_v27 = vshrl.u32 %v5163_v17, 16  ;;  %v766_v28 = vshll.u32 %v5163_v17, 16 }
  0x28   : > { %756 = vst [vmem:[#allocation2 + $0x50] sm:$0x1] %v755_v22  ;;  %721 = vst [vmem:[#allocation2 + $0x40] sm:$0xf] %v709_v25  ;;  %v772_v30 = vshrl.u32 %v5164_v18, 16  ;;  %v775_v31 = vshll.u32 %v5164_v18, 16  ;;  %v6301_v38 = vcombine.low %v1025_v19, %v1026_v24  ;;  %v5147_v44 = vpack.c.bf16 %v410_v33, %v410_v33 }
  0x29   : > { %724 = vst [vmem:[#allocation2 + $0x44] sm:$0xf] %v723_v26  ;;  %v765_v35 = vrot.slane %v763_v27, 6  ;;  %v768_v36 = vrot.slane %v766_v28, 7  ;;  %vm495_vm1 = vcmask 1041408   ;;  %5975 = vmatpush3.bf16.msra.mxu1 %v6254_v58  ;;  %5507 = vmatpush3.bf16.msra.mxu0 %v6254_v58  ;;  %v341_v50 = vmul.f32 %v5185_v6, %v6203_v7 }
  0x2a   : > { %v774_v41 = vrot.slane %v772_v30, 6  ;;  %v777_v42 = vrot.slane %v775_v31, 7  ;;  %v1190_v47 = vshrl.u32 %v6301_v38, 16  ;;  %v1192_v49 = vshll.u32 %v6301_v38, 16  ;;  %5544 = vmatprep.subr.bf16.mxu1 %v6292_v29  ;;  %5596 = vmatprep.subr.bf16.mxu0 %v6299_v34  ;;  %v491_v16 = vld [vmem:[#allocation2 + $0x8] sm:$0xe]  ;;  %vm6347_vm5 = vmand %vm495_vm1, %vm463_vm11 }
  0x2b   : > { %v769_v46 = vor.u32 %v768_v36, %v765_v35  ;;  %vm7901_vm2 = vsmask.f32 7424  ;;  %v5148_v55 = vpack.c.bf16 %v411_v43, %v411_v43  ;;  %v467_v56 = vshrl.u32 %v5147_v44, 16  ;;  %v497_v32 = vld [vmem:[#allocation2 + $0x10] sm:$0x3] }
  0x2c   : > { %v6325_v52 = vor.u32 %v777_v42, %v774_v41  ;;  %v470_v57 = vshll.u32 %v5147_v44, 16  ;;  %v6330_v61 = vrot.slane %v1192_v49, 1  ;;  %v342_v62 = vmul.f32 %v5186_v39, %v6203_v7  ;;  %v6122_v8 = vld [vmem:[#allocation2 + $0x4] sm:$0xf] }
  0x2d   : > { %v770_v58 = vrot.slane %v769_v46, 4  ;;  %v785_v60 = vsel %vm6306_vm0, %v769_v46, %v784_v37  ;;  %v469_v1 = vrot.slane %v467_v56, 6  ;;  %v380_v2 = vadd.f32 %v6208_v12, %v341_v50 }
  0x2e   : > { %v5995_v63 = vld [vmem:[#allocation2 + $0x48] sm:$0xff]   ;;  %786 = vst [vmem:[#allocation2 + $0x50] sm:$0xe] %v785_v60  ;;  %v5217_v3 = vunpack.c.l.bf16 %v6311_v45  ;;  %v472_v6 = vrot.slane %v470_v57, 7  ;;  %v381_v9 = vadd.f32 %v6208_v12, %v342_v62  ;;  %v5218_v10 = vunpack.c.h.bf16 %v6311_v45  ;;  %v5252_v45 = vld [vmem:[%s6193_s29 + $0x50] sm:$0xff]  }
  0x2f   : > { %v779_v5 = vsel %vm6321_vm3, %v770_v58, %v6325_v52  ;;  %v1261_v11 = vshll.u32 %v5995_v63, 16  ;;  %v1265_v13 = vshrl.u32 %v5995_v63, 16  ;;  %v476_v14 = vshrl.u32 %v5148_v55, 16  ;;  %v533_v60 = vld [vmem:[#allocation2 + $0x10] sm:$0xc]  ;;  %v6877_v53 = vld [vmem:[#allocation2 + $0x48] sm:$0xff]  }
  0x30   : > { %v5994_v4 = vld [vmem:[#allocation2 + $0x40] sm:$0xff]   ;;  %787 = vst [vmem:[#allocation2 + $0x54] sm:$0xf] %v779_v5  ;;  %v479_v15 = vshll.u32 %v5148_v55, 16  ;;  %v473_v19 = vor.u32 %v472_v6, %v469_v1  ;;  %v412_v20 = vmax.f32 %v380_v2, 0.0  ;;  %v413_v24 = vmax.f32 %v381_v9, 0.0 }
  0x31   : > { %v1253_v17 = vshll.u32 %v5994_v4, 16  ;;  %v1257_v18 = vshrl.u32 %v5994_v4, 16  ;;  %v1263_v21 = vrot.slane %v1261_v11, 1  ;;  %v478_v22 = vrot.slane %v476_v14, 6  ;;  %v788_v5 = vld [vmem:[#allocation2 + $0x58] sm:$0x3] }
  0x32   : > { %v481_v23 = vrot.slane %v479_v15, 7  ;;  %v474_v26 = vrot.slane %v473_v19, 4  ;;  %v492_v27 = vsel %vm6306_vm0, %v473_v19, %v491_v16  ;;  %v5149_v28 = vpack.c.bf16 %v412_v20, %v412_v20  ;;  %v5244_v19 = vld [vmem:[%s6193_s29 + $0x10] sm:$0xff]  }
  0x33   : > { %v6340_v25 = vrot.slane %v1253_v17, 1  ;;  %v1267_v30 = vor.u32 %v1265_v13, %v1263_v21  ;;  %493 = vst [vmem:[#allocation2 + $0x8] sm:$0xe] %v492_v27  ;;  %v5150_v33 = vpack.c.bf16 %v413_v24, %v413_v24  ;;  %vm505_vm4 = vsmask.f32 2304 }
  0x34   : > { %v482_v31 = vor.u32 %v481_v23, %v478_v22  ;;  %vm506_vm6 = vsmask.f32 6416  ;;  %v509_v37 = vshrl.u32 %v5149_v28, 16  ;;  %v512_v39 = vshll.u32 %v5149_v28, 16 }
  0x35   : > { %v1259_v35 = vor.u32 %v1257_v18, %v6340_v25  ;;  %v518_v43 = vshrl.u32 %v5150_v33, 16  ;;  %v521_v44 = vshll.u32 %v5150_v33, 16  ;;  %vm530_vm7 = vcmask 1043458   ;;  %vm6371_vm12 = vmor %vm505_vm4, %vm506_vm6 }
  0x36   : > { %v483_v41 = vsel %vm6321_vm3, %v474_v26, %v482_v31  ;;  %v484_v42 = vrot.slane %v482_v31, 4  ;;  %v511_v50 = vrot.slane %v509_v37, 5  ;;  %v514_v55 = vrot.slane %v512_v39, 6  ;;  %v6006_v31 = vld [vmem:[%s7898_s3 + $0x28] sm:$0xff]  }
  0x37   : > { %v1264_v46 = vsel %vm7901_vm2, %v1259_v35, %v1263_v21  ;;  %v6355_v49 = vld [vmem:[#allocation2 + $0x50] sm:$0xff]   ;;  %494 = vst [vmem:[#allocation2 + $0xc] sm:$0xf] %v483_v41  ;;  %v520_v57 = vrot.slane %v518_v43, 5  ;;  %v523_v58 = vrot.slane %v521_v44, 6  ;;  %v357_v2 = vmul.f32 %v5217_v3, %v6203_v7 }
  0x38   : > { %5524 = vmatprep.mubr.bf16.mxu1 %v1264_v46  ;;  %v498_v56 = vsel %vm6347_vm5, %v484_v42, %v497_v32  ;;  %vm531_vm8 = vsmask.f32 7946  ;;  %v1269_v62 = vshll.u32 %v6355_v49, 16  ;;  %v515_v63 = vor.u32 %v514_v55, %v511_v50  ;;  %v818_v50 = vld [vmem:[#allocation2 + $0x58] sm:$0xc] }
  0x39   : > { %499 = vst [vmem:[#allocation2 + $0x10] sm:$0x3] %v498_v56  ;;  %vm6360_vm11 = vmand %vm530_vm7, %vm531_vm8  ;;  %v358_v4 = vmul.f32 %v5218_v10, %v6203_v7  ;;  %v1195_v6 = vor.u32 %v6330_v61, %v1190_v47  ;;  %v6375_v11 = vor.u32 %v523_v58, %v520_v57  ;;  %v780_v13 = vrot.slane %v6325_v52, 4  ;;  %v6001_v47 = vld [vmem:[%s7898_s3 + $0x30] sm:$0xff]   ;;  %v6010_v56 = vld [vmem:[%s7898_s3 + $0x20] sm:$0xff]  }
  0x3a   : > { %v5221_v14 = vunpack.c.l.bf16 %v5252_v45  ;;  %v6378_v3 = vrot.slane %v1269_v62, 1  ;;  %v516_v10 = vrot.slane %v515_v63, 4  ;;  %v534_v15 = vsel %vm6360_vm11, %v515_v63, %v533_v60 }
  0x3b   : > { %v396_v16 = vadd.f32 %v6208_v12, %v357_v2  ;;  %535 = vst [vmem:[#allocation2 + $0x10] sm:$0xc] %v534_v15  ;;  %v397_v61 = vadd.f32 %v6208_v12, %v358_v4  ;;  %v789_v17 = vsel %vm6347_vm5, %v780_v13, %v788_v5  ;;  %v5222_v52 = vunpack.c.h.bf16 %v5252_v45  ;;  %v852_v13 = vld [vmem:[#allocation2 + $0x60] sm:$0x8]  ;;  %v822_v15 = vld [vmem:[#allocation2 + $0x60] sm:$0x7] }
  0x3c   : > { %v359_v18 = vmul.f32 %v5221_v14, %v6203_v7  ;;  %v1272_v20 = vsel %vm7901_vm2, %v1267_v30, %v6378_v3  ;;  %v525_v21 = vsel %vm6371_vm12, %v516_v10, %v6375_v11  ;;  %790 = vst [vmem:[#allocation2 + $0x58] sm:$0x3] %v789_v17  ;;  %v1273_v23 = vshrl.u32 %v6355_v49, 16  ;;  %v6009_v49 = vld [vmem:[%s7898_s3 + $0xa8] sm:$0xff]  }
  0x3d   : > { %v428_v22 = vmax.f32 %v396_v16, 0.0  ;;  %5525 = vmatmul.mubr.bf16.vlgmr.msra.gmra.mxu1 %v1272_v20  ;;  %536 = vst [vmem:[#allocation2 + $0x14] sm:$0xf] %v525_v21  ;;  %v429_v26 = vmax.f32 %v397_v61, 0.0  ;;  %v360_v27 = vmul.f32 %v5222_v52, %v6203_v7  ;;  %vm537_vm1 = vcmask 1042432  }
  0x3e   : > { %v5999_v24 = vld [vmem:[#allocation2 + $0x8] sm:$0xff]   ;;  %v398_v28 = vadd.f32 %v6208_v12, %v359_v18  ;;  %5545 = vmatpush3.bf16.msra.mxu1 %v6292_v29  ;;  %vm572_vm6 = vcmask 1043459   ;;  %vm573_vm7 = vsmask.f32 7950  ;;  %v5189_v32 = vunpack.c.l.bf16 %v5244_v19  ;;  %v539_v20 = vld [vmem:[#allocation2 + $0x18] sm:$0x7] }
  0x3f   : > { %v5165_v30 = vpack.c.bf16 %v428_v22, %v428_v22  ;;  %v1197_v33 = vshll.u32 %v5999_v24, 16  ;;  %v1201_v35 = vshrl.u32 %v5999_v24, 16  ;;  %5546 = vmatprep.subr.bf16.mxu1 %v6001_v47  ;;  %v5166_v37 = vpack.c.bf16 %v429_v26, %v429_v26  ;;  %vm6415_vm8 = vmand %vm572_vm6, %vm573_vm7 }
  0x40   : > { %v399_v39 = vadd.f32 %v6208_v12, %v360_v27  ;;  %v430_v43 = vmax.f32 %v398_v28, 0.0  ;;  %v5190_v44 = vunpack.c.h.bf16 %v5244_v19  ;;  %v343_v62 = vmul.f32 %v5189_v32, %v6203_v7  ;;  %v6432_v28 = vld [vmem:[%s6193_s29 + $0x18] sm:$0xff]  }
  0x41   : > { %v797_v41 = vshrl.u32 %v5165_v30, 16  ;;  %v800_v42 = vshll.u32 %v5165_v30, 16  ;;  %v1199_v45 = vrot.slane %v1197_v33, 1  ;;  %v806_v29 = vshrl.u32 %v5166_v37, 16  ;;  %v6435_v30 = vld [vmem:[%s6193_s29 + $0x58] sm:$0xff]  }
  0x42   : > { %v809_v46 = vshll.u32 %v5166_v37, 16  ;;  %v431_v55 = vmax.f32 %v399_v39, 0.0  ;;  %5547 = vmatpush3.bf16.msra.mxu1 %v6001_v47  ;;  %v5167_v60 = vpack.c.bf16 %v430_v43, %v430_v43  ;;  %v344_v52 = vmul.f32 %v5190_v44, %v6203_v7  ;;  %v6015_v37 = vld [vmem:[%s7898_s3 + $0x18] sm:$0xff]  }
  0x43   : > { %v799_v57 = vrot.slane %v797_v41, 5  ;;  %v802_v58 = vrot.slane %v800_v42, 6  ;;  %v1200_v63 = vsel %vm7901_vm2, %v1195_v6, %v1199_v45  ;;  %v1203_v2 = vor.u32 %v1201_v35, %v1199_v45  ;;  %5548 = vmatprep.subr.bf16.mxu1 %v6006_v31  ;;  %vm6427_vm2 = vmand %vm537_vm1, %vm505_vm4 }
  0x44   : > { %v808_v4 = vrot.slane %v806_v29, 5  ;;  %v811_v5 = vrot.slane %v809_v46, 6  ;;  %5508 = vmatprep.mubr.bf16.mxu0 %v1200_v63  ;;  %v6409_v14 = vld [vmem:[#allocation2 + $0x10] sm:$0xff]   ;;  %v6411_v16 = vpack.c.bf16 %v431_v55, %v431_v55  ;;  %v831_v47 = vshll.u32 %v5167_v60, 16  ;;  %v575_v63 = vld [vmem:[#allocation2 + $0x18] sm:$0x8] }
  0x45   : > { %v803_v10 = vor.u32 %v802_v58, %v799_v57  ;;  %v834_v61 = vshrl.u32 %v5167_v60, 16  ;;  %v382_v18 = vadd.f32 %v6208_v12, %v343_v62  ;;  %v526_v19 = vrot.slane %v6375_v11, 4  ;;  %v6005_v29 = vld [vmem:[%s7898_s3 + $0xb0] sm:$0xff]  }
  0x46   : > { %v812_v17 = vor.u32 %v811_v5, %v808_v4  ;;  %v1205_v21 = vshll.u32 %v6409_v14, 16  ;;  %v833_v27 = vrot.slane %v831_v47, 5  ;;  %5549 = vmatpush3.bf16.msra.mxu1 %v6006_v31  ;;  %v840_v33 = vshll.u32 %v6411_v16, 16 }
  0x47   : > { %v804_v22 = vrot.slane %v803_v10, 4  ;;  %v819_v24 = vsel %vm6360_vm11, %v803_v10, %v818_v50  ;;  %v836_v32 = vrot.slane %v834_v61, 4  ;;  %v383_v35 = vadd.f32 %v6208_v12, %v344_v52  ;;  %5550 = vmatprep.subr.bf16.mxu1 %v6010_v56  ;;  %v6476_v10 = vld [vmem:[%s6193_s29 + $0x60] sm:$0xff]  }
  0x48   : > { %820 = vst [vmem:[#allocation2 + $0x58] sm:$0xc] %v819_v24  ;;  %v814_v11 = vrot.slane %v812_v17, 4  ;;  %v6442_v39 = vrot.slane %v1205_v21, 1  ;;  %v853_v41 = vsel %vm6415_vm8, %v833_v27, %v852_v13  ;;  %v414_v42 = vmax.f32 %v382_v18, 0.0  ;;  %v6013_v24 = vld [vmem:[%s7898_s3 + $0xa0] sm:$0xff]  }
  0x49   : > { %v813_v31 = vsel %vm6371_vm12, %v804_v22, %v812_v17  ;;  %v837_v44 = vor.u32 %v836_v32, %v833_v27  ;;  %v6450_v45 = vrot.slane %v840_v33, 5  ;;  %854 = vst [vmem:[#allocation2 + $0x60] sm:$0x8] %v853_v41  ;;  %v415_v46 = vmax.f32 %v383_v35, 0.0  ;;  %v581_v33 = vld [vmem:[#allocation2 + $0x20] sm:$0xf] }
  0x4a   : > { %821 = vst [vmem:[#allocation2 + $0x5c] sm:$0xf] %v813_v31  ;;  %v823_v43 = vsel %vm6427_vm2, %v814_v11, %v822_v15  ;;  %vm7938_vm4 = vsmask.f32 7424  ;;  %v6460_v55 = vor.u32 %v1273_v23, %v6378_v3  ;;  %v540_v57 = vsel %vm6427_vm2, %v526_v19, %v539_v20  ;;  %5551 = vmatpush3.bf16.msra.mxu1 %v6010_v56  ;;  %v6020_v23 = vld [vmem:[%s7898_s3 + $0x10] sm:$0xff]  }
  0x4b   : > { %v1208_v50 = vsel %vm7938_vm4, %v1203_v2, %v6442_v39  ;;  %824 = vst [vmem:[#allocation2 + $0x60] sm:$0x7] %v823_v43  ;;  %v5151_v58 = vpack.c.bf16 %v414_v42, %v414_v42  ;;  %v838_v60 = vrot.slane %v837_v44, 4  ;;  %541 = vst [vmem:[#allocation2 + $0x18] sm:$0x7] %v540_v57  ;;  %v5152_v62 = vpack.c.bf16 %v415_v46, %v415_v46  ;;  %v6028_v44 = vld [vmem:[%s7898_s3] sm:$0xff]  }
  0x4c   : > { %5509 = vmatmul.mubr.bf16.vlgmr.msra.gmra.mxu0 %v1208_v50  ;;  %v5193_v4 = vunpack.c.l.bf16 %v6432_v28  ;;  %v5225_v3 = vunpack.c.l.bf16 %v6435_v30  ;;  %5552 = vmatprep.subr.bf16.mxu1 %v6015_v37  ;;  %v1209_v5 = vshrl.u32 %v6409_v14, 16  ;;  %v844_v13 = vshrl.u32 %v6411_v16, 16  ;;  %v6024_v14 = vld [vmem:[%s7898_s3 + $0x8] sm:$0xff]   ;;  %vm7939_vm1 = vmmov %vm7938_vm4 }
  0x4d   : > { %5597 = vmatpush3.bf16.msra.mxu0 %v6299_v34  ;;  %v551_v56 = vshll.u32 %v5151_v58, 16  ;;  %v554_v2 = vshrl.u32 %v5151_v58, 16  ;;  %v843_v15 = vsel %vm6273_vm15, %v838_v60, %v6450_v45  ;;  %v560_v47 = vshll.u32 %v5152_v62, 16  ;;  %v856_v31 = vld [vmem:[#allocation2 + $0x68] sm:$0xf]  ;;  %vm7940_vm6 = vmmov %vm7939_vm1 }
  0x4e   : > { %5598 = vmatprep.subr.bf16.mxu0 %v6005_v29  ;;  %v345_v61 = vmul.f32 %v5193_v4, %v6203_v7  ;;  %v564_v17 = vshrl.u32 %v5152_v62, 16  ;;  %855 = vst [vmem:[#allocation2 + $0x64] sm:$0xf] %v843_v15  ;;  %v361_v18 = vmul.f32 %v5225_v3, %v6203_v7  ;;  %v846_v19 = vrot.slane %v844_v13, 4  ;;  %5553 = vmatpush3.bf16.msra.mxu1 %v6015_v37  ;;  %vm7941_vm7 = vmmov %vm7939_vm1 }
  0x4f   : > { %v553_v52 = vrot.slane %v551_v56, 5  ;;  %v556_v34 = vrot.slane %v554_v2, 4  ;;  %v562_v16 = vrot.slane %v560_v47, 5  ;;  %v5226_v22 = vunpack.c.h.bf16 %v6435_v30  ;;  %5554 = vmatprep.subr.bf16.mxu1 %v6020_v23  ;;  %v6505_v2 = vld [vmem:[%s6193_s29 + $0x20] sm:$0xff]   ;;  %vm7942_vm4 = vmmov %vm7939_vm1 }
  0x50   : > { %v384_v20 = vadd.f32 %v6208_v12, %v345_v61  ;;  %v566_v21 = vrot.slane %v564_v17, 4  ;;  %v400_v35 = vadd.f32 %v6208_v12, %v361_v18  ;;  %v847_v37 = vor.u32 %v846_v19, %v6450_v45 }
  0x51   : > { %v6003_v27 = vld [vmem:[#allocation2 + $0x58] sm:$0xff]   ;;  %5599 = vmatpush3.bf16.msra.mxu0 %v6005_v29  ;;  %v557_v11 = vor.u32 %v556_v34, %v553_v52  ;;  %v576_v32 = vsel %vm6415_vm8, %v553_v52, %v575_v63  ;;  %v5229_v42 = vunpack.c.l.bf16 %v6476_v10  ;;  %v362_v43 = vmul.f32 %v5226_v22, %v6203_v7  ;;  %v614_v34 = vld [vmem:[#allocation2 + $0x24] sm:$0xf]  ;;  %v884_v22 = vld [vmem:[#allocation2 + $0x6c] sm:$0xf] }
  0x52   : > { %577 = vst [vmem:[#allocation2 + $0x18] sm:$0x8] %v576_v32  ;;  %v416_v41 = vmax.f32 %v384_v20, 0.0  ;;  %v567_v30 = vor.u32 %v566_v21, %v562_v16  ;;  %5600 = vmatprep.subr.bf16.mxu0 %v6009_v49  ;;  %v1277_v29 = vshll.u32 %v6003_v27, 16  ;;  %v1281_v46 = vshrl.u32 %v6003_v27, 16  ;;  %5555 = vmatpush3.bf16.msra.mxu1 %v6020_v23 }
  0x53   : > { %v558_v50 = vrot.slane %v557_v11, 4  ;;  %v432_v57 = vmax.f32 %v400_v35, 0.0  ;;  %v848_v60 = vrot.slane %v847_v37, 4  ;;  %v363_v62 = vmul.f32 %v5229_v42, %v6203_v7  ;;  %5556 = vmatprep.subr.bf16.mxu1 %v6024_v14  ;;  %v6021_v37 = vld [vmem:[%s7898_s3 + $0x90] sm:$0xff]  }
  0x54   : > { %v568_v45 = vrot.slane %v567_v30, 4  ;;  %v5153_v58 = vpack.c.bf16 %v416_v41, %v416_v41  ;;  %v1279_v63 = vrot.slane %v1277_v29, 1  ;;  %v401_v56 = vadd.f32 %v6208_v12, %v362_v43 }
  0x55   : > { %v563_v4 = vsel %vm6273_vm15, %v558_v50, %v562_v16  ;;  %5601 = vmatpush3.bf16.msra.mxu0 %v6009_v49  ;;  %v5169_v3 = vpack.c.bf16 %v432_v57, %v432_v57  ;;  %v6507_v13 = vld [vmem:[#allocation2 + $0x60] sm:$0xff]   ;;  %v857_v61 = vsel %vm6239_vm9, %v848_v60, %v856_v31  ;;  %v6017_v49 = vld [vmem:[%s7898_s3 + $0x98] sm:$0xff]   ;;  %v6519_v52 = vor.u32 %v1209_v5, %v6442_v39  ;;  %v6023_v60 = vld [vmem:[%s7898_s3 + $0x88] sm:$0xff]  }
  0x56   : > { %578 = vst [vmem:[#allocation2 + $0x1c] sm:$0xf] %v563_v4  ;;  %v582_v23 = vsel %vm6239_vm9, %v568_v45, %v581_v33  ;;  %v593_v15 = vshrl.u32 %v5153_v58, 16  ;;  %v596_v47 = vshll.u32 %v5153_v58, 16  ;;  %5602 = vmatprep.subr.bf16.mxu0 %v6013_v24  ;;  %v1280_v17 = vsel %vm7939_vm1, %v6460_v55, %v1279_v63  ;;  %858 = vst [vmem:[#allocation2 + $0x68] sm:$0xf] %v857_v61 }
  0x57   : > { %583 = vst [vmem:[#allocation2 + $0x20] sm:$0xf] %v582_v23  ;;  %v865_v18 = vshrl.u32 %v5169_v3, 16  ;;  %v868_v19 = vshll.u32 %v5169_v3, 16  ;;  %5557 = vmatpush3.bf16.msra.mxu1 %v6024_v14  ;;  %5528 = vmatprep.mubr.bf16.mxu1 %v1280_v17  ;;  %v1283_v16 = vor.u32 %v1281_v46, %v1279_v63  ;;  %v1285_v20 = vshll.u32 %v6507_v13, 16  ;;  %v6528_v39 = vld [vmem:[%s7898_s3 + $0xf8] sm:$0xff]  }
  0x58   : > { %v6522_v21 = vrot.slane %v593_v15, 7  ;;  %v402_v27 = vadd.f32 %v6208_v12, %v363_v62  ;;  %5558 = vmatprep.subr.bf16.mxu1 %v6028_v44  ;;  %v433_v5 = vmax.f32 %v401_v56, 0.0  ;;  %v5194_v14 = vunpack.c.h.bf16 %v6432_v28  ;;  %v6547_v46 = vld [vmem:[%s6193_s29 + $0x28] sm:$0xff]   ;;  %v6557_v45 = vld [vmem:[%s7896_s1] ss:$0 sm:$0xff] }
  0x59   : > { %v6530_v55 = vrot.slane %v865_v18, 7  ;;  %5603 = vmatpush3.bf16.msra.mxu0 %v6013_v24  ;;  %v5197_v11 = vunpack.c.l.bf16 %v6505_v2  ;;  %v1287_v32 = vrot.slane %v1285_v20, 1  ;;  %v1289_v12 = vshrl.u32 %v6507_v13, 16  ;;  %v888_v62 = vld [vmem:[#allocation2 + $0x74] sm:$0x1] }
  0x5a   : > { %v598_v33 = vor.u32 %v596_v47, %v6522_v21  ;;  %v434_v35 = vmax.f32 %v402_v27, 0.0  ;;  %5604 = vmatprep.subr.bf16.mxu0 %v6017_v49  ;;  %v5170_v41 = vpack.c.bf16 %v433_v5, %v433_v5  ;;  %v346_v24 = vmul.f32 %v5194_v14, %v6203_v7  ;;  %v6566_v3 = vld [vmem:[%s7897_s2] ss:$0 sm:$0xff]  ;;  %v918_v61 = vld [vmem:[#allocation2 + $0x74] sm:$0xe] }
  0x5b   : > { %v870_v31 = vor.u32 %v868_v19, %v6530_v55  ;;  %v599_v28 = vrot.slane %v6522_v21, 4  ;;  %5559 = vmatpush3.bf16.msra.mxu1 %v6028_v44  ;;  %v1288_v30 = vsel %vm7940_vm6, %v1283_v16, %v1287_v32  ;;  %v871_v43 = vrot.slane %v6530_v55, 4 }
  0x5c   : > { %v615_v42 = vsel %vm6258_vm13, %v598_v33, %v614_v34  ;;  %v5171_v29 = vpack.c.bf16 %v434_v35, %v434_v35  ;;  %5648 = vmatprep.subr.bf16.mxu1 %v6528_v39  ;;  %5529 = vmatmul.mubr.bf16.gmra.mxu1 %v1288_v30  ;;  %v873_v44 = vshrl.u32 %v5170_v41, 16  ;;  %v876_v57 = vshll.u32 %v5170_v41, 16 }
  0x5d   : > { %v6550_v50 = vld [vmem:[#allocation2 + $0x18] sm:$0xff]   ;;  %616 = vst [vmem:[#allocation2 + $0x24] sm:$0xf] %v615_v42  ;;  %v885_v7 = vsel %vm6258_vm13, %v870_v31, %v884_v22  ;;  %v347_v58 = vmul.f32 %v6557_v45, %v5197_v11  ;;  %5605 = vmatpush3.bf16.msra.mxu0 %v6017_v49  ;;  %v385_v56 = vadd.f32 %v6566_v3, %v346_v24  ;;  %v5198_v13 = vunpack.c.h.bf16 %v6505_v2  ;;  %v6027_v11 = vld [vmem:[%s7898_s3 + $0x80] sm:$0xff]  }
  0x5e   : > { %886 = vst [vmem:[#allocation2 + $0x6c] sm:$0xf] %v885_v7  ;;  %v897_v63 = vshrl.u32 %v5171_v29, 16  ;;  %v900_v4 = vshll.u32 %v5171_v29, 16  ;;  %5606 = vmatprep.subr.bf16.mxu0 %v6021_v37  ;;  %v1213_v23 = vshll.u32 %v6550_v50, 16  ;;  %v1217_v15 = vshrl.u32 %v6550_v50, 16 }
  0x5f   : > { %v875_v47 = vrot.slane %v873_v44, 7  ;;  %v386_v49 = vadd.f32 %v6566_v3, %v347_v58  ;;  %v417_v18 = vmax.f32 %v385_v56, 0.0  ;;  %v5201_v19 = vunpack.c.l.bf16 %v6547_v46  ;;  %v6603_v58 = vld [vmem:[%s7898_s3 + $0x138] sm:$0xff]  }
  0x60   : > { %v899_v17 = vrot.slane %v897_v63, 6  ;;  %v902_v34 = vrot.slane %v900_v4, 7  ;;  %v1215_v16 = vrot.slane %v1213_v23, 1  ;;  %v348_v5 = vmul.f32 %v6557_v45, %v5198_v13 }
  0x61   : > { %v878_v20 = vor.u32 %v876_v57, %v875_v47  ;;  %v880_v22 = vrot.slane %v875_v47, 4  ;;  %v418_v27 = vmax.f32 %v386_v49, 0.0  ;;  %5607 = vmatpush3.bf16.msra.mxu0 %v6021_v37  ;;  %v5154_v55 = vpack.c.bf16 %v417_v18, %v417_v18 }
  0x62   : > { %v6574_v2 = vor.u32 %v902_v34, %v899_v17  ;;  %v349_v14 = vmul.f32 %v6557_v45, %v5201_v19  ;;  %5608 = vmatprep.subr.bf16.mxu0 %v6023_v60  ;;  %v1216_v33 = vsel %vm7941_vm7, %v6519_v52, %v1215_v16  ;;  %v1291_v35 = vor.u32 %v1289_v12, %v1287_v32  ;;  %v6593_v52 = vld [vmem:[%s6193_s29 + $0x68] sm:$0xff]  }
  0x63   : > { %v879_v37 = vsel %vm6245_vm10, %v871_v43, %v878_v20  ;;  %v889_v31 = vsel %vm6264_vm14, %v880_v22, %v888_v62  ;;  %5512 = vmatprep.mubr.bf16.mxu0 %v1216_v33  ;;  %v601_v30 = vshrl.u32 %v5154_v55, 16  ;;  %v604_v42 = vshll.u32 %v5154_v55, 16  ;;  %v620_v43 = vld [vmem:[#allocation2 + $0x2c] sm:$0x1]  ;;  %v650_v17 = vld [vmem:[#allocation2 + $0x2c] sm:$0xe] }
  0x64   : > { %v6587_v41 = vld [vmem:[#allocation2 + $0x20] sm:$0xff]   ;;  %887 = vst [vmem:[#allocation2 + $0x70] sm:$0xf] %v879_v37  ;;  %890 = vst [vmem:[#allocation2 + $0x74] sm:$0x1] %v889_v31  ;;  %v919_v24 = vsel %vm6306_vm0, %v6574_v2, %v918_v61  ;;  %v5155_v29 = vpack.c.bf16 %v418_v27, %v418_v27  ;;  %v1219_v32 = vor.u32 %v1217_v15, %v1215_v16  ;;  %v5230_v57 = vunpack.c.h.bf16 %v6476_v10 }
  0x65   : > { %v6595_v12 = vld [vmem:[#allocation2 + $0x68] sm:$0xff]   ;;  %920 = vst [vmem:[#allocation2 + $0x74] sm:$0xe] %v919_v24  ;;  %v387_v7 = vadd.f32 %v6566_v3, %v348_v5  ;;  %v388_v44 = vadd.f32 %v6566_v3, %v349_v14  ;;  %5609 = vmatpush3.bf16.msra.mxu0 %v6023_v60  ;;  %v1221_v62 = vshll.u32 %v6587_v41, 16  ;;  %v603_v63 = vrot.slane %v601_v30, 7 }
  0x66   : > { %v629_v4 = vshrl.u32 %v5155_v29, 16  ;;  %v632_v56 = vshll.u32 %v5155_v29, 16  ;;  %5610 = vmatprep.subr.bf16.mxu0 %v6027_v11  ;;  %v1293_v13 = vshll.u32 %v6595_v12, 16  ;;  %v1297_v23 = vshrl.u32 %v6595_v12, 16 }
  0x67   : > { %v419_v15 = vmax.f32 %v387_v7, 0.0  ;;  %v5233_v47 = vunpack.c.l.bf16 %v6593_v52  ;;  %v1223_v10 = vrot.slane %v1221_v62, 1  ;;  %v606_v60 = vor.u32 %v604_v42, %v603_v63  ;;  %v654_v62 = vld [vmem:[#allocation2 + $0x34] sm:$0x3] }
  0x68   : > { %v608_v61 = vrot.slane %v603_v63, 4  ;;  %v631_v49 = vrot.slane %v629_v4, 6  ;;  %v1295_v34 = vrot.slane %v1293_v13, 1  ;;  %v634_v18 = vrot.slane %v632_v56, 7 }
  0x69   : > { %v420_v19 = vmax.f32 %v388_v44, 0.0  ;;  %v5156_v16 = vpack.c.bf16 %v419_v15, %v419_v15  ;;  %5611 = vmatpush3.bf16.msra.mxu0 %v6027_v11  ;;  %v1224_v20 = vsel %vm7942_vm4, %v1219_v32, %v1223_v10  ;;  %v607_v22 = vsel %vm6245_vm10, %v599_v28, %v606_v60 }
  0x6a   : > { %v621_v27 = vsel %vm6264_vm14, %v608_v61, %v620_v43  ;;  %5700 = vmatprep.subr.bf16.mxu0 %v6603_v58  ;;  %5513 = vmatmul.mubr.bf16.gmra.mxu0 %v1224_v20  ;;  %v1296_v55 = vsel %vm7939_vm1, %v1291_v35, %v1295_v34  ;;  %617 = vst [vmem:[#allocation2 + $0x28] sm:$0xf] %v607_v22  ;;  %v6625_v35 = vld [vmem:[%s6193_s29 + $0x70] sm:$0xff]   ;;  %v1225_v44 = vshrl.u32 %v6587_v41, 16  ;;  %v5234_v40 = vunpack.c.h.bf16 %v6593_v52 }
  0x6b   : > { %622 = vst [vmem:[#allocation2 + $0x2c] sm:$0x1] %v621_v27  ;;  %v635_v5 = vor.u32 %v634_v18, %v631_v49  ;;  %v638_v14 = vshrl.u32 %v5156_v16, 16  ;;  %5532 = vmatprep.mubr.bf16.mxu1 %v1296_v55  ;;  %v641_v21 = vshll.u32 %v5156_v16, 16  ;;  %v5157_v33 = vpack.c.bf16 %v420_v19, %v420_v19 }
  0x6c   : > { %v6618_v11 = vld [vmem:[#allocation2 + $0x70] sm:$0xff]   ;;  %v364_v28 = vmul.f32 %v6557_v45, %v5230_v57  ;;  %v365_v37 = vmul.f32 %v6557_v45, %v5233_v47  ;;  %v1299_v31 = vor.u32 %v1297_v23, %v1295_v34  ;;  %v5237_v61 = vunpack.c.l.bf16 %v6625_v35 }
  0x6d   : > { %v651_v24 = vsel %vm6306_vm0, %v635_v5, %v650_v17  ;;  %v636_v30 = vrot.slane %v635_v5, 4  ;;  %v640_v42 = vrot.slane %v638_v14, 6  ;;  %v1301_v29 = vshll.u32 %v6618_v11, 16  ;;  %v684_v57 = vld [vmem:[#allocation2 + $0x34] sm:$0xc]  ;;  %vm7943_vm0 = vmmov %vm7939_vm1 }
  0x6e   : > { %652 = vst [vmem:[#allocation2 + $0x2c] sm:$0xe] %v651_v24  ;;  %v643_v32 = vrot.slane %v641_v21, 7  ;;  %v663_v43 = vshrl.u32 %v5157_v33, 16  ;;  %v666_v7 = vshll.u32 %v5157_v33, 16  ;;  %v403_v63 = vadd.f32 %v6566_v3, %v364_v28  ;;  %vm7944_vm6 = vmmov %vm7943_vm0 }
  0x6f   : > { %v404_v4 = vadd.f32 %v6566_v3, %v365_v37  ;;  %v6632_v56 = vrot.slane %v1301_v29, 1  ;;  %v366_v49 = vmul.f32 %v6557_v45, %v5234_v40  ;;  %v1227_v52 = vor.u32 %v1225_v44, %v1223_v10  ;;  %v718_v21 = vld [vmem:[#allocation2 + $0x3c] sm:$0x8] }
  0x70   : > { %v644_v13 = vor.u32 %v643_v32, %v640_v42  ;;  %v665_v23 = vrot.slane %v663_v43, 5  ;;  %v668_v15 = vrot.slane %v666_v7, 6  ;;  %v435_v47 = vmax.f32 %v403_v63, 0.0  ;;  %v952_v44 = vld [vmem:[#allocation2 + $0x7c] sm:$0xc] }
  0x71   : > { %v436_v60 = vmax.f32 %v404_v4, 0.0  ;;  %v1304_v17 = vsel %vm7943_vm0, %v1299_v31, %v6632_v56  ;;  %v367_v22 = vmul.f32 %v6557_v45, %v5237_v61  ;;  %v405_v5 = vadd.f32 %v6566_v3, %v366_v49 }
  0x72   : > { %v645_v34 = vsel %vm6321_vm3, %v636_v30, %v644_v13  ;;  %v646_v18 = vrot.slane %v644_v13, 4  ;;  %v6640_v19 = vor.u32 %v668_v15, %v665_v23  ;;  %5533 = vmatmul.mubr.bf16.gmra.mxu1 %v1304_v17  ;;  %v5172_v16 = vpack.c.bf16 %v435_v47, %v435_v47  ;;  %v922_v15 = vld [vmem:[#allocation2 + $0x7c] sm:$0x3] }
  0x73   : > { %653 = vst [vmem:[#allocation2 + $0x30] sm:$0xf] %v645_v34  ;;  %v5173_v20 = vpack.c.bf16 %v436_v60, %v436_v60  ;;  %v5202_v14 = vunpack.c.h.bf16 %v6547_v46  ;;  %v406_v31 = vadd.f32 %v6566_v3, %v367_v22  ;;  %v904_v24 = vrot.slane %v6574_v2, 4 }
  0x74   : > { %v655_v27 = vsel %vm6347_vm5, %v646_v18, %v654_v62  ;;  %v685_v55 = vsel %vm6360_vm11, %v6640_v19, %v684_v57  ;;  %v906_v10 = vshrl.u32 %v5172_v16, 16  ;;  %v909_v28 = vshll.u32 %v5172_v16, 16  ;;  %v6665_v16 = vld [vmem:[%s6193_s29 + $0x78] sm:$0xff]   ;;  %s5976_s29 = smul.u32 288, %s7999_s19 }
  0x75   : > { %v6650_v33 = vld [vmem:[#allocation2 + $0x28] sm:$0xff]   ;;  %656 = vst [vmem:[#allocation2 + $0x34] sm:$0x3] %v655_v27  ;;  %686 = vst [vmem:[#allocation2 + $0x34] sm:$0xc] %v685_v55  ;;  %v931_v37 = vshrl.u32 %v5173_v20, 16  ;;  %v350_v29 = vmul.f32 %v6557_v45, %v5202_v14  ;;  %v719_v23 = vsel %vm6415_vm8, %v6249_v54, %v718_v21  ;;  %v5238_v21 = vunpack.c.h.bf16 %v6625_v35 }
  0x76   : > { %v934_v30 = vshll.u32 %v5173_v20, 16  ;;  %v437_v42 = vmax.f32 %v405_v5, 0.0  ;;  %v1229_v32 = vshll.u32 %v6650_v33, 16  ;;  %v1233_v46 = vshrl.u32 %v6650_v33, 16  ;;  %720 = vst [vmem:[#allocation2 + $0x3c] sm:$0x8] %v719_v23  ;;  %s7784_s19 = scalar_lea.vmem %s7900_s5, %s5976_s29 }
  0x77   : > { %v908_v43 = vrot.slane %v906_v10, 6  ;;  %v911_v7 = vrot.slane %v909_v28, 7  ;;  %v933_v62 = vrot.slane %v931_v37, 5  ;;  %v438_v63 = vmax.f32 %v406_v31, 0.0  ;;  %v986_v31 = vld [vmem:[#allocation2 + $0x84] sm:$0x8] }
  0x78   : > { %v936_v57 = vrot.slane %v934_v30, 6  ;;  %v5174_v4 = vpack.c.bf16 %v437_v42, %v437_v42  ;;  %v1231_v40 = vrot.slane %v1229_v32, 1  ;;  %v389_v2 = vadd.f32 %v6566_v3, %v350_v29 }
  0x79   : > { %v912_v13 = vor.u32 %v911_v7, %v908_v43  ;;  %v5175_v49 = vpack.c.bf16 %v438_v63, %v438_v63  ;;  %v368_v42 = vmul.f32 %v6557_v45, %v5238_v21  ;;  %v5241_v36 = vunpack.c.l.bf16 %v6665_v16 }
  0x7a   : > { %v937_v47 = vor.u32 %v936_v57, %v933_v62  ;;  %v940_v60 = vshrl.u32 %v5174_v4, 16  ;;  %v943_v61 = vshll.u32 %v5174_v4, 16  ;;  %v1232_v17 = vsel %vm7944_vm6, %v1227_v52, %v1231_v40  ;;  %v956_v52 = vld [vmem:[#allocation2 + $0x84] sm:$0x7] }
  0x7b   : > { %v913_v34 = vsel %vm6321_vm3, %v904_v24, %v912_v13  ;;  %v914_v18 = vrot.slane %v912_v13, 4  ;;  %5516 = vmatprep.mubr.bf16.mxu0 %v1232_v17  ;;  %v965_v51 = vshll.u32 %v5175_v49, 16  ;;  %v421_v14 = vmax.f32 %v389_v2, 0.0  ;;  %vm7945_vm3 = vmmov %vm7943_vm0  ;;  %v688_v17 = vld [vmem:[#allocation2 + $0x3c] sm:$0x7] }
  0x7c   : > { %v6667_v20 = vld [vmem:[#allocation2 + $0x30] sm:$0xff]   ;;  %921 = vst [vmem:[#allocation2 + $0x78] sm:$0xf] %v913_v34  ;;  %v953_v54 = vsel %vm6360_vm11, %v937_v47, %v952_v44  ;;  %v938_v22 = vrot.slane %v937_v47, 4  ;;  %v942_v27 = vrot.slane %v940_v60, 5  ;;  %v945_v55 = vrot.slane %v943_v61, 6  ;;  %vm7949_vm11 = vmmov %vm7943_vm0 }
  0x7d   : > { %v923_v5 = vsel %vm6347_vm5, %v914_v18, %v922_v15  ;;  %954 = vst [vmem:[#allocation2 + $0x7c] sm:$0xc] %v953_v54  ;;  %v1235_v10 = vor.u32 %v1233_v46, %v1231_v40  ;;  %v1237_v28 = vshll.u32 %v6667_v20, 16  ;;  %v968_v1 = vshrl.u32 %v5175_v49, 16  ;;  %vm7946_vm5 = vmmov %vm7943_vm0 }
  0x7e   : > { %924 = vst [vmem:[#allocation2 + $0x7c] sm:$0x3] %v923_v5  ;;  %v946_v37 = vor.u32 %v945_v55, %v942_v27  ;;  %v967_v24 = vrot.slane %v965_v51, 5  ;;  %v5158_v30 = vpack.c.bf16 %v421_v14, %v421_v14  ;;  %v407_v62 = vadd.f32 %v6566_v3, %v368_v42 }
  0x7f   : > { %v6677_v29 = vrot.slane %v1237_v28, 1  ;;  %v970_v35 = vrot.slane %v968_v1, 4  ;;  %v1305_v63 = vshrl.u32 %v6618_v11, 16  ;;  %v670_v40 = vrot.slane %v6640_v19, 4 }
  0x80   : > { %v947_v32 = vsel %vm6371_vm12, %v938_v22, %v946_v37  ;;  %v948_v43 = vrot.slane %v946_v37, 4  ;;  %v987_v46 = vsel %vm6415_vm8, %v967_v24, %v986_v31  ;;  %v672_v7 = vshrl.u32 %v5158_v30, 16 }
  0x81   : > { %955 = vst [vmem:[#allocation2 + $0x80] sm:$0xf] %v947_v32  ;;  %v675_v44 = vshll.u32 %v5158_v30, 16  ;;  %v1240_v57 = vsel %vm7945_vm3, %v1235_v10, %v6677_v29  ;;  %988 = vst [vmem:[#allocation2 + $0x84] sm:$0x8] %v987_v46  ;;  %v439_v2 = vmax.f32 %v407_v62, 0.0  ;;  %v971_v23 = vor.u32 %v970_v35, %v967_v24 }
  0x82   : > { %v957_v4 = vsel %vm6427_vm2, %v948_v43, %v956_v52  ;;  %5517 = vmatmul.mubr.bf16.gmra.mxu0 %v1240_v57  ;;  %v674_v13 = vrot.slane %v672_v7, 5  ;;  %v369_v15 = vmul.f32 %v6557_v45, %v5241_v36  ;;  %v1307_v49 = vor.u32 %v1305_v63, %v6632_v56  ;;  %v990_v30 = vld [vmem:[#allocation2 + $0x8c] sm:$0xf]  ;;  %v1823_v36 = vld [vmem:[#allocation2] sm:$0xe] }
  0x83   : > { %958 = vst [vmem:[#allocation2 + $0x84] sm:$0x7] %v957_v4  ;;  %v677_v6 = vrot.slane %v675_v44, 6  ;;  %v5176_v61 = vpack.c.bf16 %v439_v2, %v439_v2  ;;  %v972_v22 = vrot.slane %v971_v23, 4  ;;  %v1241_v35 = vshrl.u32 %v6667_v20, 16  ;;  %v6123_v23 = vld [vmem:[#allocation2 + $0x8] sm:$0xff]  }
  0x84   : > { %v408_v34 = vadd.f32 %v6566_v3, %v369_v15  ;;  %v1018_v62 = vld [vmem:[#allocation2 + $0x90] sm:$0xf]  ;;  %v4948_v57 = vcombine.low %v1823_v36, %v6122_v8  ;;  %v1846_v15 = vrot.slane %v6123_v23, 1  ;;  %v6034_v36 = vld [vmem:[%s7898_s3 + $0xe8] sm:$0xff]   ;;  %vm3116_vm8 = vcmask 1045504  }
  0x85   : > { %v6691_v47 = vld [vmem:[#allocation2 + $0x78] sm:$0xff]   ;;  %v678_v60 = vor.u32 %v677_v6, %v674_v13  ;;  %v974_v55 = vshll.u32 %v5176_v61, 16  ;;  %v978_v5 = vshrl.u32 %v5176_v61, 16  ;;  %v1872_v0 = vrot.slane %v6618_v11, 1 }
  0x86   : > { %v1309_v18 = vshll.u32 %v6691_v47, 16  ;;  %v1313_v27 = vshrl.u32 %v6691_v47, 16  ;;  %v440_v52 = vmax.f32 %v408_v34, 0.0  ;;  %v1845_v48 = vrot.slane %v4948_v57, 1  ;;  %v6041_v57 = vld [vmem:[%s7898_s3 + $0x110] sm:$0xff]  }
  0x87   : > { %v679_v19 = vsel %vm6371_vm12, %v670_v40, %v678_v60  ;;  %v680_v54 = vrot.slane %v678_v60, 4  ;;  %v976_v21 = vrot.slane %v974_v55, 5  ;;  %v980_v10 = vrot.slane %v978_v5, 4  ;;  %vm7951_vm12 = vmmov %vm7943_vm0 }
  0x88   : > { %687 = vst [vmem:[#allocation2 + $0x38] sm:$0xf] %v679_v19  ;;  %v1311_v51 = vrot.slane %v1309_v18, 1  ;;  %v5177_v28 = vpack.c.bf16 %v440_v52, %v440_v52  ;;  %v1243_v40 = vor.u32 %v1241_v35, %v6677_v29  ;;  %vm3917_vm7 = vsmask.f32 5376 }
  0x89   : > { %v689_v56 = vsel %vm6427_vm2, %v680_v54, %v688_v17  ;;  %v977_v1 = vsel %vm6273_vm15, %v972_v22, %v976_v21  ;;  %v981_v24 = vor.u32 %v980_v10, %v976_v21  ;;  %vm7947_vm2 = vmmov %vm7943_vm0 }
  0x8a   : > { %v6701_v14 = vld [vmem:[#allocation2 + $0x80] sm:$0xff]   ;;  %690 = vst [vmem:[#allocation2 + $0x3c] sm:$0x7] %v689_v56  ;;  %v1312_v9 = vsel %vm7946_vm5, %v1307_v49, %v1311_v51  ;;  %v1315_v37 = vor.u32 %v1313_v27, %v1311_v51  ;;  %989 = vst [vmem:[#allocation2 + $0x88] sm:$0xf] %v977_v1  ;;  %v999_v26 = vshrl.u32 %v5177_v28, 16 }
  0x8b   : > { %5536 = vmatprep.mubr.bf16.mxu1 %v1312_v9  ;;  %v1317_v31 = vshll.u32 %v6701_v14, 16  ;;  %v1002_v42 = vshll.u32 %v5177_v28, 16  ;;  %v982_v43 = vrot.slane %v981_v24, 4  ;;  %v1321_v61 = vshrl.u32 %v6701_v14, 16  ;;  %vm7948_vm15 = vmmov %vm7943_vm0  ;;  %v6124_v27 = vld [vmem:[#allocation2 + $0x10] sm:$0xff]   ;;  %v6035_v1 = vld [vmem:[%s7898_s3 + $0x128] sm:$0xff]  }
  0x8c   : > { %v6708_v46 = vrot.slane %v999_v26, 7  ;;  %v1848_v55 = vrot.slane %v6124_v27, 1  ;;  %v1850_v51 = vrot.slane %v6550_v50, 1  ;;  %v6033_v28 = vld [vmem:[%s7898_s3 + $0x130] sm:$0xff]   ;;  %v1854_v24 = vrot.slane %v6650_v33, 1 }
  0x8d   : > { %v1319_v32 = vrot.slane %v1317_v31, 1  ;;  %v991_v44 = vsel %vm6239_vm9, %v982_v43, %v990_v30  ;;  %vm1844_vm9 = vcmask 1046528   ;;  %v1852_v31 = vrot.slane %v6587_v41, 1  ;;  %v6032_v26 = vld [vmem:[%s7898_s3 + $0xf0] sm:$0xff]  }
  0x8e   : > { %992 = vst [vmem:[#allocation2 + $0x8c] sm:$0xf] %v991_v44  ;;  %v1004_v4 = vor.u32 %v1002_v42, %v6708_v46  ;;  %v1847_v34 = vsel %vm1844_vm9, %v1845_v48, %v1846_v15  ;;  %v1849_v10 = vsel %vm1844_vm9, %v1846_v15, %v1848_v55  ;;  %v1856_v42 = vrot.slane %v6667_v20, 1  ;;  %v6039_v44 = vld [vmem:[%s7898_s3 + $0x118] sm:$0xff]   ;;  %v6796_v48 = vld [vmem:[#allocation2 + $0xc] sm:$0xf] }
  0x8f   : > { %v1320_v7 = vsel %vm7947_vm2, %v1315_v37, %v1319_v32  ;;  %v1323_v18 = vor.u32 %v1321_v61, %v1319_v32  ;;  %v1851_v37 = vsel %vm1844_vm9, %v1848_v55, %v1850_v51  ;;  %v1853_v30 = vsel %vm1844_vm9, %v1850_v51, %v1852_v31  ;;  %v6045_v61 = vld [vmem:[%s7898_s3 + $0x100] sm:$0xff]  }
  0x90   : > { %5537 = vmatmul.mubr.bf16.gmra.mxu1 %v1320_v7  ;;  %v1019_v2 = vsel %vm6258_vm13, %v1004_v4, %v1018_v62  ;;  %vm7950_vm13 = vmmov %vm7943_vm0  ;;  %v5242_v43 = vunpack.c.h.bf16 %v6665_v16  ;;  %v1857_v35 = vsel %vm1844_vm9, %v1854_v24, %v1856_v42  ;;  %v6774_v62 = vld [vmem:[#allocation2 + $0x40] sm:$0xff]   ;;  %v6780_v4 = vld [vmem:[#allocation2 + $0x48] sm:$0xff]  }
  0x91   : > { %v6713_v63 = vld [vmem:[#allocation2 + $0x38] sm:$0xff]   ;;  %1020 = vst [vmem:[#allocation2 + $0x90] sm:$0xf] %v1019_v2  ;;  %v1860_v8 = vrot.slane %v6774_v62, 1  ;;  %v6043_v2 = vld [vmem:[%s7898_s3 + $0x108] sm:$0xff]  }
  0x92   : > { %v1245_v13 = vshll.u32 %v6713_v63, 16  ;;  %v1249_v6 = vshrl.u32 %v6713_v63, 16  ;;  %v1858_v32 = vrot.slane %v6713_v63, 1  ;;  %v370_v16 = vmul.f32 %v6557_v45, %v5242_v43  ;;  %v6038_v45 = vld [vmem:[%s7898_s3 + $0xd8] sm:$0xff]  }
  0x94   : > { %v1247_v60 = vrot.slane %v1245_v13, 1  ;;  %v1859_v7 = vsel %vm1844_vm9, %v1856_v42, %v1858_v32  ;;  %v6846_v42 = vld [vmem:[#allocation2 + $0x38] sm:$0xff]  }
  0x95   : > { %v6723_v29 = vld [vmem:[#allocation2 + $0x88] sm:$0xff]  }
  0x96   : > { %v1248_v49 = vsel %vm7948_vm15, %v1243_v40, %v1247_v60  ;;  %v1251_v17 = vor.u32 %v1249_v6, %v1247_v60  ;;  %v1325_v19 = vshll.u32 %v6723_v29, 16  ;;  %v1329_v54 = vshrl.u32 %v6723_v29, 16  ;;  %v6040_v6 = vld [vmem:[%s7898_s3 + $0xd0] sm:$0xff]   ;;  %v6042_v60 = vld [vmem:[%s7898_s3 + $0xc8] sm:$0xff]  }
  0x97   : > { %5520 = vmatprep.mubr.bf16.mxu0 %v1248_v49  ;;  %v409_v40 = vadd.f32 %v6566_v3, %v370_v16  ;;  %v6799_v3 = vld [vmem:[#allocation2 + $0x50] sm:$0xff]   ;;  %v3128_v16 = vrot.slane %v6846_v42, 2 }
  0x98   : > { %v1256_v59 = vsel %vm7949_vm11, %v1251_v17, %v6340_v25  ;;  %v6730_v22 = vld [vmem:[#allocation2 + $0x90] ss:$0 sps:$4 sm:$0x11]   ;;  %v1327_v5 = vrot.slane %v1325_v19, 1  ;;  %v1864_v15 = vrot.slane %v6799_v3, 1  ;;  %v6810_v17 = vld [vmem:[#allocation2 + $0x58] sm:$0xff]  }
  0x99   : > { %5521 = vmatmul.mubr.bf16.gmra.mxu0 %v1256_v59  ;;  %v1333_v52 = vshll.u32 %v6730_v22, 16  ;;  %v441_v49 = vmax.f32 %v409_v40, 0.0  ;;  %v6815_v59 = vld [vmem:[#allocation2 + $0x20] sm:$0xff]   ;;  %v1874_v40 = vrot.slane %v6691_v47, 1 }
  0x9a   : > { %5612 = vmatprep.mubr.bf16.mxu0 %v1847_v34  ;;  %v1328_v56 = vsel %vm7950_vm13, %v1323_v18, %v1327_v5  ;;  %v1331_v21 = vor.u32 %v1329_v54, %v1327_v5  ;;  %v6813_v34 = vld [vmem:[#allocation2 + $0x18] sm:$0xff]   ;;  %v6818_v54 = vld [vmem:[#allocation2 + $0x28] sm:$0xff]  }
  0x9b   : > { %5540 = vmatprep.mubr.bf16.mxu1 %v1328_v56  ;;  %v1335_v25 = vrot.slane %v1333_v52, 1  ;;  %v5178_v18 = vpack.c.bf16 %v441_v49, %v441_v49  ;;  %v3120_v55 = vrot.slane %v6813_v34, 2  ;;  %v6900_v49 = vld [vmem:[#allocation2 + $0x58] sm:$0xff]  }
  0x9d   : > { %v1336_v9 = vsel %vm7951_vm12, %v1331_v21, %v1335_v25  ;;  %v1007_v52 = vshrl.u32 %v5178_v18, 16  ;;  %v1010_v51 = vshll.u32 %v5178_v18, 16  ;;  %v6824_v21 = vld [vmem:[#allocation2 + $0x30] sm:$0xff]  }
  0x9e   : > { %5541 = vmatmul.mubr.bf16.gmra.mxu1 %v1336_v9  ;;  %v6044_v9 = vld [vmem:[%s7898_s3 + $0xc0] sm:$0xff]  }
  0x9f   : > { %5560 = vmatprep.mubr.bf16.mxu1 %v6301_v38  ;;  %v1855_v38 = vsel %vm1844_vm9, %v1852_v31, %v1854_v24  ;;  %v1009_v31 = vrot.slane %v1007_v52, 7  ;;  %v3124_v24 = vrot.slane %v6818_v54, 2 }
  0xa1   : > { %5613 = vmatmul.mubr.bf16.vlgmr.msra.gmra.mxu0 %v1849_v10 }
  0xa2   : > { %5701 = vmatpush3.bf16.msra.mxu0 %v6603_v58  ;;  %5616 = vmatprep.mubr.bf16.mxu0 %v1851_v37  ;;  %v6037_v58 = vld [vmem:[%s7898_s3 + $0x120] sm:$0xff]   ;;  %v6836_v37 = vld [vmem:[%s7898_s3 + $0x1b8] sm:$0xff]  }
  0xa3   : > { %5702 = vmatprep.subr.bf16.mxu0 %v6033_v28 }
  0xa6   : > { %5703 = vmatpush3.bf16.msra.mxu0 %v6033_v28  ;;  %5561 = vmatmul.mubr.bf16.vlgmr.msra.gmra.mxu1 %v6123_v23  ;;  %v3095_v23 = vld [vmem:[#allocation2 + $0x8] sm:$0xc]  ;;  %v1005_v28 = vrot.slane %v6708_v46, 4  ;;  %v6129_v46 = vld [vmem:[#allocation2 + $0x60] sm:$0xff]  }
  0xa7   : > { %5704 = vmatprep.subr.bf16.mxu0 %v6035_v1  ;;  %5649 = vmatpush3.bf16.msra.mxu1 %v6528_v39  ;;  %v6036_v39 = vld [vmem:[%s7898_s3 + $0xe0] sm:$0xff]   ;;  %v5041_v19 = vcombine.low %v3095_v23, %v6796_v48 }
  0xa8   : > { %5564 = vmatprep.mubr.bf16.mxu1 %v6124_v27  ;;  %5650 = vmatprep.subr.bf16.mxu1 %v6032_v26 }
  0xa9   : > { %5617 = vmatmul.mubr.bf16.gmra.mxu0 %v1853_v30  ;;  %v3117_v25 = vrot.slane %v5041_v19, 2  ;;  %v1868_v30 = vrot.slane %v6129_v46, 1 }
  0xaa   : > { %5620 = vmatprep.mubr.bf16.mxu0 %v1855_v38  ;;  %5705 = vmatpush3.bf16.msra.mxu0 %v6035_v1  ;;  %v3122_v1 = vrot.slane %v6815_v59, 2 }
  0xab   : > { %5706 = vmatprep.subr.bf16.mxu0 %v6037_v58  ;;  %5651 = vmatpush3.bf16.msra.mxu1 %v6032_v26  ;;  %v1022_v26 = vld [vmem:[#allocation2 + $0x98] sm:$0x1] }
  0xac   : > { %5652 = vmatprep.subr.bf16.mxu1 %v6034_v36  ;;  %v6849_v43 = vsel %vm3116_vm8, %v3120_v55, %v3122_v1 }
  0xae   : > { %5707 = vmatpush3.bf16.msra.mxu0 %v6037_v58  ;;  %5565 = vmatmul.mubr.bf16.gmra.mxu1 %v6550_v50  ;;  %v1862_v50 = vrot.slane %v6780_v4, 1  ;;  %v3126_v58 = vrot.slane %v6824_v21, 2 }
  0xaf   : > { %5568 = vmatprep.mubr.bf16.mxu1 %v6587_v41  ;;  %5653 = vmatpush3.bf16.msra.mxu1 %v6034_v36  ;;  %v1861_v41 = vsel %vm1844_vm9, %v1858_v32, %v1860_v8  ;;  %v1012_v36 = vor.u32 %v1010_v51, %v1009_v31  ;;  %v1014_v32 = vrot.slane %v1009_v31, 4  ;;  %v6130_v31 = vld [vmem:[#allocation2 + $0x68] sm:$0xff]  }
  0xb0   : > { %5654 = vmatprep.subr.bf16.mxu1 %v6036_v39  ;;  %5708 = vmatprep.subr.bf16.mxu0 %v6039_v44  ;;  %v1863_v13 = vsel %vm1844_vm9, %v1860_v8, %v1862_v50  ;;  %v1865_v5 = vsel %vm1844_vm9, %v1862_v50, %v1864_v15  ;;  %v6871_v8 = vsel %vm3116_vm8, %v3126_v58, %v3128_v16  ;;  %v6874_v50 = vld [vmem:[#allocation2 + $0x40] sm:$0xff]  }
  0xb1   : > { %5621 = vmatmul.mubr.bf16.gmra.mxu0 %v1857_v35  ;;  %v6853_v35 = vsel %vm3116_vm8, %v3122_v1, %v3124_v24  ;;  %v6917_v1 = vld [vmem:[#allocation2 + $0x60] sm:$0xff]  }
  0xb2   : > { %5624 = vmatprep.mubr.bf16.mxu0 %v1859_v7  ;;  %5709 = vmatpush3.bf16.msra.mxu0 %v6039_v44  ;;  %v6861_v7 = vld [vmem:[%s7898_s3 + $0x178] sm:$0xff]   ;;  %v1013_v44 = vsel %vm6245_vm10, %v1005_v28, %v1012_v36  ;;  %v3138_v36 = vrot.slane %v6917_v1, 2  ;;  %vm2645_vm10 = vsmask.f32 6400 }
  0xb3   : > { %5655 = vmatpush3.bf16.msra.mxu1 %v6036_v39  ;;  %5710 = vmatprep.subr.bf16.mxu0 %v6041_v57  ;;  %v6856_v39 = vsel %vm3116_vm8, %v3124_v24, %v3126_v58  ;;  %1021 = vst [vmem:[#allocation2 + $0x94] sm:$0xf] %v1013_v44  ;;  %v1880_v24 = vrot.slane %v6730_v22, 1  ;;  %v6926_v44 = vld [vmem:[#allocation2 + $0x68] sm:$0xff]  }
  0xb4   : > { %5656 = vmatprep.subr.bf16.mxu1 %v6038_v45 }
  0xb6   : > { %5569 = vmatmul.mubr.bf16.gmra.mxu1 %v6650_v33  ;;  %v6808_v33 = vld [vmem:[#allocation2 + $0x10] sm:$0xff]   ;;  %5711 = vmatpush3.bf16.msra.mxu0 %v6041_v57 }
  0xb7   : > { %5572 = vmatprep.mubr.bf16.mxu1 %v6667_v20  ;;  %v1866_v20 = vrot.slane %v6810_v17, 1  ;;  %5657 = vmatpush3.bf16.msra.mxu1 %v6038_v45  ;;  %v3118_v27 = vrot.slane %v6808_v33, 2  ;;  %v2161_v45 = vld [vmem:[#allocation2 + $0x8] sm:$0xe]  ;;  %v2658_v18 = vshll.u32 %v6808_v33, 16 }
  0xb8   : > { %5658 = vmatprep.subr.bf16.mxu1 %v6040_v6  ;;  %5712 = vmatprep.subr.bf16.mxu0 %v6043_v2 }
  0xb9   : > { %5625 = vmatmul.mubr.bf16.gmra.mxu0 %v1861_v41  ;;  %v1867_v56 = vsel %vm1844_vm9, %v1864_v15, %v1866_v20  ;;  %v6827_v10 = vsel %vm3116_vm8, %v3118_v27, %v3120_v55  ;;  %v6842_v38 = vsel %vm3116_vm8, %v3117_v25, %v3118_v27  ;;  %v3130_v41 = vrot.slane %v6874_v50, 2 }
  0xba   : > { %5628 = vmatprep.mubr.bf16.mxu0 %v1863_v13  ;;  %5713 = vmatpush3.bf16.msra.mxu0 %v6043_v2  ;;  %v3132_v13 = vrot.slane %v6877_v53, 2  ;;  %v1875_v15 = vsel %vm1844_vm9, %v1872_v0, %v1874_v40  ;;  %v1878_v27 = vrot.slane %v6723_v29, 1  ;;  %v3136_v55 = vrot.slane %v6900_v49, 2 }
  0xbb   : > { %5659 = vmatpush3.bf16.msra.mxu1 %v6040_v6  ;;  %5714 = vmatprep.subr.bf16.mxu0 %v6045_v61  ;;  %v6886_v6 = vsel %vm3116_vm8, %v3128_v16, %v3130_v41 }
  0xbc   : > { %5660 = vmatprep.subr.bf16.mxu1 %v6042_v60  ;;  %v6889_v2 = vsel %vm3116_vm8, %v3130_v41, %v3132_v13  ;;  %v1881_v22 = vsel %vm1844_vm9, %v1878_v27, %v1880_v24  ;;  %v2313_v24 = vrot.slane %v6815_v59, 1 }
  0xbe   : > { %5573 = vmatmul.mubr.bf16.gmra.mxu1 %v6713_v63  ;;  %v1870_v63 = vrot.slane %v6595_v12, 1  ;;  %5715 = vmatpush3.bf16.msra.mxu0 %v6045_v61  ;;  %v1023_v12 = vsel %vm6264_vm14, %v1014_v32, %v1022_v26  ;;  %v2655_v61 = vshrl.u32 %v6808_v33, 16  ;;  %v2673_v32 = vshrl.u32 %v6815_v59, 16 }
  0xbf   : > { %5576 = vmatprep.mubr.bf16.mxu1 %v6774_v62  ;;  %5661 = vmatpush3.bf16.msra.mxu1 %v6042_v60  ;;  %1024 = vst [vmem:[#allocation2 + $0x98] sm:$0x1] %v1023_v12  ;;  %v1869_v62 = vsel %vm1844_vm9, %v1866_v20, %v1868_v30  ;;  %v6896_v60 = vld [vmem:[#allocation2 + $0x50] sm:$0xff]   ;;  %vm4388_vm14 = vcmask 1044480  }
  0xc0   : > { %5662 = vmatprep.subr.bf16.mxu1 %v6044_v9  ;;  %5804 = vmatprep.subr.bf16.mxu0 %v6836_v37  ;;  %v1871_v57 = vsel %vm1844_vm9, %v1868_v30, %v1870_v63  ;;  %v1873_v23 = vsel %vm1844_vm9, %v1870_v63, %v1872_v0  ;;  %v3134_v19 = vrot.slane %v6896_v60, 2  ;;  %v2657_v51 = vrot.slane %v2655_v61, 1  ;;  %v6943_v61 = vld [vmem:[#allocation2 + $0x70] sm:$0xff]  }
  0xc1   : > { %5629 = vmatmul.mubr.bf16.gmra.mxu0 %v1865_v5  ;;  %v2667_v30 = vshll.u32 %v6813_v34, 16  ;;  %v2676_v63 = vshll.u32 %v6815_v59, 16  ;;  %v2675_v0 = vrot.slane %v2673_v32, 1  ;;  %v2315_v32 = vrot.slane %v6818_v54, 1 }
  0xc2   : > { %5632 = vmatprep.mubr.bf16.mxu0 %v1867_v56  ;;  %v6910_v5 = vsel %vm3116_vm8, %v3132_v13, %v3134_v19  ;;  %v2682_v13 = vshrl.u32 %v6818_v54, 16 }
  0xc3   : > { %5663 = vmatpush3.bf16.msra.mxu1 %v6044_v9  ;;  %v2660_v9 = vrot.slane %v2658_v18, 2  ;;  %v2669_v16 = vrot.slane %v2667_v30, 2  ;;  %v6947_v18 = vld [vmem:[#allocation2 + $0x78] sm:$0xff]  }
  0xc4   : > { %5752 = vmatprep.subr.bf16.mxu1 %v6861_v7 }
  0xc5   : > { %v2661_v58 = vor.u32 %v2660_v9, %v2657_v51  ;;  %v6054_v51 = vld [vmem:[%s7898_s3 + $0x1b0] sm:$0xff]  }
  0xc6   : > { %5577 = vmatmul.mubr.bf16.gmra.mxu1 %v6780_v4  ;;  %v6892_v4 = vcombine.low %v2161_v45, %v6796_v48  ;;  %v2678_v45 = vrot.slane %v2676_v63, 2 }
  0xc7   : > { %5580 = vmatprep.mubr.bf16.mxu1 %v6799_v3  ;;  %v1876_v3 = vrot.slane %v6701_v14, 1 }
  0xc8   : > { %v2647_v20 = vshrl.u32 %v6892_v4, 16  ;;  %v2650_v48 = vshll.u32 %v6892_v4, 16 }
  0xc9   : > { %5633 = vmatmul.mubr.bf16.gmra.mxu0 %v1869_v62  ;;  %v1877_v52 = vsel %vm1844_vm9, %v1874_v40, %v1876_v3  ;;  %v1879_v56 = vsel %vm1844_vm9, %v1876_v3, %v1878_v27  ;;  %v3140_v62 = vrot.slane %v6926_v44, 2  ;;  %v2309_v3 = vrot.slane %v6808_v33, 1 }
  0xca   : > { %5636 = vmatprep.mubr.bf16.mxu0 %v1871_v57  ;;  %v2649_v25 = vrot.slane %v2647_v20, 1  ;;  %v2652_v28 = vrot.slane %v2650_v48, 2  ;;  %v2679_v20 = vor.u32 %v2678_v45, %v2675_v0  ;;  %v2691_v48 = vshrl.u32 %v6824_v21, 16 }
  0xcb   : > { %v6935_v41 = vsel %vm3116_vm8, %v3138_v36, %v3140_v62  ;;  %v2684_v27 = vrot.slane %v2682_v13, 1  ;;  %v2311_v33 = vrot.slane %v6813_v34, 1  ;;  %v2718_v0 = vshrl.u32 %v6877_v53, 16 }
  0xcc   : > { %v2653_v26 = vor.u32 %v2652_v28, %v2649_v25  ;;  %v2693_v28 = vrot.slane %v2691_v48, 1  ;;  %v2721_v45 = vshll.u32 %v6877_v53, 16  ;;  %v2317_v48 = vrot.slane %v6824_v21, 1 }
  0xcd   : > { %v2312_v59 = vsel %vm1844_vm9, %v2309_v3, %v2311_v33 }
  0xce   : > { %5581 = vmatmul.mubr.bf16.gmra.mxu1 %v6810_v17  ;;  %v6913_v17 = vsel %vm3116_vm8, %v3134_v19, %v3136_v55  ;;  %v2662_v57 = vsel %vm2645_vm10, %v2653_v26, %v2661_v58  ;;  %v2709_v26 = vshrl.u32 %v6874_v50, 16 }
  0xcf   : > { %5584 = vmatprep.mubr.bf16.mxu1 %v6129_v46  ;;  %v2664_v46 = vshrl.u32 %v6813_v34, 16  ;;  %v2700_v34 = vshrl.u32 %v6846_v42, 16 }
  0xd0   : > { %v2711_v13 = vrot.slane %v2709_v26, 1 }
  0xd1   : > { %5637 = vmatmul.mubr.bf16.gmra.mxu0 %v1873_v23  ;;  %v2666_v12 = vrot.slane %v2664_v46, 1  ;;  %v2685_v23 = vshll.u32 %v6818_v54, 16  ;;  %v2703_v46 = vshll.u32 %v6846_v42, 16  ;;  %v6053_v54 = vld [vmem:[%s7898_s3 + $0x170] sm:$0xff]  }
  0xd2   : > { %5640 = vmatprep.mubr.bf16.mxu0 %v1875_v15  ;;  %v2308_v15 = vrot.slane %v6892_v4, 1 }
  0xd3   : > { %v2670_v40 = vor.u32 %v2669_v16, %v2666_v12  ;;  %v2702_v12 = vrot.slane %v2700_v34, 1  ;;  %v2705_v16 = vrot.slane %v2703_v46, 2  ;;  %v2318_v34 = vsel %vm1844_vm9, %v2315_v32, %v2317_v48  ;;  %v7013_v46 = vld [vmem:[#allocation2 + $0x98] ss:$0 sps:$4 sm:$0x33]  }
  0xd4   : > { %v2310_v4 = vsel %vm1844_vm9, %v2308_v15, %v2309_v3  ;;  %v2727_v15 = vshrl.u32 %v6896_v60, 16 }
  0xd5   : > { %v2671_v19 = vsel %vm2645_vm10, %v2661_v58, %v2670_v40  ;;  %v2680_v25 = vsel %vm2645_vm10, %v2670_v40, %v2679_v20  ;;  %v2712_v58 = vshll.u32 %v6874_v50, 16 }
  0xd6   : > { %5585 = vmatmul.mubr.bf16.gmra.mxu1 %v6130_v31 }
  0xd7   : > { %5588 = vmatprep.mubr.bf16.mxu1 %v6618_v11  ;;  %v6929_v11 = vsel %vm3116_vm8, %v3136_v55, %v3138_v36  ;;  %v2687_v55 = vrot.slane %v2685_v23, 2  ;;  %v6974_v36 = vld [vmem:[#allocation2 + $0x80] sm:$0xff]   ;;  %v2714_v23 = vrot.slane %v2712_v58, 2 }
  0xd9   : > { %5641 = vmatmul.mubr.bf16.gmra.mxu0 %v1877_v52  ;;  %v3144_v52 = vrot.slane %v6947_v18, 2  ;;  %v2688_v30 = vor.u32 %v2687_v55, %v2684_v27  ;;  %v7902_v27 = vrot.slane %v6846_v42, 1  ;;  %v6064_v55 = vld [vmem:[%s7898_s3 + $0x1a0] sm:$0xff]  }
  0xda   : > { %5644 = vmatprep.mubr.bf16.mxu0 %v1879_v56 }
  0xdb   : > { %v7019_v58 = vsel %vm1844_vm9, %v2317_v48, %v7902_v27  ;;  %v7045_v48 = vld [vmem:[#allocation2 + $0x20] sm:$0xff]  }
  0xde   : > { %5589 = vmatmul.mubr.bf16.gmra.mxu1 %v6691_v47  ;;  %v2694_v47 = vshll.u32 %v6824_v21, 16  ;;  %v6057_v21 = vld [vmem:[%s7898_s3 + $0x168] sm:$0xff]  }
  0xdf   : > { %5592 = vmatprep.mubr.bf16.mxu1 %v6701_v14  ;;  %v3142_v14 = vrot.slane %v6943_v61, 2 }
  0xe0   : > { %v2696_v9 = vrot.slane %v2694_v47, 2  ;;  %v2730_v47 = vshll.u32 %v6896_v60, 16 }
  0xe1   : > { %5645 = vmatmul.mubr.bf16.gmra.mxu0 %v1881_v22  ;;  %v6958_v56 = vsel %vm3116_vm8, %v3140_v62, %v3142_v14  ;;  %v6962_v31 = vsel %vm3116_vm8, %v3142_v14, %v3144_v52  ;;  %v6978_v22 = vld [vmem:[#allocation2 + $0x88] sm:$0xff]   ;;  %v3146_v62 = vrot.slane %v6974_v36, 2 }
  0xe2   : > { %5716 = vmatprep.mubr.bf16.mxu0 %v2662_v57  ;;  %v2697_v63 = vor.u32 %v2696_v9, %v2693_v28  ;;  %v2689_v57 = vsel %vm2645_vm10, %v2679_v20, %v2688_v30  ;;  %v3148_v40 = vrot.slane %v6978_v22, 2  ;;  %v3433_v28 = vld [vmem:[#allocation2 + $0x10] sm:$0xc]  ;;  %v2316_v9 = vsel %vm1844_vm9, %v2313_v24, %v2315_v32 }
  0xe3   : > { %v6991_v3 = vsel %vm3116_vm8, %v3144_v52, %v3146_v62  ;;  %v2720_v52 = vrot.slane %v2718_v0, 1  ;;  %v2739_v32 = vshll.u32 %v6900_v49, 16  ;;  %v7033_v0 = vld [vmem:[#allocation2 + $0x18] sm:$0xff]  }
  0xe4   : > { %v2698_v20 = vsel %vm2645_vm10, %v2688_v30, %v2697_v63  ;;  %v6997_v14 = vsel %vm3116_vm8, %v3146_v62, %v3148_v40  ;;  %v3434_v30 = vld [vmem:[#allocation2 + $0x14] sm:$0xf]  ;;  %v6061_v62 = vld [vmem:[%s7898_s3 + $0x160] sm:$0xff]  }
  0xe5   : > { %v2741_v27 = vrot.slane %v2739_v32, 2 }
  0xe6   : > { %5593 = vmatmul.mubr.bf16.gmra.mxu1 %v6723_v29  ;;  %v6059_v29 = vld [vmem:[%s7898_s3 + $0x1a8] sm:$0xff]  }
  0xe7   : > { %5664 = vmatprep.mubr.bf16.mxu1 %v2310_v4  ;;  %v2723_v4 = vrot.slane %v2721_v45, 2 }
  0xe9   : > { %5717 = vmatmul.mubr.bf16.vlgmr.msra.gmra.mxu0 %v2671_v19  ;;  %v2706_v19 = vor.u32 %v2705_v16, %v2702_v12  ;;  %v3152_v12 = vrot.slane %v7013_v46, 2  ;;  %v4367_v16 = vld [vmem:[#allocation2 + $0x10] sm:$0x8] }
  0xea   : > { %5805 = vmatpush3.bf16.msra.mxu0 %v6836_v37  ;;  %5720 = vmatprep.mubr.bf16.mxu0 %v2680_v25  ;;  %v2314_v37 = vsel %vm1844_vm9, %v2311_v33, %v2313_v24  ;;  %v7007_v33 = vor.u32 %v2714_v23, %v2711_v13  ;;  %v7009_v25 = vld [vmem:[#allocation2 + $0x90] sm:$0xff]   ;;  %v2724_v24 = vor.u32 %v2723_v4, %v2720_v52  ;;  %v2745_v23 = vshrl.u32 %v6917_v1, 16 }
  0xeb   : > { %5806 = vmatprep.subr.bf16.mxu0 %v6054_v51  ;;  %v2707_v26 = vsel %vm2645_vm10, %v2697_v63, %v2706_v19  ;;  %v6072_v4 = vld [vmem:[%s7898_s3 + $0x190] sm:$0xff]  }
  0xec   : > { %v2716_v63 = vsel %vm2645_vm10, %v2706_v19, %v7007_v33  ;;  %v4390_v19 = vrot.slane %v7033_v0, 3  ;;  %v2747_v32 = vrot.slane %v2745_v23, 1 }
  0xee   : > { %5807 = vmatpush3.bf16.msra.mxu0 %v6054_v51  ;;  %5665 = vmatmul.mubr.bf16.vlgmr.msra.gmra.mxu1 %v2312_v59  ;;  %v2729_v51 = vrot.slane %v2727_v15, 1  ;;  %v2748_v15 = vshll.u32 %v6917_v1, 16 }
  0xef   : > { %5808 = vmatprep.subr.bf16.mxu0 %v6059_v29  ;;  %5753 = vmatpush3.bf16.msra.mxu1 %v6861_v7  ;;  %v2732_v7 = vrot.slane %v2730_v47, 2 }
  0xf0   : > { %5668 = vmatprep.mubr.bf16.mxu1 %v2314_v37  ;;  %5754 = vmatprep.subr.bf16.mxu1 %v6053_v54  ;;  %v3150_v37 = vrot.slane %v7009_v25, 2 }
  0xf1   : > { %5721 = vmatmul.mubr.bf16.gmra.mxu0 %v2689_v57  ;;  %v7031_v57 = vcombine.low %v3433_v28, %v3434_v30  ;;  %v7038_v13 = vor.u32 %v2732_v7, %v2729_v51  ;;  %v7903_v51 = vrot.slane %v7045_v48, 3  ;;  %v3927_v28 = vshrl.u32 %v7033_v0, 16  ;;  %v6066_v7 = vld [vmem:[%s7898_s3 + $0x158] sm:$0xff]  }
  0xf2   : > { %5724 = vmatprep.mubr.bf16.mxu0 %v2698_v20  ;;  %5809 = vmatpush3.bf16.msra.mxu0 %v6059_v29  ;;  %v2736_v29 = vshrl.u32 %v6900_v49, 16  ;;  %v7036_v45 = vsel %vm3116_vm8, %v3148_v40, %v3150_v37  ;;  %v6068_v20 = vld [vmem:[%s7898_s3 + $0x198] sm:$0xff]   ;;  %v7048_v47 = vsel %vm3116_vm8, %v3150_v37, %v3152_v12 }
  0xf3   : > { %5810 = vmatprep.subr.bf16.mxu0 %v6064_v55  ;;  %5755 = vmatpush3.bf16.msra.mxu1 %v6053_v54  ;;  %v5134_v54 = vcombine.low %v4367_v16, %v3434_v30  ;;  %7952 = vst [vmem:[#allocation3_spill] sm:$0xff] %v7048_v47  ;;  %v3922_v52 = vshll.u32 %v7031_v57, 16  ;;  %v7069_v37 = vsel %vm4388_vm14, %v4390_v19, %v7903_v51  ;;  %v3929_v12 = vrot.slane %v3927_v28, 2 }
  0xf4   : > { %5756 = vmatprep.subr.bf16.mxu1 %v6057_v21  ;;  %v7954_v28 = vrot.slane %v6846_v42, 1 }
  0xf5   : > { %v4389_v40 = vrot.slane %v5134_v54, 3  ;;  %v3924_v30 = vrot.slane %v3922_v52, 3  ;;  %v2738_v54 = vrot.slane %v2736_v29, 1  ;;  %v2734_v29 = vsel %vm2645_vm10, %v2724_v24, %v7038_v13 }
  0xf6   : > { %5811 = vmatpush3.bf16.msra.mxu0 %v6064_v55  ;;  %5669 = vmatmul.mubr.bf16.gmra.mxu1 %v2316_v9  ;;  %v3919_v55 = vshrl.u32 %v7031_v57, 16  ;;  %v3930_v9 = vshll.u32 %v7033_v0, 16 }
  0xf7   : > { %5672 = vmatprep.mubr.bf16.mxu1 %v2318_v34  ;;  %5757 = vmatpush3.bf16.msra.mxu1 %v6057_v21  ;;  %v7063_v34 = vsel %vm4388_vm14, %v4389_v40, %v4390_v19  ;;  %v7953_v19 = vrot.slane %v6874_v50, 1  ;;  %v2742_v23 = vor.u32 %v2741_v27, %v2738_v54  ;;  %v6081_v27 = vld [vmem:[%s7898_s3 + $0x180] sm:$0xff]  }
  0xf8   : > { %5758 = vmatprep.subr.bf16.mxu1 %v6061_v62  ;;  %v3921_v21 = vrot.slane %v3919_v55, 2  ;;  %5812 = vmatprep.subr.bf16.mxu0 %v6068_v20  ;;  %v3932_v16 = vrot.slane %v3930_v9, 3  ;;  %v2725_v55 = vsel %vm2645_vm10, %v7007_v33, %v2724_v24  ;;  %v6071_v33 = vld [vmem:[%s7898_s3 + $0x150] sm:$0xff]   ;;  %v2323_v24 = vrot.slane %v6877_v53, 1  ;;  %v6075_v53 = vld [vmem:[%s7898_s3 + $0x148] sm:$0xff]   ;;  %v6079_v50 = vld [vmem:[%s7898_s3 + $0x140] sm:$0xff]  }
  0xf9   : > { %5725 = vmatmul.mubr.bf16.gmra.mxu0 %v2707_v26  ;;  %v3936_v26 = vshrl.u32 %v7045_v48, 16  ;;  %v2322_v9 = vsel %vm1844_vm9, %v7954_v28, %v7953_v19 }
  0xfa   : > { %5728 = vmatprep.mubr.bf16.mxu0 %v2716_v63  ;;  %v3939_v63 = vshll.u32 %v7045_v48, 16  ;;  %5813 = vmatpush3.bf16.msra.mxu0 %v6068_v20  ;;  %v3925_v59 = vor.u32 %v3924_v30, %v3921_v21  ;;  %v3933_v52 = vor.u32 %v3932_v16, %v3929_v12  ;;  %v2750_v20 = vrot.slane %v2748_v15, 2 }
  0xfb   : > { %v3938_v40 = vrot.slane %v3936_v26, 2  ;;  %5759 = vmatpush3.bf16.msra.mxu1 %v6061_v62  ;;  %5814 = vmatprep.subr.bf16.mxu0 %v6072_v4  ;;  %v6076_v62 = vld [vmem:[%s7898_s3 + $0x188] sm:$0xff]   ;;  %v2754_v15 = vshrl.u32 %v6926_v44, 16  ;;  %v2757_v30 = vshll.u32 %v6926_v44, 16  ;;  %v2766_v12 = vshll.u32 %v6943_v61, 16 }
  0xfc   : > { %v3941_v47 = vrot.slane %v3939_v63, 3  ;;  %5760 = vmatprep.subr.bf16.mxu1 %v6066_v7  ;;  %v7088_v21 = vsel %vm3917_vm7, %v3925_v59, %v3933_v52  ;;  %v2325_v59 = vrot.slane %v6896_v60, 1  ;;  %v7955_v16 = vmov %v7953_v19 }
  0xfd   : > { %v2324_v60 = vsel %vm1844_vm9, %v7955_v16, %v2323_v24  ;;  %v2756_v63 = vrot.slane %v2754_v15, 1  ;;  %v2759_v54 = vrot.slane %v2757_v30, 2  ;;  %v2327_v19 = vrot.slane %v6900_v49, 1  ;;  %v7133_v49 = vld [vmem:[%s7898_s3 + $0x1f8] sm:$0xff]  }
  0xfe   : > { %v7090_v42 = vor.u32 %v3941_v47, %v3938_v40  ;;  %5673 = vmatmul.mubr.bf16.gmra.mxu1 %v7019_v58  ;;  %v2751_v47 = vor.u32 %v2750_v20, %v2747_v32  ;;  %v2763_v58 = vshrl.u32 %v6943_v61, 16  ;;  %5815 = vmatpush3.bf16.msra.mxu0 %v6072_v4  ;;  %v2326_v4 = vsel %vm1844_vm9, %v2323_v24, %v2325_v59 }
  0xff   : > { %5676 = vmatprep.mubr.bf16.mxu1 %v2322_v9  ;;  %5761 = vmatpush3.bf16.msra.mxu1 %v6066_v7  ;;  %v2743_v7 = vsel %vm2645_vm10, %v7038_v13, %v2742_v23  ;;  %v7122_v13 = vld [vmem:[%s7898_s3 + $0x238] sm:$0xff]   ;;  %v2760_v28 = vor.u32 %v2759_v54, %v2756_v63  ;;  %v2772_v9 = vshrl.u32 %v6947_v18, 16  ;;  %v2329_v32 = vrot.slane %v6917_v1, 1 }
 0x100   : > { %v7098_v26 = vsel %vm3917_vm7, %v3933_v52, %v7090_v42  ;;  %5762 = vmatprep.subr.bf16.mxu1 %v6071_v33  ;;  %5816 = vmatprep.subr.bf16.mxu0 %v6076_v62  ;;  %v2752_v40 = vsel %vm2645_vm10, %v2742_v23, %v2751_v47  ;;  %v2768_v52 = vrot.slane %v2766_v12, 2  ;;  %v2328_v24 = vsel %vm1844_vm9, %v2325_v59, %v2327_v19 }
 0x101   : > { %5729 = vmatmul.mubr.bf16.gmra.mxu0 %v2725_v55  ;;  %v2765_v55 = vrot.slane %v2763_v58, 1  ;;  %v2761_v23 = vsel %vm2645_vm10, %v2751_v47, %v2760_v28  ;;  %v2774_v1 = vrot.slane %v2772_v9, 1  ;;  %v2330_v30 = vsel %vm1844_vm9, %v2327_v19, %v2329_v32 }
 0x102   : > { %5732 = vmatprep.mubr.bf16.mxu0 %v2734_v29  ;;  %5817 = vmatpush3.bf16.msra.mxu0 %v6076_v62  ;;  %v2775_v29 = vshll.u32 %v6947_v18, 16  ;;  %v2784_v62 = vshll.u32 %v6974_v36, 16  ;;  %v2790_v47 = vshrl.u32 %v6978_v22, 16  ;;  %v2793_v16 = vshll.u32 %v6978_v22, 16 }
 0x103   : > { %5763 = vmatpush3.bf16.msra.mxu1 %v6071_v33  ;;  %5818 = vmatprep.subr.bf16.mxu0 %v6081_v27  ;;  %v2769_v20 = vor.u32 %v2768_v52, %v2765_v55  ;;  %v2781_v33 = vshrl.u32 %v6974_v36, 16  ;;  %v2799_v63 = vshrl.u32 %v7009_v25, 16  ;;  %v2802_v54 = vshll.u32 %v7009_v25, 16 }
 0x104   : > { %5764 = vmatprep.subr.bf16.mxu1 %v6075_v53  ;;  %v2777_v15 = vrot.slane %v2775_v29, 2  ;;  %v2792_v55 = vrot.slane %v2790_v47, 1  ;;  %v2795_v52 = vrot.slane %v2793_v16, 2  ;;  %v2808_v29 = vshrl.u32 %v7013_v46, 16 }
 0x105   : > { %v2770_v58 = vsel %vm2645_vm10, %v2760_v28, %v2769_v20  ;;  %v2783_v12 = vrot.slane %v2781_v33, 1  ;;  %v2801_v19 = vrot.slane %v2799_v63, 1  ;;  %v2804_v28 = vrot.slane %v2802_v54, 2  ;;  %v6080_v16 = vld [vmem:[#allocation2 + $0x98] ss:$0 sps:$4 sm:$0x11]  }
 0x106   : > { %5677 = vmatmul.mubr.bf16.gmra.mxu1 %v2324_v60  ;;  %5819 = vmatpush3.bf16.msra.mxu0 %v6081_v27  ;;  %v2331_v27 = vrot.slane %v6926_v44, 1  ;;  %v2778_v59 = vor.u32 %v2777_v15, %v2774_v1  ;;  %v2333_v60 = vrot.slane %v6943_v61, 1  ;;  %v2335_v61 = vrot.slane %v6947_v18, 1  ;;  %v7159_v18 = vpop.f32.mrf.mxu1 }
 0x107   : > { %5680 = vmatprep.mubr.bf16.mxu1 %v2326_v4  ;;  %5765 = vmatpush3.bf16.msra.mxu1 %v6075_v53  ;;  %v2786_v53 = vrot.slane %v2784_v62, 2  ;;  %v2796_v9 = vor.u32 %v2795_v52, %v2792_v55  ;;  %v2805_v33 = vor.u32 %v2804_v28, %v2801_v19  ;;  %v3583_v63 = vrot.slane %v7045_v48, 2  ;;  %v7191_v28 = vld [vmem:[#allocation2 + $0x38] sm:$0xff]  }
 0x108   : > { %5766 = vmatprep.subr.bf16.mxu1 %v6079_v50  ;;  %5908 = vmatprep.subr.bf16.mxu0 %v7122_v13  ;;  %v2332_v4 = vsel %vm1844_vm9, %v2329_v32, %v2331_v27  ;;  %v2334_v44 = vsel %vm1844_vm9, %v2331_v27, %v2333_v60  ;;  %v2811_v32 = vshll.u32 %v7013_v46, 16  ;;  %v2336_v62 = vsel %vm1844_vm9, %v2333_v60, %v2335_v61  ;;  %v7165_v27 = vpop.f32.mrf.mxu1 }
 0x109   : > { %5733 = vmatmul.mubr.bf16.gmra.mxu0 %v2743_v7  ;;  %v2787_v7 = vor.u32 %v2786_v53, %v2783_v12  ;;  %v2339_v46 = vrot.slane %v6978_v22, 1  ;;  %v3580_v12 = vrot.slane %v7031_v57, 2  ;;  %v3581_v53 = vrot.slane %v7033_v0, 2  ;;  %v7171_v22 = vld [vmem:[#allocation2 + $0x28] sm:$0xff]  }
 0x10a   : > { %5736 = vmatprep.mubr.bf16.mxu0 %v2752_v40  ;;  %v2779_v40 = vsel %vm2645_vm10, %v2769_v20, %v2778_v59  ;;  %v2337_v20 = vrot.slane %v6974_v36, 1  ;;  %v2813_v1 = vrot.slane %v2811_v32, 2  ;;  %v7175_v57 = vpop.f32.mrf.mxu1  ;;  %v2343_v0 = vrot.slane %v6080_v16, 1  ;;  %v6096_v32 = vld [vmem:[%s7898_s3 + $0x228] sm:$0xff]  }
 0x10b   : > { %5767 = vmatpush3.bf16.msra.mxu1 %v6079_v50  ;;  %v2788_v50 = vsel %vm2645_vm10, %v2778_v59, %v2787_v7  ;;  %v3585_v54 = vrot.slane %v7171_v22, 2  ;;  %v3584_v52 = vsel %vm3116_vm8, %v3581_v53, %v3583_v63 }
 0x10c   : > { %5856 = vmatprep.subr.bf16.mxu1 %v7133_v49  ;;  %v2338_v15 = vsel %vm1844_vm9, %v2335_v61, %v2337_v20  ;;  %v2340_v59 = vsel %vm1844_vm9, %v2337_v20, %v2339_v46  ;;  %v3589_v20 = vrot.slane %v7191_v28, 2 }
 0x10d   : > { %v3586_v19 = vsel %vm3116_vm8, %v3583_v63, %v3585_v54 }
 0x10e   : > { %5681 = vmatmul.mubr.bf16.gmra.mxu1 %v2328_v24  ;;  %v2797_v24 = vsel %vm2645_vm10, %v2787_v7, %v2796_v9  ;;  %v3582_v7 = vsel %vm3116_vm8, %v3580_v12, %v3581_v53 }
 0x10f   : > { %5684 = vmatprep.mubr.bf16.mxu1 %v2330_v30  ;;  %v2806_v30 = vsel %vm2645_vm10, %v2796_v9, %v2805_v33 }
 0x111   : > { %5737 = vmatmul.mubr.bf16.gmra.mxu0 %v2761_v23  ;;  %v2810_v23 = vrot.slane %v2808_v29, 1 }
 0x112   : > { %5740 = vmatprep.mubr.bf16.mxu0 %v2770_v58  ;;  %v2341_v58 = vrot.slane %v7009_v25, 1  ;;  %v7173_v25 = vpop.f32.mrf.mxu0 }
 0x113   : > { %v2814_v36 = vor.u32 %v2813_v1, %v2810_v23  ;;  %v7215_v1 = vld [vmem:[#allocation2 + $0x48] sm:$0xff]  }
 0x114   : > { %v2342_v60 = vsel %vm1844_vm9, %v2339_v46, %v2341_v58  ;;  %v2344_v55 = vsel %vm1844_vm9, %v2341_v58, %v2343_v0  ;;  %v6101_v46 = vld [vmem:[%s7898_s3 + $0x220] sm:$0xff]   ;;  %v3593_v58 = vrot.slane %v7215_v1, 2 }
 0x115   : > { %v2815_v47 = vsel %vm2645_vm10, %v2805_v33, %v2814_v36 }
 0x116   : > { %5685 = vmatmul.mubr.bf16.gmra.mxu1 %v2332_v4  ;;  %v7179_v4 = vpop.f32.mrf.mxu0 }
 0x117   : > { %5688 = vmatprep.mubr.bf16.mxu1 %v2334_v44  ;;  %v7185_v44 = vld [vmem:[#allocation2 + $0x30] sm:$0xff]  }
 0x118   : > { %v7193_v61 = vpop.f32.mrf.mxu0  ;;  %v3587_v29 = vrot.slane %v7185_v44, 2 }
 0x119   : > { %5741 = vmatmul.mubr.bf16.gmra.mxu0 %v2779_v40  ;;  %v7181_v40 = vpop.f32.mrf.mxu1 }
 0x11a   : > { %5744 = vmatprep.mubr.bf16.mxu0 %v2788_v50  ;;  %v6091_v50 = vld [vmem:[%s7898_s3 + $0x230] sm:$0xff]   ;;  %v7204_v33 = vpop.f32.mrf.mxu0  ;;  %v3590_v23 = vsel %vm3116_vm8, %v3587_v29, %v3589_v20 }
 0x11c   : > { %v7195_v9 = vpop.f32.mrf.mxu1 }
 0x11e   : > { %5689 = vmatmul.mubr.bf16.gmra.mxu1 %v2336_v62  ;;  %v7206_v62 = vpop.f32.mrf.mxu1 }
 0x11f   : > { %5692 = vmatprep.mubr.bf16.mxu1 %v2338_v15 }
 0x121   : > { %5745 = vmatmul.mubr.bf16.gmra.mxu0 %v2797_v24  ;;  %v3588_v24 = vsel %vm3116_vm8, %v3585_v54, %v3587_v29  ;;  %v6109_v54 = vld [vmem:[%s7898_s3 + $0x210] sm:$0xff]  }
 0x122   : > { %5748 = vmatprep.mubr.bf16.mxu0 %v2806_v30  ;;  %v7220_v30 = vpop.f32.mrf.mxu1 }
 0x124   : > { %v7234_v53 = vpop.f32.mrf.mxu1 }
 0x126   : > { %5693 = vmatmul.mubr.bf16.gmra.mxu1 %v2340_v59  ;;  %v6098_v59 = vld [vmem:[%s7898_s3 + $0x1e0] sm:$0xff]  }
 0x127   : > { %5696 = vmatprep.mubr.bf16.mxu1 %v2342_v60  ;;  %v6105_v60 = vld [vmem:[%s7898_s3 + $0x218] sm:$0xff]  }
 0x129   : > { %5749 = vmatmul.mubr.bf16.gmra.mxu0 %v2815_v47  ;;  %v7242_v47 = vld [vmem:[#allocation2 + $0x58] sm:$0xff]  }
 0x12a   : > { %5820 = vmatprep.mubr.bf16.mxu0 %v3582_v7  ;;  %v7218_v15 = vpop.f32.mrf.mxu0 }
 0x12c   : > { %v7232_v12 = vpop.f32.mrf.mxu0 }
 0x12e   : > { %5697 = vmatmul.mubr.bf16.gmra.mxu1 %v2344_v55  ;;  %v7249_v7 = vpop.f32.mrf.mxu0  ;;  %v3597_v55 = vrot.slane %v7242_v47, 2 }
 0x12f   : > { %5768 = vmatprep.mubr.bf16.mxu1 %v6842_v38  ;;  %v7209_v38 = vld [vmem:[#allocation2 + $0x40] sm:$0xff]  }
 0x130   : > { %v3591_v36 = vrot.slane %v7209_v38, 2 }
 0x131   : > { %5821 = vmatmul.mubr.bf16.vlgmr.msra.gmra.mxu0 %v3584_v52  ;;  %v7262_v52 = vpop.f32.mrf.mxu0 }
 0x132   : > { %5909 = vmatpush3.bf16.msra.mxu0 %v7122_v13  ;;  %5824 = vmatprep.mubr.bf16.mxu0 %v3586_v19  ;;  %v6090_v13 = vld [vmem:[%s7898_s3 + $0x1f0] sm:$0xff]   ;;  %v3594_v16 = vsel %vm3116_vm8, %v3591_v36, %v3593_v58  ;;  %v7251_v0 = vpop.f32.mrf.mxu1  ;;  %v7267_v19 = vld [vmem:[#allocation2 + $0x60] sm:$0xff]  }
 0x133   : > { %5910 = vmatprep.subr.bf16.mxu0 %v6091_v50  ;;  %7956 = vst [vmem:[#allocation4_spill] sm:$0xff] %v7251_v0 }
 0x136   : > { %5911 = vmatpush3.bf16.msra.mxu0 %v6091_v50  ;;  %5769 = vmatmul.mubr.bf16.vlgmr.msra.gmra.mxu1 %v6827_v10  ;;  %v6094_v10 = vld [vmem:[%s7898_s3 + $0x1e8] sm:$0xff]   ;;  %v7264_v50 = vpop.f32.mrf.mxu1 }
 0x137   : > { %5912 = vmatprep.subr.bf16.mxu0 %v6096_v32  ;;  %5857 = vmatpush3.bf16.msra.mxu1 %v7133_v49  ;;  %v3592_v49 = vsel %vm3116_vm8, %v3589_v20, %v3591_v36  ;;  %7957 = vst [vmem:[#allocation5_spill] sm:$0xff] %v7264_v50  ;;  %v6108_v20 = vld [vmem:[%s7898_s3 + $0x1d0] sm:$0xff]  }
 0x138   : > { %5772 = vmatprep.mubr.bf16.mxu1 %v6849_v43  ;;  %5858 = vmatprep.subr.bf16.mxu1 %v6090_v13  ;;  %v7237_v43 = vld [vmem:[#allocation2 + $0x50] sm:$0xff]  }
 0x139   : > { %5825 = vmatmul.mubr.bf16.gmra.mxu0 %v3588_v24  ;;  %v3595_v63 = vrot.slane %v7237_v43, 2  ;;  %v6113_v24 = vld [vmem:[%s7898_s3 + $0x208] sm:$0xff]  }
 0x13a   : > { %5828 = vmatprep.mubr.bf16.mxu0 %v3590_v23  ;;  %5913 = vmatpush3.bf16.msra.mxu0 %v6096_v32  ;;  %v7270_v32 = vld [vmem:[#allocation2 + $0x68] sm:$0xff]   ;;  %v7281_v23 = vpop.f32.mrf.mxu1 }
 0x13b   : > { %5914 = vmatprep.subr.bf16.mxu0 %v6101_v46  ;;  %5859 = vmatpush3.bf16.msra.mxu1 %v6090_v13  ;;  %v3598_v29 = vsel %vm3116_vm8, %v3595_v63, %v3597_v55  ;;  %7958 = vst [vmem:[#allocation6_spill] sm:$0xff] %v7281_v23  ;;  %v3601_v36 = vrot.slane %v7270_v32, 2 }
 0x13c   : > { %5860 = vmatprep.subr.bf16.mxu1 %v6094_v10 }
 0x13e   : > { %5915 = vmatpush3.bf16.msra.mxu0 %v6101_v46  ;;  %5773 = vmatmul.mubr.bf16.gmra.mxu1 %v6853_v35  ;;  %v6103_v35 = vld [vmem:[%s7898_s3 + $0x1d8] sm:$0xff]   ;;  %v3599_v46 = vrot.slane %v7267_v19, 2 }
 0x13f   : > { %5776 = vmatprep.mubr.bf16.mxu1 %v6856_v39  ;;  %5861 = vmatpush3.bf16.msra.mxu1 %v6094_v10  ;;  %v3596_v39 = vsel %vm3116_vm8, %v3593_v58, %v3595_v63  ;;  %v6112_v10 = vld [vmem:[%s7898_s3 + $0x1c8] sm:$0xff]   ;;  %v6116_v63 = vld [vmem:[%s7898_s3 + $0x1c0] sm:$0xff]  }
 0x140   : > { %5862 = vmatprep.subr.bf16.mxu1 %v6098_v59  ;;  %5916 = vmatprep.subr.bf16.mxu0 %v6105_v60 }
 0x141   : > { %5829 = vmatmul.mubr.bf16.gmra.mxu0 %v3592_v49  ;;  %v3600_v49 = vsel %vm3116_vm8, %v3597_v55, %v3599_v46 }
 0x142   : > { %5832 = vmatprep.mubr.bf16.mxu0 %v3594_v16  ;;  %5917 = vmatpush3.bf16.msra.mxu0 %v6105_v60  ;;  %v7279_v13 = vpop.f32.mrf.mxu0  ;;  %v3602_v16 = vsel %vm3116_vm8, %v3599_v46, %v3601_v36  ;;  %v7300_v60 = vld [vmem:[#allocation2 + $0x78] sm:$0xff]  }
 0x143   : > { %5863 = vmatpush3.bf16.msra.mxu1 %v6098_v59  ;;  %5918 = vmatprep.subr.bf16.mxu0 %v6109_v54  ;;  %v7297_v59 = vld [vmem:[#allocation2 + $0x70] sm:$0xff]   ;;  %7960 = vst [vmem:[#allocation8_spill] sm:$0xff] %v7300_v60 }
 0x144   : > { %5864 = vmatprep.subr.bf16.mxu1 %v6103_v35  ;;  %v7292_v58 = vpop.f32.mrf.mxu0 }
 0x146   : > { %5777 = vmatmul.mubr.bf16.gmra.mxu1 %v6871_v8  ;;  %5919 = vmatpush3.bf16.msra.mxu0 %v6109_v54  ;;  %v6117_v8 = vld [vmem:[%s7898_s3 + $0x200] sm:$0xff]   ;;  %v7306_v54 = vpop.f32.mrf.mxu0 }
 0x147   : > { %5780 = vmatprep.mubr.bf16.mxu1 %v6886_v6  ;;  %5865 = vmatpush3.bf16.msra.mxu1 %v6103_v35  ;;  %v7294_v6 = vpop.f32.mrf.mxu1  ;;  %v3603_v35 = vrot.slane %v7297_v59, 2 }
 0x148   : > { %5866 = vmatprep.subr.bf16.mxu1 %v6108_v20  ;;  %5920 = vmatprep.subr.bf16.mxu0 %v6113_v24  ;;  %7959 = vst [vmem:[#allocation7_spill] sm:$0xff] %v7294_v6 }
 0x149   : > { %5833 = vmatmul.mubr.bf16.gmra.mxu0 %v3596_v39  ;;  %v3605_v39 = vrot.slane %v7300_v60, 2 }
 0x14a   : > { %5836 = vmatprep.mubr.bf16.mxu0 %v3598_v29  ;;  %5921 = vmatpush3.bf16.msra.mxu0 %v6113_v24  ;;  %v7313_v29 = vpop.f32.mrf.mxu0  ;;  %v7318_v24 = vld [vmem:[#allocation2 + $0x80] sm:$0xff]  }
 0x14b   : > { %5867 = vmatpush3.bf16.msra.mxu1 %v6108_v20  ;;  %5922 = vmatprep.subr.bf16.mxu0 %v6117_v8  ;;  %7963 = vst [vmem:[#allocation11_spill] sm:$0xff] %v7318_v24  ;;  %v3606_v46 = vsel %vm3116_vm8, %v3603_v35, %v3605_v39 }
 0x14c   : > { %5868 = vmatprep.subr.bf16.mxu1 %v6112_v10 }
 0x14e   : > { %5781 = vmatmul.mubr.bf16.gmra.mxu1 %v6889_v2  ;;  %5923 = vmatpush3.bf16.msra.mxu0 %v6117_v8  ;;  %v3604_v2 = vsel %vm3116_vm8, %v3601_v36, %v3603_v35  ;;  %v3607_v8 = vrot.slane %v7318_v24, 2 }
 0x14f   : > { %5784 = vmatprep.mubr.bf16.mxu1 %v6910_v5  ;;  %5869 = vmatpush3.bf16.msra.mxu1 %v6112_v10 }
 0x150   : > { %v7308_v55 = vpop.f32.mrf.mxu1  ;;  %5870 = vmatprep.subr.bf16.mxu1 %v6116_v63 }
 0x151   : > { %5837 = vmatmul.mubr.bf16.gmra.mxu0 %v3600_v49  ;;  %7961 = vst [vmem:[#allocation9_spill] sm:$0xff] %v7308_v55  ;;  %v7321_v49 = vld [vmem:[#allocation2 + $0x88] sm:$0xff]  }
 0x152   : > { %5840 = vmatprep.mubr.bf16.mxu0 %v3602_v16  ;;  %v7315_v20 = vpop.f32.mrf.mxu1  ;;  %7964 = vst [vmem:[#allocation12_spill] sm:$0xff] %v7321_v49  ;;  %v3609_v16 = vrot.slane %v7321_v49, 2 }
 0x153   : > { %7962 = vst [vmem:[#allocation10_spill] sm:$0xff] %v7315_v20  ;;  %5871 = vmatpush3.bf16.msra.mxu1 %v6116_v63  ;;  %v7338_v63 = vld [vmem:[#allocation2 + $0x90] sm:$0xff]  }
 0x154   : > { %v7326_v10 = vpop.f32.mrf.mxu1  ;;  %7967 = vst [vmem:[#allocation15_spill] sm:$0xff] %v7338_v63 }
 0x155   : > { %7965 = vst [vmem:[#allocation13_spill] sm:$0xff] %v7326_v10 }
 0x156   : > { %5785 = vmatmul.mubr.bf16.gmra.mxu1 %v6913_v17  ;;  %v7333_v35 = vpop.f32.mrf.mxu1  ;;  %v3608_v17 = vsel %vm3116_vm8, %v3605_v39, %v3607_v8 }
 0x157   : > { %5788 = vmatprep.mubr.bf16.mxu1 %v6929_v11  ;;  %7966 = vst [vmem:[#allocation14_spill] sm:$0xff] %v7333_v35  ;;  %v7343_v11 = vld [vmem:[#allocation2 + $0x98] sm:$0xff]   ;;  %v3611_v35 = vrot.slane %v7338_v63, 2 }
 0x158   : > { %7968 = vst [vmem:[#allocation16_spill] sm:$0xff] %v7343_v11  ;;  %v3613_v55 = vrot.slane %v7343_v11, 2 }
 0x159   : > { %v7324_v5 = vpop.f32.mrf.mxu0  ;;  %5841 = vmatmul.mubr.bf16.gmra.mxu0 %v3604_v2  ;;  %v3610_v2 = vsel %vm3116_vm8, %v3607_v8, %v3609_v16  ;;  %v3612_v6 = vsel %vm3116_vm8, %v3609_v16, %v3611_v35 }
 0x15a   : > { %5844 = vmatprep.mubr.bf16.mxu0 %v3606_v46 }
 0x15b   : > { %v7330_v36 = vpop.f32.mrf.mxu0 }
 0x15d   : > { %v7335_v51 = vpop.f32.mrf.mxu0 }
 0x15e   : > { %v7345_v46 = vpop.f32.mrf.mxu1  ;;  %5789 = vmatmul.mubr.bf16.gmra.mxu1 %v6935_v41 }
 0x15f   : > { %v7340_v20 = vpop.f32.mrf.mxu0  ;;  %7969 = vst [vmem:[#allocation17_spill] sm:$0xff] %v7345_v46  ;;  %5792 = vmatprep.mubr.bf16.mxu1 %v6958_v56  ;;  %v6115_v46 = vld [vmem:[#allocation2 + $0xa0] ss:$0 sps:$4 sm:$0x33]  }
 0x160   : > { %v7350_v39 = vpop.f32.mrf.mxu1 }
 0x161   : > { %v5614_v10 = vpop.f32.mrf.mxu0  ;;  %5845 = vmatmul.mubr.bf16.gmra.mxu0 %v3608_v17  ;;  %7970 = vst [vmem:[#allocation18_spill] sm:$0xff] %v7350_v39  ;;  %v3614_v17 = vsel %vm3116_vm8, %v3611_v35, %v3613_v55 }
 0x162   : > { %5848 = vmatprep.mubr.bf16.mxu0 %v3610_v2  ;;  %v7353_v24 = vpop.f32.mrf.mxu1 }
 0x163   : > { %v1982_v49 = vpop.f32.mrf.mxu0  ;;  %7971 = vst [vmem:[#allocation19_spill] sm:$0xff] %v7353_v24  ;;  %v3615_v24 = vrot.slane %v6115_v46, 2 }
 0x164   : > { %v7356_v23 = vpop.f32.mrf.mxu1 }
 0x165   : > { %v5615_v8 = vpop.f32.mrf.mxu0  ;;  %7972 = vst [vmem:[#allocation20_spill] sm:$0xff] %v7356_v23 }
 0x166   : > { %v5562_v56 = vpop.f32.mrf.mxu1  ;;  %5793 = vmatmul.mubr.bf16.gmra.mxu1 %v6962_v31  ;;  %v3616_v31 = vsel %vm3116_vm8, %v3613_v55, %v3615_v24  ;;  %v4394_v24 = vrot.slane %v7171_v22, 3 }
 0x167   : > { %v1985_v41 = vpop.f32.mrf.mxu0  ;;  %v1689_v39 = vadd.f32 %v5562_v56, %v7173_v25  ;;  %5796 = vmatprep.mubr.bf16.mxu1 %v6991_v3  ;;  %v7973_v56 = vrot.slane %v7045_v48, 3 }
 0x168   : > { %v1680_v11 = vpop.f32.mrf.mxu1 }
 0x169   : > { %v5618_v2 = vpop.f32.mrf.mxu0  ;;  %5849 = vmatmul.mubr.bf16.gmra.mxu0 %v3612_v6  ;;  %v1681_v16 = vadd.f32 %v1680_v11, %v7179_v4  ;;  %v7363_v50 = vadd.f32 %v5614_v10, %v1689_v39 }
 0x16a   : > { %5852 = vmatprep.mubr.bf16.mxu0 %v3614_v17  ;;  %v5563_v23 = vpop.f32.mrf.mxu1 }
 0x16b   : > { %v1998_v63 = vpop.f32.mrf.mxu0  ;;  %v1692_v35 = vadd.f32 %v5563_v23, %v7193_v61  ;;  %v7367_v0 = vadd.f32 %v1982_v49, %v1681_v16  ;;  %v3948_v49 = vshll.u32 %v7171_v22, 16  ;;  %v4395_v16 = vsel %vm4388_vm14, %v7973_v56, %v4394_v24 }
 0x16c   : > { %v1683_v6 = vpop.f32.mrf.mxu1 }
 0x16d   : > { %v5619_v60 = vpop.f32.mrf.mxu0  ;;  %v1684_v3 = vadd.f32 %v1683_v6, %v7204_v33  ;;  %v7370_v17 = vadd.f32 %v5615_v8, %v1692_v35  ;;  %v3945_v33 = vshrl.u32 %v7171_v22, 16 }
 0x16e   : > { %v5566_v46 = vpop.f32.mrf.mxu1  ;;  %5797 = vmatmul.mubr.bf16.gmra.mxu1 %v6997_v14 }
 0x16f   : > { %v2001_v25 = vpop.f32.mrf.mxu0  ;;  %v1705_v10 = vadd.f32 %v5566_v46, %v7218_v15  ;;  %5800 = vmatprep.mubr.bf16.mxu1 %v7036_v45  ;;  %v7376_v61 = vadd.f32 %v1985_v41, %v1684_v3  ;;  %v3947_v35 = vrot.slane %v3945_v33, 2  ;;  %v4396_v46 = vrot.slane %v7185_v44, 3 }
 0x170   : > { %v1696_v23 = vpop.f32.mrf.mxu1  ;;  %v4398_v33 = vrot.slane %v7191_v28, 3 }
 0x171   : > { %v5622_v4 = vpop.f32.mrf.mxu0  ;;  %5853 = vmatmul.mubr.bf16.gmra.mxu0 %v3616_v31  ;;  %v1697_v14 = vadd.f32 %v1696_v23, %v7232_v12  ;;  %v7382_v11 = vadd.f32 %v5618_v2, %v1705_v10  ;;  %v3950_v31 = vrot.slane %v3948_v49, 3  ;;  %v7974_v2 = vld [vmem:[#allocation3_spill] sm:$0xff]  ;;  %v3966_v49 = vshll.u32 %v7191_v28, 16 }
 0x172   : > { %5924 = vmatprep.mubr.bf16.mxu0 %v7063_v34  ;;  %v5567_v39 = vpop.f32.mrf.mxu1 }
 0x173   : > { %v2014_v55 = vpop.f32.mrf.mxu0  ;;  %v1708_v45 = vadd.f32 %v5567_v39, %v7249_v7  ;;  %v7385_v8 = vadd.f32 %v1998_v63, %v1697_v14  ;;  %v3954_v7 = vshrl.u32 %v7185_v44, 16  ;;  %v3957_v63 = vshll.u32 %v7185_v44, 16 }
 0x174   : > { %v1699_v34 = vpop.f32.mrf.mxu1  ;;  %v3951_v23 = vor.u32 %v3950_v31, %v3947_v35 }
 0x175   : > { %v5623_v15 = vpop.f32.mrf.mxu0  ;;  %v1700_v22 = vadd.f32 %v1699_v34, %v7262_v52  ;;  %v7391_v6 = vadd.f32 %v5619_v60, %v1708_v45  ;;  %v3956_v45 = vrot.slane %v3954_v7, 2  ;;  %v3959_v34 = vrot.slane %v3957_v63, 3 }
 0x176   : > { %v5570_v12 = vpop.f32.mrf.mxu1  ;;  %5801 = vmatmul.mubr.bf16.gmra.mxu1 %v7974_v2  ;;  %v3952_v31 = vsel %vm3917_vm7, %v7090_v42, %v3951_v23  ;;  %v3972_v42 = vshrl.u32 %v7209_v38, 16  ;;  %v3975_v63 = vshll.u32 %v7209_v38, 16 }
 0x177   : > { %v2017_v41 = vpop.f32.mrf.mxu0  ;;  %v1721_v48 = vadd.f32 %v5570_v12, %v7279_v13  ;;  %5872 = vmatprep.mubr.bf16.mxu1 %v7088_v21  ;;  %v7400_v52 = vadd.f32 %v2001_v25, %v1700_v22  ;;  %v4397_v25 = vsel %vm4388_vm14, %v4394_v24, %v4396_v46  ;;  %v4400_v24 = vrot.slane %v7209_v38, 3 }
 0x178   : > { %v1712_v60 = vpop.f32.mrf.mxu1 }
 0x179   : > { %v5626_v3 = vpop.f32.mrf.mxu0  ;;  %5925 = vmatmul.mubr.bf16.vlgmr.msra.gmra.mxu0 %v7069_v37  ;;  %v3963_v37 = vshrl.u32 %v7191_v28, 16  ;;  %v1713_v14 = vadd.f32 %v1712_v60, %v7292_v58  ;;  %v7406_v39 = vadd.f32 %v5622_v4, %v1721_v48  ;;  %v4399_v28 = vsel %vm4388_vm14, %v4396_v46, %v4398_v33 }
 0x17a   : > { %5928 = vmatprep.mubr.bf16.mxu0 %v4395_v16  ;;  %v5571_v13 = vpop.f32.mrf.mxu1  ;;  %v3968_v4 = vrot.slane %v3966_v49, 3  ;;  %v3981_v60 = vshrl.u32 %v7215_v1, 16  ;;  %v4401_v38 = vsel %vm4388_vm14, %v4398_v33, %v4400_v24 }
 0x17b   : > { %v2030_v10 = vpop.f32.mrf.mxu0  ;;  %v1724_v44 = vadd.f32 %v5571_v13, %v7306_v54  ;;  %v7410_v56 = vadd.f32 %v2014_v55, %v1713_v14  ;;  %v3965_v58 = vrot.slane %v3963_v37, 2  ;;  %v3960_v55 = vor.u32 %v3959_v34, %v3956_v45 }
 0x17c   : > { %v1715_v16 = vpop.f32.mrf.mxu1  ;;  %v3984_v37 = vshll.u32 %v7215_v1, 16  ;;  %v3974_v34 = vrot.slane %v3972_v42, 2  ;;  %v4406_v42 = vrot.slane %v7242_v47, 3 }
 0x17d   : > { %v5627_v21 = vpop.f32.mrf.mxu0  ;;  %v1716_v22 = vadd.f32 %v1715_v16, %v7313_v29  ;;  %v7416_v12 = vadd.f32 %v5623_v15, %v1724_v44  ;;  %v3969_v46 = vor.u32 %v3968_v4, %v3965_v58  ;;  %v3961_v45 = vsel %vm3917_vm7, %v3951_v23, %v3960_v55 }
 0x17e   : > { %v5574_v2 = vpop.f32.mrf.mxu1  ;;  %5873 = vmatmul.mubr.bf16.vlgmr.msra.gmra.mxu1 %v7098_v26  ;;  %v4402_v26 = vrot.slane %v7215_v1, 3  ;;  %v3977_v44 = vrot.slane %v3975_v63, 3  ;;  %v3999_v63 = vshrl.u32 %v7242_v47, 16 }
 0x17f   : > { %v2033_v35 = vpop.f32.mrf.mxu0  ;;  %v1737_v7 = vadd.f32 %v5574_v2, %v7324_v5  ;;  %5876 = vmatprep.mubr.bf16.mxu1 %v3952_v31  ;;  %v7423_v48 = vadd.f32 %v2017_v41, %v1716_v22  ;;  %v3970_v1 = vsel %vm3917_vm7, %v3960_v55, %v3969_v46  ;;  %v4404_v55 = vrot.slane %v7237_v43, 3 }
 0x180   : > { %v1728_v29 = vpop.f32.mrf.mxu1  ;;  %v3978_v2 = vor.u32 %v3977_v44, %v3974_v34 }
 0x181   : > { %v5630_v54 = vpop.f32.mrf.mxu0  ;;  %5929 = vmatmul.mubr.bf16.gmra.mxu0 %v4397_v25  ;;  %v1729_v49 = vadd.f32 %v1728_v29, %v7330_v36  ;;  %v7429_v5 = vadd.f32 %v5626_v3, %v1737_v7  ;;  %v4403_v36 = vsel %vm4388_vm14, %v4400_v24, %v4402_v26  ;;  %v3983_v3 = vrot.slane %v3981_v60, 2 }
 0x182   : > { %5932 = vmatprep.mubr.bf16.mxu0 %v4399_v28  ;;  %v5575_v14 = vpop.f32.mrf.mxu1  ;;  %v3986_v28 = vrot.slane %v3984_v37, 3  ;;  %v4002_v29 = vshll.u32 %v7242_v47, 16 }
 0x183   : > { %v2046_v15 = vpop.f32.mrf.mxu0  ;;  %v1740_v41 = vadd.f32 %v5575_v14, %v7335_v51  ;;  %v7434_v25 = vadd.f32 %v2030_v10, %v1729_v49  ;;  %v3990_v51 = vshrl.u32 %v7237_v43, 16  ;;  %v3993_v10 = vshll.u32 %v7237_v43, 16 }
 0x184   : > { %v1731_v16 = vpop.f32.mrf.mxu1  ;;  %v3987_v7 = vor.u32 %v3986_v28, %v3983_v3  ;;  %v4008_v28 = vshrl.u32 %v7267_v19, 16 }
 0x185   : > { %v5631_v13 = vpop.f32.mrf.mxu0  ;;  %v1732_v58 = vadd.f32 %v1731_v16, %v7340_v20  ;;  %v7439_v4 = vadd.f32 %v5627_v21, %v1740_v41  ;;  %v3992_v14 = vrot.slane %v3990_v51, 2  ;;  %v4004_v16 = vrot.slane %v4002_v29, 3 }
 0x186   : > { %v5578_v23 = vpop.f32.mrf.mxu1  ;;  %5877 = vmatmul.mubr.bf16.gmra.mxu1 %v3961_v45  ;;  %v3995_v45 = vrot.slane %v3993_v10, 3  ;;  %v3988_v47 = vsel %vm3917_vm7, %v3978_v2, %v3987_v7  ;;  %v4410_v10 = vrot.slane %v7270_v32, 3 }
 0x187   : > { %v2049_v31 = vpop.f32.mrf.mxu0  ;;  %v1753_v22 = vadd.f32 %v5578_v23, %v7159_v18  ;;  %5880 = vmatprep.mubr.bf16.mxu1 %v3970_v1  ;;  %v7445_v24 = vadd.f32 %v2033_v35, %v1732_v58  ;;  %v3979_v35 = vsel %vm3917_vm7, %v3969_v46, %v3978_v2  ;;  %v4011_v58 = vshll.u32 %v7267_v19, 16 }
 0x188   : > { %v1744_v20 = vpop.f32.mrf.mxu1  ;;  %v3996_v46 = vor.u32 %v3995_v45, %v3992_v14  ;;  %v4020_v2 = vshll.u32 %v7270_v32, 16 }
 0x189   : > { %v5634_v33 = vpop.f32.mrf.mxu0  ;;  %5933 = vmatmul.mubr.bf16.gmra.mxu0 %v4401_v38  ;;  %v1745_v60 = vadd.f32 %v1744_v20, %v7165_v27  ;;  %v7451_v37 = vadd.f32 %v5630_v54, %v1753_v22  ;;  %v4405_v38 = vsel %vm4388_vm14, %v4402_v26, %v4404_v55  ;;  %v4407_v27 = vsel %vm4388_vm14, %v4404_v55, %v4406_v42 }
 0x18a   : > { %5936 = vmatprep.mubr.bf16.mxu0 %v4403_v36  ;;  %v5579_v18 = vpop.f32.mrf.mxu1  ;;  %v4001_v54 = vrot.slane %v3999_v63, 2  ;;  %v4017_v22 = vshrl.u32 %v7270_v32, 16  ;;  %v3997_v29 = vsel %vm3917_vm7, %v3987_v7, %v3996_v46 }
 0x18b   : > { %v2062_v21 = vpop.f32.mrf.mxu0  ;;  %v1756_v43 = vadd.f32 %v5579_v18, %v7175_v57  ;;  %v7456_v41 = vadd.f32 %v2046_v15, %v1745_v60  ;;  %v4408_v15 = vrot.slane %v7267_v19, 3  ;;  %v4010_v60 = vrot.slane %v4008_v28, 2 }
 0x18c   : > { %v1747_v34 = vpop.f32.mrf.mxu1  ;;  %v4005_v51 = vor.u32 %v4004_v16, %v4001_v54  ;;  %v4013_v18 = vrot.slane %v4011_v58, 3  ;;  %v4412_v16 = vrot.slane %v7297_v59, 3  ;;  %v7977_v58 = vld [vmem:[#allocation5_spill] sm:$0xff] }
 0x18d   : > { %v5635_v49 = vpop.f32.mrf.mxu0  ;;  %v1748_v1 = vadd.f32 %v1747_v34, %v7181_v40  ;;  %v7461_v36 = vadd.f32 %v5631_v13, %v1756_v43  ;;  %v4409_v19 = vsel %vm4388_vm14, %v4406_v42, %v4408_v15 }
 0x18e   : > { %v5582_v3 = vpop.f32.mrf.mxu1  ;;  %5881 = vmatmul.mubr.bf16.gmra.mxu1 %v3979_v35  ;;  %v4006_v32 = vsel %vm3917_vm7, %v3996_v46, %v4005_v51  ;;  %v4022_v35 = vrot.slane %v4020_v2, 3  ;;  %v4014_v54 = vor.u32 %v4013_v18, %v4010_v60  ;;  %v7976_v46 = vld [vmem:[#allocation8_spill] sm:$0xff] }
 0x18f   : > { %v2065_v44 = vpop.f32.mrf.mxu0  ;;  %v1769_v26 = vadd.f32 %v5582_v3, %v7195_v9  ;;  %5884 = vmatprep.mubr.bf16.mxu1 %v3988_v47  ;;  %v7467_v23 = vadd.f32 %v2049_v31, %v1748_v1  ;;  %v7975_v47 = vld [vmem:[#allocation4_spill] sm:$0xff]  ;;  %v4038_v28 = vshll.u32 %v7976_v46, 16 }
 0x190   : > { %v1760_v40 = vpop.f32.mrf.mxu1 }
 0x191   : > { %v5638_v57 = vpop.f32.mrf.mxu0  ;;  %5937 = vmatmul.mubr.bf16.gmra.mxu0 %v4405_v38  ;;  %v1761_v55 = vadd.f32 %v1760_v40, %v7206_v62  ;;  %v7473_v9 = vadd.f32 %v5634_v33, %v1769_v26  ;;  %v4411_v62 = vsel %vm4388_vm14, %v4408_v15, %v4410_v10  ;;  %v4019_v33 = vrot.slane %v4017_v22, 2 }
 0x192   : > { %5940 = vmatprep.mubr.bf16.mxu0 %v4407_v27  ;;  %v5583_v20 = vpop.f32.mrf.mxu1  ;;  %v4414_v15 = vrot.slane %v7976_v46, 3  ;;  %v4035_v26 = vshrl.u32 %v7976_v46, 16 }
 0x193   : > { %v2078_v13 = vpop.f32.mrf.mxu0  ;;  %v1772_v31 = vadd.f32 %v5583_v20, %v7220_v30  ;;  %v7478_v14 = vadd.f32 %v2062_v21, %v1761_v55  ;;  %v4026_v30 = vshrl.u32 %v7297_v59, 16  ;;  %v4029_v21 = vshll.u32 %v7297_v59, 16  ;;  %v7978_v59 = vld [vmem:[#allocation6_spill] sm:$0xff] }
 0x194   : > { %v1763_v45 = vpop.f32.mrf.mxu1  ;;  %v4023_v3 = vor.u32 %v4022_v35, %v4019_v33  ;;  %v4040_v33 = vrot.slane %v4038_v28, 3  ;;  %v7979_v35 = vld [vmem:[#allocation7_spill] sm:$0xff]  ;;  %v7982_v28 = vld [vmem:[#allocation12_spill] sm:$0xff] }
 0x195   : > { %v5639_v63 = vpop.f32.mrf.mxu0  ;;  %v1764_v38 = vadd.f32 %v1763_v45, %v7234_v53  ;;  %v7483_v34 = vadd.f32 %v5635_v49, %v1772_v31  ;;  %v4028_v20 = vrot.slane %v4026_v30, 2  ;;  %v4413_v31 = vsel %vm4388_vm14, %v4410_v10, %v4412_v16  ;;  %v7980_v10 = vld [vmem:[#allocation11_spill] sm:$0xff] }
 0x196   : > { %v5586_v7 = vpop.f32.mrf.mxu1  ;;  %5885 = vmatmul.mubr.bf16.gmra.mxu1 %v3997_v29  ;;  %v4031_v29 = vrot.slane %v4029_v21, 3 }
 0x197   : > { %v2081_v43 = vpop.f32.mrf.mxu0  ;;  %v1785_v27 = vadd.f32 %v5586_v7, %v7975_v47  ;;  %5888 = vmatprep.mubr.bf16.mxu1 %v4006_v32  ;;  %v7489_v1 = vadd.f32 %v2065_v44, %v1764_v38  ;;  %v4024_v32 = vsel %vm3917_vm7, %v4014_v54, %v4023_v3  ;;  %v7981_v47 = vld [vmem:[#allocation9_spill] sm:$0xff] }
 0x198   : > { %v1776_v53 = vpop.f32.mrf.mxu1 }
 0x199   : > { %v5642_v42 = vpop.f32.mrf.mxu0  ;;  %5941 = vmatmul.mubr.bf16.gmra.mxu0 %v4409_v19  ;;  %v1777_v40 = vadd.f32 %v1776_v53, %v7977_v58  ;;  %v7495_v22 = vadd.f32 %v5638_v57, %v1785_v27  ;;  %v4015_v19 = vsel %vm3917_vm7, %v4005_v51, %v4014_v54  ;;  %v4037_v57 = vrot.slane %v4035_v26, 2 }
 0x19a   : > { %5944 = vmatprep.mubr.bf16.mxu0 %v4411_v62  ;;  %v5587_v2 = vpop.f32.mrf.mxu1  ;;  %v4415_v62 = vsel %vm4388_vm14, %v4412_v16, %v4414_v15  ;;  %v4032_v51 = vor.u32 %v4031_v29, %v4028_v20  ;;  %v4044_v54 = vshrl.u32 %v7980_v10, 16  ;;  %v4047_v16 = vshll.u32 %v7980_v10, 16  ;;  %v7983_v20 = vld [vmem:[#allocation10_spill] sm:$0xff] }
 0x19b   : > { %v2094_v49 = vpop.f32.mrf.mxu0  ;;  %v1788_v44 = vadd.f32 %v5587_v2, %v7978_v59  ;;  %v7500_v60 = vadd.f32 %v2078_v13, %v1777_v40  ;;  %v4416_v13 = vrot.slane %v7980_v10, 3  ;;  %v4041_v26 = vor.u32 %v4040_v33, %v4037_v57 }
 0x19c   : > { %v1779_v18 = vpop.f32.mrf.mxu1  ;;  %v4418_v58 = vrot.slane %v7982_v28, 3  ;;  %v4053_v40 = vshrl.u32 %v7982_v28, 16  ;;  %v4056_v2 = vshll.u32 %v7982_v28, 16  ;;  %v4049_v57 = vrot.slane %v4047_v16, 3 }
 0x19d   : > { %v5643_v55 = vpop.f32.mrf.mxu0  ;;  %v1780_v38 = vadd.f32 %v1779_v18, %v7979_v35  ;;  %v7505_v7 = vadd.f32 %v5639_v63, %v1788_v44  ;;  %v7984_v18 = vld [vmem:[#allocation13_spill] sm:$0xff] }
 0x19e   : > { %v5590_v30 = vpop.f32.mrf.mxu1  ;;  %5889 = vmatmul.mubr.bf16.gmra.mxu1 %v4015_v19  ;;  %v4419_v10 = vsel %vm4388_vm14, %v4416_v13, %v4418_v58 }
 0x19f   : > { %v2097_v45 = vpop.f32.mrf.mxu0  ;;  %v1801_v27 = vadd.f32 %v5590_v30, %v7981_v47  ;;  %5892 = vmatprep.mubr.bf16.mxu1 %v4024_v32  ;;  %v7511_v53 = vadd.f32 %v2081_v43, %v1780_v38  ;;  %v4417_v43 = vsel %vm4388_vm14, %v4414_v15, %v4416_v13  ;;  %v4042_v30 = vsel %vm3917_vm7, %v4032_v51, %v4041_v26 }
 0x1a0   : > { %v1792_v46 = vpop.f32.mrf.mxu1  ;;  %v4058_v47 = vrot.slane %v4056_v2, 3 }
 0x1a1   : > { %v5646_v21 = vpop.f32.mrf.mxu0  ;;  %5945 = vmatmul.mubr.bf16.gmra.mxu0 %v4413_v31  ;;  %v1793_v29 = vadd.f32 %v1792_v46, %v7983_v20  ;;  %v7517_v59 = vadd.f32 %v5642_v42, %v1801_v27  ;;  %v4033_v31 = vsel %vm3917_vm7, %v4023_v3, %v4032_v51  ;;  %v4055_v42 = vrot.slane %v4053_v40, 2  ;;  %v7985_v27 = vld [vmem:[#allocation14_spill] sm:$0xff]  ;;  %v7988_v20 = vld [vmem:[#allocation17_spill] sm:$0xff] }
 0x1a2   : > { %5948 = vmatprep.mubr.bf16.mxu0 %v4415_v62  ;;  %v5591_v44 = vpop.f32.mrf.mxu1  ;;  %v4046_v62 = vrot.slane %v4044_v54, 2  ;;  %v7987_v54 = vld [vmem:[#allocation15_spill] sm:$0xff] }
 0x1a3   : > { %v2110_v63 = vpop.f32.mrf.mxu0  ;;  %v1804_v32 = vadd.f32 %v5591_v44, %v7984_v18  ;;  %v7522_v33 = vadd.f32 %v2094_v49, %v1793_v29  ;;  %v4062_v16 = vshrl.u32 %v7987_v54, 16  ;;  %v4065_v49 = vshll.u32 %v7987_v54, 16  ;;  %v7990_v18 = vld [vmem:[#allocation16_spill] sm:$0xff] }
 0x1a4   : > { %v1795_v35 = vpop.f32.mrf.mxu1  ;;  %v4050_v51 = vor.u32 %v4049_v57, %v4046_v62  ;;  %v4420_v13 = vrot.slane %v7987_v54, 3  ;;  %v4059_v44 = vor.u32 %v4058_v47, %v4055_v42 }
 0x1a5   : > { %v5647_v19 = vpop.f32.mrf.mxu0  ;;  %v1796_v46 = vadd.f32 %v1795_v35, %v7985_v27  ;;  %v7527_v28 = vadd.f32 %v5643_v55, %v1804_v32  ;;  %v4074_v32 = vshll.u32 %v7990_v18, 16  ;;  %v7991_v35 = vld [vmem:[#allocation18_spill] sm:$0xff]  ;;  %v4064_v57 = vrot.slane %v4062_v16, 2 }
 0x1a6   : > { %v5594_v3 = vpop.f32.mrf.mxu1  ;;  %5893 = vmatmul.mubr.bf16.gmra.mxu1 %v4033_v31  ;;  %v4422_v31 = vrot.slane %v7990_v18, 3  ;;  %v4051_v54 = vsel %vm3917_vm7, %v4041_v26, %v4050_v51  ;;  %v4421_v42 = vsel %vm4388_vm14, %v4418_v58, %v4420_v13 }
 0x1a7   : > { %v2113_v38 = vpop.f32.mrf.mxu0  ;;  %7986 = vst [vmem:[#allocation3_spill] sm:$0xff] %v7527_v28  ;;  %v1817_v29 = vadd.f32 %v5594_v3, %v7988_v20  ;;  %5896 = vmatprep.mubr.bf16.mxu1 %v4042_v30  ;;  %v7533_v40 = vadd.f32 %v2097_v45, %v1796_v46  ;;  %v6119_v3 = vld [vmem:[#allocation2 + $0xa0] ss:$0 sps:$4 sm:$0x77]   ;;  %v7993_v45 = vld [vmem:[#allocation19_spill] sm:$0xff] }
 0x1a8   : > { %v1808_v2 = vpop.f32.mrf.mxu1  ;;  %v4424_v58 = vrot.slane %v6119_v3, 3 }
 0x1a9   : > { %v5718_v15 = vpop.f32.mrf.mxu0  ;;  %5949 = vmatmul.mubr.bf16.gmra.mxu0 %v4417_v43  ;;  %7989 = vst [vmem:[#allocation4_spill] sm:$0xff] %v7533_v40  ;;  %v4071_v43 = vshrl.u32 %v7990_v18, 16  ;;  %v1809_v27 = vadd.f32 %v1808_v2, %v7991_v35  ;;  %v7539_v28 = vadd.f32 %v5646_v21, %v1817_v29  ;;  %v4060_v18 = vsel %vm3917_vm7, %v4050_v51, %v4059_v44  ;;  %v7994_v35 = vld [vmem:[#allocation20_spill] sm:$0xff] }
 0x1aa   : > { %5952 = vmatprep.mubr.bf16.mxu0 %v4419_v10  ;;  %v5595_v30 = vpop.f32.mrf.mxu1  ;;  %v4067_v10 = vrot.slane %v4065_v49, 3  ;;  %v4423_v21 = vsel %vm4388_vm14, %v4420_v13, %v4422_v31  ;;  %v4076_v2 = vrot.slane %v4074_v32, 3  ;;  %v4083_v51 = vshll.u32 %v6119_v3, 16 }
 0x1ab   : > { %v2916_v55 = vpop.f32.mrf.mxu0  ;;  %7992 = vst [vmem:[#allocation8_spill] sm:$0xff] %v7539_v28  ;;  %v1820_v46 = vadd.f32 %v5595_v30, %v7993_v45  ;;  %v7544_v47 = vadd.f32 %v2110_v63, %v1809_v27  ;;  %v4073_v29 = vrot.slane %v4071_v43, 2  ;;  %v4080_v27 = vshrl.u32 %v6119_v3, 16 }
 0x1ac   : > { %v1811_v20 = vpop.f32.mrf.mxu1  ;;  %v4068_v26 = vor.u32 %v4067_v10, %v4064_v57  ;;  %v4425_v10 = vsel %vm4388_vm14, %v4422_v31, %v4424_v58 }
 0x1ad   : > { %v5719_v62 = vpop.f32.mrf.mxu0  ;;  %v1812_v16 = vadd.f32 %v1811_v20, %v7994_v35  ;;  %v7549_v49 = vadd.f32 %v5647_v19, %v1820_v46  ;;  %v4077_v32 = vor.u32 %v4076_v2, %v4073_v29 }
 0x1ae   : > { %v5666_v28 = vpop.f32.mrf.mxu1  ;;  %5897 = vmatmul.mubr.bf16.gmra.mxu1 %v4051_v54  ;;  %v4069_v57 = vsel %vm3917_vm7, %v4059_v44, %v4068_v26 }
 0x1af   : > { %v2919_v40 = vpop.f32.mrf.mxu0  ;;  %v2590_v63 = vadd.f32 %v5666_v28, %v7363_v50  ;;  %5900 = vmatprep.mubr.bf16.mxu1 %v4060_v18  ;;  %v7552_v45 = vadd.f32 %v2113_v38, %v1812_v16  ;;  %v4082_v28 = vrot.slane %v4080_v27, 2 }
 0x1b0   : > { %v2445_v13 = vpop.f32.mrf.mxu1 }
 0x1b1   : > { %v5722_v30 = vpop.f32.mrf.mxu0  ;;  %5953 = vmatmul.mubr.bf16.gmra.mxu0 %v4421_v42  ;;  %v2588_v19 = vadd.f32 %v2445_v13, %v7367_v0  ;;  %v7555_v46 = vadd.f32 %v5718_v15, %v2590_v63  ;;  %v4085_v42 = vrot.slane %v4083_v51, 3 }
 0x1b2   : > { %5956 = vmatprep.mubr.bf16.mxu0 %v4423_v21  ;;  %v5667_v54 = vpop.f32.mrf.mxu1  ;;  %v4078_v21 = vsel %vm3917_vm7, %v4068_v26, %v4077_v32 }
 0x1b3   : > { %v2932_v43 = vpop.f32.mrf.mxu0  ;;  %v2591_v50 = vadd.f32 %v5667_v54, %v7370_v17  ;;  %v7560_v3 = vadd.f32 %v2916_v55, %v2588_v19  ;;  %v4086_v17 = vor.u32 %v4085_v42, %v4082_v28 }
 0x1b4   : > { %v2448_v38 = vpop.f32.mrf.mxu1 }
 0x1b5   : > { %v5723_v20 = vpop.f32.mrf.mxu0  ;;  %v2589_v0 = vadd.f32 %v2448_v38, %v7376_v61  ;;  %v7564_v15 = vadd.f32 %v5719_v62, %v2591_v50  ;;  %v4087_v63 = vsel %vm3917_vm7, %v4077_v32, %v4086_v17 }
 0x1b6   : > { %v5670_v29 = vpop.f32.mrf.mxu1  ;;  %5901 = vmatmul.mubr.bf16.gmra.mxu1 %v4069_v57 }
 0x1b7   : > { %v2935_v18 = vpop.f32.mrf.mxu0  ;;  %v2594_v44 = vadd.f32 %v5670_v29, %v7382_v11  ;;  %5904 = vmatprep.mubr.bf16.mxu1 %v4078_v21  ;;  %v7567_v31 = vadd.f32 %v2919_v40, %v2589_v0 }
 0x1b8   : > { %v2461_v55 = vpop.f32.mrf.mxu1 }
 0x1b9   : > { %v5726_v2 = vpop.f32.mrf.mxu0  ;;  %5957 = vmatmul.mubr.bf16.gmra.mxu0 %v4425_v10  ;;  %v2592_v16 = vadd.f32 %v2461_v55, %v7385_v8  ;;  %v7570_v58 = vadd.f32 %v5722_v30, %v2594_v44 }
 0x1ba   : > { %v5671_v26 = vpop.f32.mrf.mxu1 }
 0x1bb   : > { %v2948_v35 = vpop.f32.mrf.mxu0  ;;  %v2595_v62 = vadd.f32 %v5671_v26, %v7391_v6  ;;  %v7574_v27 = vadd.f32 %v2932_v43, %v2592_v16 }
 0x1bc   : > { %v2464_v51 = vpop.f32.mrf.mxu1 }
 0x1bd   : > { %v5727_v61 = vpop.f32.mrf.mxu0  ;;  %v2593_v13 = vadd.f32 %v2464_v51, %v7400_v52  ;;  %v7577_v40 = vadd.f32 %v5723_v20, %v2595_v62 }
 0x1be   : > { %v5674_v19 = vpop.f32.mrf.mxu1  ;;  %5905 = vmatmul.mubr.bf16.gmra.mxu1 %v4087_v63 }
 0x1bf   : > { %v2951_v11 = vpop.f32.mrf.mxu0  ;;  %v2598_v8 = vadd.f32 %v5674_v19, %v7406_v39  ;;  %v7580_v30 = vadd.f32 %v2935_v18, %v2593_v13 }
 0x1c0   : > { %v2477_v57 = vpop.f32.mrf.mxu1 }
 0x1c1   : > { %v5730_v54 = vpop.f32.mrf.mxu0  ;;  %v2596_v6 = vadd.f32 %v2477_v57, %v7410_v56  ;;  %v7583_v32 = vadd.f32 %v5726_v2, %v2598_v8 }
 0x1c2   : > { %v5675_v43 = vpop.f32.mrf.mxu1 }
 0x1c3   : > { %v2964_v10 = vpop.f32.mrf.mxu0  ;;  %v2599_v28 = vadd.f32 %v5675_v43, %v7416_v12  ;;  %v7586_v52 = vadd.f32 %v2948_v35, %v2596_v6 }
 0x1c4   : > { %v2480_v20 = vpop.f32.mrf.mxu1 }
 0x1c5   : > { %v5731_v50 = vpop.f32.mrf.mxu0  ;;  %v2597_v38 = vadd.f32 %v2480_v20, %v7423_v48  ;;  %v7589_v21 = vadd.f32 %v5727_v61, %v2599_v28 }
 0x1c6   : > { %v5678_v39 = vpop.f32.mrf.mxu1 }
 0x1c7   : > { %v2967_v42 = vpop.f32.mrf.mxu0  ;;  %v2602_v0 = vadd.f32 %v5678_v39, %v7429_v5  ;;  %v7592_v29 = vadd.f32 %v2951_v11, %v2597_v38 }
 0x1c8   : > { %v2493_v56 = vpop.f32.mrf.mxu1 }
 0x1c9   : > { %v5734_v18 = vpop.f32.mrf.mxu0  ;;  %v2600_v44 = vadd.f32 %v2493_v56, %v7434_v25  ;;  %v7595_v17 = vadd.f32 %v5730_v54, %v2602_v0 }
 0x1ca   : > { %v5679_v12 = vpop.f32.mrf.mxu1 }
 0x1cb   : > { %v2980_v2 = vpop.f32.mrf.mxu0  ;;  %v2603_v35 = vadd.f32 %v5679_v12, %v7439_v4  ;;  %v7598_v16 = vadd.f32 %v2964_v10, %v2600_v44 }
 0x1cc   : > { %v2496_v48 = vpop.f32.mrf.mxu1 }
 0x1cd   : > { %v5735_v55 = vpop.f32.mrf.mxu0  ;;  %v2601_v61 = vadd.f32 %v2496_v48, %v7445_v24  ;;  %v7601_v62 = vadd.f32 %v5731_v50, %v2603_v35 }
 0x1ce   : > { %v5682_v5 = vpop.f32.mrf.mxu1 }
 0x1cf   : > { %v2983_v26 = vpop.f32.mrf.mxu0  ;;  %v2606_v51 = vadd.f32 %v5682_v5, %v7451_v37  ;;  %v7604_v11 = vadd.f32 %v2967_v42, %v2601_v61 }
 0x1d0   : > { %v2509_v25 = vpop.f32.mrf.mxu1 }
 0x1d1   : > { %v5738_v63 = vpop.f32.mrf.mxu0  ;;  %v2604_v19 = vadd.f32 %v2509_v25, %v7456_v41  ;;  %v7607_v54 = vadd.f32 %v5734_v18, %v2606_v51 }
 0x1d2   : > { %v5683_v4 = vpop.f32.mrf.mxu1 }
 0x1d3   : > { %v2996_v13 = vpop.f32.mrf.mxu0  ;;  %v2607_v57 = vadd.f32 %v5683_v4, %v7461_v36  ;;  %v7610_v10 = vadd.f32 %v2980_v2, %v2604_v19 }
 0x1d4   : > { %v2512_v24 = vpop.f32.mrf.mxu1 }
 0x1d5   : > { %v5739_v8 = vpop.f32.mrf.mxu0  ;;  %v2605_v43 = vadd.f32 %v2512_v24, %v7467_v23  ;;  %v7613_v50 = vadd.f32 %v5735_v55, %v2607_v57 }
 0x1d6   : > { %v5686_v37 = vpop.f32.mrf.mxu1 }
 0x1d7   : > { %v2999_v6 = vpop.f32.mrf.mxu0  ;;  %v2610_v20 = vadd.f32 %v5686_v37, %v7473_v9  ;;  %v7616_v42 = vadd.f32 %v2983_v26, %v2605_v43 }
 0x1d8   : > { %v2525_v41 = vpop.f32.mrf.mxu1 }
 0x1d9   : > { %v5742_v28 = vpop.f32.mrf.mxu0  ;;  %v2608_v39 = vadd.f32 %v2525_v41, %v7478_v14  ;;  %v7619_v18 = vadd.f32 %v5738_v63, %v2610_v20  ;;  %v7995_v41 = vld [vmem:[#allocation3_spill] sm:$0xff] }
 0x1da   : > { %v5687_v36 = vpop.f32.mrf.mxu1 }
 0x1db   : > { %v3012_v38 = vpop.f32.mrf.mxu0  ;;  %v2611_v56 = vadd.f32 %v5687_v36, %v7483_v34  ;;  %v7622_v2 = vadd.f32 %v2996_v13, %v2608_v39 }
 0x1dc   : > { %v2528_v23 = vpop.f32.mrf.mxu1 }
 0x1dd   : > { %v5743_v0 = vpop.f32.mrf.mxu0  ;;  %v2609_v12 = vadd.f32 %v2528_v23, %v7489_v1  ;;  %v7625_v55 = vadd.f32 %v5739_v8, %v2611_v56 }
 0x1de   : > { %v5690_v9 = vpop.f32.mrf.mxu1 }
 0x1df   : > { %v3015_v44 = vpop.f32.mrf.mxu0  ;;  %v2614_v48 = vadd.f32 %v5690_v9, %v7495_v22  ;;  %v7628_v26 = vadd.f32 %v2999_v6, %v2609_v12  ;;  %v7997_v12 = vld [vmem:[#allocation8_spill] sm:$0xff] }
 0x1e0   : > { %v2541_v14 = vpop.f32.mrf.mxu1 }
 0x1e1   : > { %v5746_v35 = vpop.f32.mrf.mxu0  ;;  %v2612_v5 = vadd.f32 %v2541_v14, %v7500_v60  ;;  %v7631_v63 = vadd.f32 %v5742_v28, %v2614_v48 }
 0x1e2   : > { %v5691_v34 = vpop.f32.mrf.mxu1 }
 0x1e3   : > { %v3028_v61 = vpop.f32.mrf.mxu0  ;;  %v2615_v25 = vadd.f32 %v5691_v34, %v7505_v7  ;;  %v7634_v13 = vadd.f32 %v3012_v38, %v2612_v5 }
 0x1e4   : > { %v2544_v1 = vpop.f32.mrf.mxu1 }
 0x1e5   : > { %v5747_v51 = vpop.f32.mrf.mxu0  ;;  %v2613_v4 = vadd.f32 %v2544_v1, %v7511_v53  ;;  %v7637_v8 = vadd.f32 %v5743_v0, %v2615_v25  ;;  %v7996_v0 = vld [vmem:[#allocation4_spill] sm:$0xff] }
 0x1e6   : > { %v5694_v22 = vpop.f32.mrf.mxu1 }
 0x1e7   : > { %v3031_v19 = vpop.f32.mrf.mxu0  ;;  %v2618_v24 = vadd.f32 %v5694_v22, %v7517_v59  ;;  %v7640_v6 = vadd.f32 %v3015_v44, %v2613_v4 }
 0x1e8   : > { %v2557_v60 = vpop.f32.mrf.mxu1 }
 0x1e9   : > { %v5750_v57 = vpop.f32.mrf.mxu0  ;;  %v2616_v37 = vadd.f32 %v2557_v60, %v7522_v33  ;;  %v7643_v28 = vadd.f32 %v5746_v35, %v2618_v24 }
 0x1ea   : > { %v5695_v7 = vpop.f32.mrf.mxu1 }
 0x1eb   : > { %v3044_v43 = vpop.f32.mrf.mxu0  ;;  %v2619_v38 = vadd.f32 %v5695_v7, %v7995_v41  ;;  %v7646_v39 = vadd.f32 %v3028_v61, %v2616_v37 }
 0x1ec   : > { %v2560_v53 = vpop.f32.mrf.mxu1 }
 0x1ed   : > { %v5751_v20 = vpop.f32.mrf.mxu0  ;;  %v2617_v56 = vadd.f32 %v2560_v53, %v7996_v0  ;;  %v7649_v23 = vadd.f32 %v5747_v51, %v2619_v38 }
 0x1ee   : > { %v5698_v59 = vpop.f32.mrf.mxu1 }
 0x1ef   : > { %v3047_v36 = vpop.f32.mrf.mxu0  ;;  %v2622_v9 = vadd.f32 %v5698_v59, %v7997_v12  ;;  %v7652_v48 = vadd.f32 %v3031_v19, %v2617_v56 }
 0x1f0   : > { %v2573_v33 = vpop.f32.mrf.mxu1 }
 0x1f1   : > { %v5822_v44 = vpop.f32.mrf.mxu0  ;;  %v2620_v14 = vadd.f32 %v2573_v33, %v7544_v47  ;;  %v7655_v5 = vadd.f32 %v5750_v57, %v2622_v9 }
 0x1f2   : > { %v5699_v61 = vpop.f32.mrf.mxu1 }
 0x1f3   : > { %v3717_v35 = vpop.f32.mrf.mxu0  ;;  %v2623_v25 = vadd.f32 %v5699_v61, %v7549_v49  ;;  %v7658_v1 = vadd.f32 %v3044_v43, %v2620_v14 }
 0x1f4   : > { %v2576_v51 = vpop.f32.mrf.mxu1 }
 0x1f5   : > { %v5823_v34 = vpop.f32.mrf.mxu0  ;;  %v2621_v22 = vadd.f32 %v2576_v51, %v7552_v45  ;;  %v7661_v24 = vadd.f32 %v5751_v20, %v2623_v25 }
 0x1f6   : > { %v5770_v19 = vpop.f32.mrf.mxu1 }
 0x1f7   : > { %v3720_v4 = vpop.f32.mrf.mxu0  ;;  %v3399_v37 = vadd.f32 %v5770_v19, %v7555_v46  ;;  %v7664_v7 = vadd.f32 %v3047_v36, %v2621_v22 }
 0x1f8   : > { %v3254_v47 = vpop.f32.mrf.mxu1 }
 0x1f9   : > { %v5826_v60 = vpop.f32.mrf.mxu0  ;;  %v3397_v41 = vadd.f32 %v3254_v47, %v7560_v3  ;;  %v7667_v38 = vadd.f32 %v5822_v44, %v3399_v37 }
 0x1fa   : > { %v5771_v49 = vpop.f32.mrf.mxu1 }
 0x1fb   : > { %v3733_v57 = vpop.f32.mrf.mxu0  ;;  %v3400_v53 = vadd.f32 %v5771_v49, %v7564_v15  ;;  %v7670_v0 = vadd.f32 %v3717_v35, %v3397_v41 }
 0x1fc   : > { %v3257_v45 = vpop.f32.mrf.mxu1 }
 0x1fd   : > { %v5827_v43 = vpop.f32.mrf.mxu0  ;;  %v3398_v56 = vadd.f32 %v3257_v45, %v7567_v31  ;;  %v7673_v59 = vadd.f32 %v5823_v34, %v3400_v53 }
 0x1fe   : > { %v5774_v46 = vpop.f32.mrf.mxu1 }
 0x1ff   : > { %v3736_v20 = vpop.f32.mrf.mxu0  ;;  %v3403_v12 = vadd.f32 %v5774_v46, %v7570_v58  ;;  %v7676_v9 = vadd.f32 %v3720_v4, %v3398_v56 }
 0x200   : > { %v3270_v3 = vpop.f32.mrf.mxu1 }
 0x201   : > { %v5830_v36 = vpop.f32.mrf.mxu0  ;;  %v3401_v33 = vadd.f32 %v3270_v3, %v7574_v27  ;;  %v7679_v14 = vadd.f32 %v5826_v60, %v3403_v12 }
 0x202   : > { %v5775_v15 = vpop.f32.mrf.mxu1 }
 0x203   : > { %v3749_v44 = vpop.f32.mrf.mxu0  ;;  %v3404_v61 = vadd.f32 %v5775_v15, %v7577_v40  ;;  %v7682_v25 = vadd.f32 %v3733_v57, %v3401_v33 }
 0x204   : > { %v3273_v31 = vpop.f32.mrf.mxu1 }
 0x205   : > { %v5831_v35 = vpop.f32.mrf.mxu0  ;;  %v3402_v51 = vadd.f32 %v3273_v31, %v7580_v30  ;;  %v7685_v22 = vadd.f32 %v5827_v43, %v3404_v61 }
 0x206   : > { %v5778_v58 = vpop.f32.mrf.mxu1 }
 0x207   : > { %v3752_v34 = vpop.f32.mrf.mxu0  ;;  %v3407_v19 = vadd.f32 %v5778_v58, %v7583_v32  ;;  %v7688_v37 = vadd.f32 %v3736_v20, %v3402_v51 }
 0x208   : > { %v3286_v27 = vpop.f32.mrf.mxu1 }
 0x209   : > { %v5834_v4 = vpop.f32.mrf.mxu0  ;;  %v3405_v47 = vadd.f32 %v3286_v27, %v7586_v52  ;;  %v7691_v41 = vadd.f32 %v5830_v36, %v3407_v19 }
 0x20a   : > { %v5779_v40 = vpop.f32.mrf.mxu1 }
 0x20b   : > { %v3765_v60 = vpop.f32.mrf.mxu0  ;;  %v3408_v49 = vadd.f32 %v5779_v40, %v7589_v21  ;;  %v7694_v53 = vadd.f32 %v3749_v44, %v3405_v47 }
 0x20c   : > { %v3289_v30 = vpop.f32.mrf.mxu1 }
 0x20d   : > { %v5835_v57 = vpop.f32.mrf.mxu0  ;;  %v3406_v45 = vadd.f32 %v3289_v30, %v7592_v29  ;;  %v7697_v56 = vadd.f32 %v5831_v35, %v3408_v49 }
 0x20e   : > { %v5782_v32 = vpop.f32.mrf.mxu1 }
 0x20f   : > { %v3768_v43 = vpop.f32.mrf.mxu0  ;;  %v3411_v46 = vadd.f32 %v5782_v32, %v7595_v17  ;;  %v7700_v12 = vadd.f32 %v3752_v34, %v3406_v45 }
 0x210   : > { %v3302_v52 = vpop.f32.mrf.mxu1 }
 0x211   : > { %v5838_v20 = vpop.f32.mrf.mxu0  ;;  %v3409_v3 = vadd.f32 %v3302_v52, %v7598_v16  ;;  %v7703_v33 = vadd.f32 %v5834_v4, %v3411_v46 }
 0x212   : > { %v5783_v21 = vpop.f32.mrf.mxu1 }
 0x213   : > { %v3781_v36 = vpop.f32.mrf.mxu0  ;;  %v3412_v15 = vadd.f32 %v5783_v21, %v7601_v62  ;;  %v7706_v61 = vadd.f32 %v3765_v60, %v3409_v3 }
 0x214   : > { %v3305_v29 = vpop.f32.mrf.mxu1 }
 0x215   : > { %v5839_v44 = vpop.f32.mrf.mxu0  ;;  %v3410_v31 = vadd.f32 %v3305_v29, %v7604_v11  ;;  %v7709_v51 = vadd.f32 %v5835_v57, %v3412_v15 }
 0x216   : > { %v5786_v17 = vpop.f32.mrf.mxu1 }
 0x217   : > { %v3784_v35 = vpop.f32.mrf.mxu0  ;;  %v3415_v58 = vadd.f32 %v5786_v17, %v7607_v54  ;;  %v7712_v19 = vadd.f32 %v3768_v43, %v3410_v31 }
 0x218   : > { %v3318_v16 = vpop.f32.mrf.mxu1 }
 0x219   : > { %v5842_v34 = vpop.f32.mrf.mxu0  ;;  %v3413_v27 = vadd.f32 %v3318_v16, %v7610_v10  ;;  %v7715_v47 = vadd.f32 %v5838_v20, %v3415_v58 }
 0x21a   : > { %v5787_v62 = vpop.f32.mrf.mxu1 }
 0x21b   : > { %v3797_v4 = vpop.f32.mrf.mxu0  ;;  %v3416_v40 = vadd.f32 %v5787_v62, %v7613_v50  ;;  %v7718_v49 = vadd.f32 %v3781_v36, %v3413_v27 }
 0x21c   : > { %v3321_v11 = vpop.f32.mrf.mxu1 }
 0x21d   : > { %v5843_v60 = vpop.f32.mrf.mxu0  ;;  %v3414_v30 = vadd.f32 %v3321_v11, %v7616_v42  ;;  %v7721_v45 = vadd.f32 %v5839_v44, %v3416_v40 }
 0x21e   : > { %v5790_v54 = vpop.f32.mrf.mxu1 }
 0x21f   : > { %v3800_v57 = vpop.f32.mrf.mxu0  ;;  %v3419_v32 = vadd.f32 %v5790_v54, %v7619_v18  ;;  %v7724_v46 = vadd.f32 %v3784_v35, %v3414_v30 }
 0x220   : > { %v3334_v10 = vpop.f32.mrf.mxu1 }
 0x221   : > { %v5846_v43 = vpop.f32.mrf.mxu0  ;;  %v3417_v52 = vadd.f32 %v3334_v10, %v7622_v2  ;;  %v7727_v3 = vadd.f32 %v5842_v34, %v3419_v32 }
 0x222   : > { %v5791_v50 = vpop.f32.mrf.mxu1 }
 0x223   : > { %v3813_v20 = vpop.f32.mrf.mxu0  ;;  %v3420_v21 = vadd.f32 %v5791_v50, %v7625_v55  ;;  %v7730_v15 = vadd.f32 %v3797_v4, %v3417_v52 }
 0x224   : > { %v3337_v42 = vpop.f32.mrf.mxu1 }
 0x225   : > { %v5847_v36 = vpop.f32.mrf.mxu0  ;;  %v3418_v29 = vadd.f32 %v3337_v42, %v7628_v26  ;;  %v7733_v31 = vadd.f32 %v5843_v60, %v3420_v21 }
 0x226   : > { %v5794_v18 = vpop.f32.mrf.mxu1 }
 0x227   : > { %v3816_v44 = vpop.f32.mrf.mxu0  ;;  %v3423_v17 = vadd.f32 %v5794_v18, %v7631_v63  ;;  %v7736_v58 = vadd.f32 %v3800_v57, %v3418_v29 }
 0x228   : > { %v3350_v2 = vpop.f32.mrf.mxu1 }
 0x229   : > { %v5850_v35 = vpop.f32.mrf.mxu0  ;;  %v3421_v16 = vadd.f32 %v3350_v2, %v7634_v13  ;;  %v7739_v27 = vadd.f32 %v5846_v43, %v3423_v17 }
 0x22a   : > { %v5795_v55 = vpop.f32.mrf.mxu1 }
 0x22b   : > { %v3829_v34 = vpop.f32.mrf.mxu0  ;;  %v3424_v62 = vadd.f32 %v5795_v55, %v7637_v8  ;;  %v7742_v40 = vadd.f32 %v3813_v20, %v3421_v16 }
 0x22c   : > { %v3353_v26 = vpop.f32.mrf.mxu1 }
 0x22d   : > { %v5851_v4 = vpop.f32.mrf.mxu0  ;;  %v3422_v11 = vadd.f32 %v3353_v26, %v7640_v6  ;;  %v7745_v30 = vadd.f32 %v5847_v36, %v3424_v62 }
 0x22e   : > { %v5798_v63 = vpop.f32.mrf.mxu1 }
 0x22f   : > { %v3832_v60 = vpop.f32.mrf.mxu0  ;;  %v3427_v54 = vadd.f32 %v5798_v63, %v7643_v28  ;;  %v7748_v32 = vadd.f32 %v3816_v44, %v3422_v11 }
 0x230   : > { %v3366_v13 = vpop.f32.mrf.mxu1 }
 0x231   : > { %v5854_v57 = vpop.f32.mrf.mxu0  ;;  %v3425_v10 = vadd.f32 %v3366_v13, %v7646_v39  ;;  %v7751_v52 = vadd.f32 %v5850_v35, %v3427_v54 }
 0x232   : > { %v5799_v8 = vpop.f32.mrf.mxu1 }
 0x233   : > { %v3845_v43 = vpop.f32.mrf.mxu0  ;;  %v3428_v50 = vadd.f32 %v5799_v8, %v7649_v23  ;;  %v7754_v21 = vadd.f32 %v3829_v34, %v3425_v10 }
 0x234   : > { %v3369_v6 = vpop.f32.mrf.mxu1 }
 0x235   : > { %v5855_v20 = vpop.f32.mrf.mxu0  ;;  %v3426_v42 = vadd.f32 %v3369_v6, %v7652_v48  ;;  %v7757_v29 = vadd.f32 %v5851_v4, %v3428_v50 }
 0x236   : > { %v5802_v28 = vpop.f32.mrf.mxu1 }
 0x237   : > { %v3848_v36 = vpop.f32.mrf.mxu0  ;;  %v3431_v18 = vadd.f32 %v5802_v28, %v7655_v5  ;;  %v7760_v39 = vadd.f32 %v3832_v60, %v3426_v42 }
 0x238   : > { %v3382_v35 = vpop.f32.mrf.mxu1 }
 0x239   : > { %v5926_v44 = vpop.f32.mrf.mxu0  ;;  %v3429_v2 = vadd.f32 %v3382_v35, %v7658_v1  ;;  %v7763_v23 = vadd.f32 %v5854_v57, %v3431_v18  ;;  %v7778_v57 = vld [vmem:[%s7899_s4] ss:$0 sm:$0xff] }
 0x23a   : > { %v5803_v34 = vpop.f32.mrf.mxu1 }
 0x23b   : > { %v4526_v17 = vpop.f32.mrf.mxu0  ;;  %v3432_v55 = vadd.f32 %v5803_v34, %v7661_v24  ;;  %v7766_v48 = vadd.f32 %v3845_v43, %v3429_v2 }
 0x23c   : > { %v3385_v4 = vpop.f32.mrf.mxu1 }
 0x23d   : > { %v5927_v16 = vpop.f32.mrf.mxu0  ;;  %v3430_v26 = vadd.f32 %v3385_v4, %v7664_v7  ;;  %v7769_v11 = vadd.f32 %v5855_v20, %v3432_v55 }
 0x23e   : > { %v5874_v5 = vpop.f32.mrf.mxu1 }
 0x23f   : > { %v4529_v62 = vpop.f32.mrf.mxu0  ;;  %v4333_v63 = vadd.f32 %v5874_v5, %v7667_v38  ;;  %v7773_v1 = vadd.f32 %v3848_v36, %v3430_v26 }
 0x240   : > { %v4188_v24 = vpop.f32.mrf.mxu1 }
 0x241   : > { %v5930_v60 = vpop.f32.mrf.mxu0  ;;  %v4671_v13 = vadd.f32 %v5926_v44, %v4333_v63  ;;  %v4331_v43 = vadd.f32 %v4188_v24, %v7670_v0 }
 0x242   : > { %v5875_v7 = vpop.f32.mrf.mxu1 }
 0x243   : > { %v4542_v54 = vpop.f32.mrf.mxu0  ;;  %v4714_v10 = vadd.f32 %v7778_v57, %v4671_v13  ;;  %v4669_v8 = vadd.f32 %v4526_v17, %v4331_v43  ;;  %v4334_v20 = vadd.f32 %v5875_v7, %v7673_v59 }
 0x244   : > { %v4191_v50 = vpop.f32.mrf.mxu1 }
 0x245   : > { %v5931_v38 = vpop.f32.mrf.mxu0  ;;  %4750 = vst [vmem:[%s7784_s19 + $0x10] sm:$0xff] %v4714_v10  ;;  %v4712_v0 = vadd.f32 %v7778_v57, %v4669_v8  ;;  %v4672_v36 = vadd.f32 %v5927_v16, %v4334_v20  ;;  %v4332_v42 = vadd.f32 %v4191_v50, %v7676_v9 }
 0x246   : > { %v5878_v28 = vpop.f32.mrf.mxu1 }
 0x247   : > { %v4545_v6 = vpop.f32.mrf.mxu0  ;;  %4748 = vst [vmem:[%s7784_s19] sm:$0xff] %v4712_v0  ;;  %v4715_v18 = vadd.f32 %v7778_v57, %v4672_v36  ;;  %v4670_v35 = vadd.f32 %v4529_v62, %v4332_v42  ;;  %v4337_v17 = vadd.f32 %v5878_v28, %v7679_v14 }
 0x248   : > { %v4204_v2 = vpop.f32.mrf.mxu1 }
 0x249   : > { %v5934_v44 = vpop.f32.mrf.mxu0  ;;  %4751 = vst [vmem:[%s7784_s19 + $0x18] sm:$0xff] %v4715_v18  ;;  %v4713_v34 = vadd.f32 %v7778_v57, %v4670_v35  ;;  %v4675_v55 = vadd.f32 %v5930_v60, %v4337_v17  ;;  %v4335_v16 = vadd.f32 %v4204_v2, %v7682_v25 }
 0x24a   : > { %v5879_v4 = vpop.f32.mrf.mxu1 }
 0x24b   : > { %v4558_v59 = vpop.f32.mrf.mxu0  ;;  %4749 = vst [vmem:[%s7784_s19 + $0x8] sm:$0xff] %v4713_v34  ;;  %v4718_v26 = vadd.f32 %v7778_v57, %v4675_v55  ;;  %v4673_v5 = vadd.f32 %v4542_v54, %v4335_v16  ;;  %v4338_v62 = vadd.f32 %v5879_v4, %v7685_v22 }
 0x24c   : > { %v4207_v63 = vpop.f32.mrf.mxu1 }
 0x24d   : > { %v5935_v9 = vpop.f32.mrf.mxu0  ;;  %4754 = vst [vmem:[%s7784_s19 + $0x30] sm:$0xff] %v4718_v26  ;;  %v4716_v24 = vadd.f32 %v7778_v57, %v4673_v5  ;;  %v4676_v13 = vadd.f32 %v5931_v38, %v4338_v62  ;;  %v4336_v60 = vadd.f32 %v4207_v63, %v7688_v37 }
 0x24e   : > { %v5882_v43 = vpop.f32.mrf.mxu1 }
 0x24f   : > { %v4561_v14 = vpop.f32.mrf.mxu0  ;;  %4752 = vst [vmem:[%s7784_s19 + $0x20] sm:$0xff] %v4716_v24  ;;  %v4719_v7 = vadd.f32 %v7778_v57, %v4676_v13  ;;  %v4674_v10 = vadd.f32 %v4545_v6, %v4336_v60  ;;  %v4341_v54 = vadd.f32 %v5882_v43, %v7691_v41 }
 0x250   : > { %v4220_v8 = vpop.f32.mrf.mxu1 }
 0x251   : > { %v5938_v25 = vpop.f32.mrf.mxu0  ;;  %4755 = vst [vmem:[%s7784_s19 + $0x38] sm:$0xff] %v4719_v7  ;;  %v4717_v20 = vadd.f32 %v7778_v57, %v4674_v10  ;;  %v4679_v50 = vadd.f32 %v5934_v44, %v4341_v54  ;;  %v4339_v38 = vadd.f32 %v4220_v8, %v7694_v53 }
 0x252   : > { %v5883_v0 = vpop.f32.mrf.mxu1 }
 0x253   : > { %v4574_v22 = vpop.f32.mrf.mxu0  ;;  %4753 = vst [vmem:[%s7784_s19 + $0x28] sm:$0xff] %v4717_v20  ;;  %v4722_v36 = vadd.f32 %v7778_v57, %v4679_v50  ;;  %v4677_v42 = vadd.f32 %v4558_v59, %v4339_v38  ;;  %v4342_v6 = vadd.f32 %v5883_v0, %v7697_v56 }
 0x254   : > { %v4223_v28 = vpop.f32.mrf.mxu1 }
 0x255   : > { %v5939_v37 = vpop.f32.mrf.mxu0  ;;  %4758 = vst [vmem:[%s7784_s19 + $0x50] sm:$0xff] %v4722_v36  ;;  %v4720_v18 = vadd.f32 %v7778_v57, %v4677_v42  ;;  %v4680_v35 = vadd.f32 %v5935_v9, %v4342_v6  ;;  %v4340_v44 = vadd.f32 %v4223_v28, %v7700_v12 }
 0x256   : > { %v5886_v17 = vpop.f32.mrf.mxu1 }
 0x257   : > { %v4577_v41 = vpop.f32.mrf.mxu0  ;;  %4756 = vst [vmem:[%s7784_s19 + $0x40] sm:$0xff] %v4720_v18  ;;  %v4723_v2 = vadd.f32 %v7778_v57, %v4680_v35  ;;  %v4678_v34 = vadd.f32 %v4561_v14, %v4340_v44  ;;  %v4345_v59 = vadd.f32 %v5886_v17, %v7703_v33 }
 0x258   : > { %v4236_v55 = vpop.f32.mrf.mxu1 }
 0x259   : > { %v5942_v53 = vpop.f32.mrf.mxu0  ;;  %4759 = vst [vmem:[%s7784_s19 + $0x58] sm:$0xff] %v4723_v2  ;;  %v4721_v16 = vadd.f32 %v7778_v57, %v4678_v34  ;;  %v4683_v4 = vadd.f32 %v5938_v25, %v4345_v59  ;;  %v4343_v9 = vadd.f32 %v4236_v55, %v7706_v61 }
 0x25a   : > { %v5887_v26 = vpop.f32.mrf.mxu1 }
 0x25b   : > { %v4590_v56 = vpop.f32.mrf.mxu0  ;;  %4757 = vst [vmem:[%s7784_s19 + $0x48] sm:$0xff] %v4721_v16  ;;  %v4726_v5 = vadd.f32 %v7778_v57, %v4683_v4  ;;  %v4681_v62 = vadd.f32 %v4574_v22, %v4343_v9  ;;  %v4346_v63 = vadd.f32 %v5887_v26, %v7709_v51 }
 0x25c   : > { %v4239_v14 = vpop.f32.mrf.mxu1 }
 0x25d   : > { %v5943_v12 = vpop.f32.mrf.mxu0  ;;  %4762 = vst [vmem:[%s7784_s19 + $0x70] sm:$0xff] %v4726_v5  ;;  %v4724_v24 = vadd.f32 %v7778_v57, %v4681_v62  ;;  %v4684_v13 = vadd.f32 %v5939_v37, %v4346_v63  ;;  %v4344_v60 = vadd.f32 %v4239_v14, %v7712_v19 }
 0x25e   : > { %v5890_v43 = vpop.f32.mrf.mxu1 }
 0x25f   : > { %v4593_v33 = vpop.f32.mrf.mxu0  ;;  %4760 = vst [vmem:[%s7784_s19 + $0x60] sm:$0xff] %v4724_v24  ;;  %v4727_v25 = vadd.f32 %v7778_v57, %v4684_v13  ;;  %v4682_v7 = vadd.f32 %v4577_v41, %v4344_v60  ;;  %v4349_v10 = vadd.f32 %v5890_v43, %v7715_v47 }
 0x260   : > { %v4252_v54 = vpop.f32.mrf.mxu1 }
 0x261   : > { %v5946_v61 = vpop.f32.mrf.mxu0  ;;  %4763 = vst [vmem:[%s7784_s19 + $0x78] sm:$0xff] %v4727_v25  ;;  %v4725_v8 = vadd.f32 %v7778_v57, %v4682_v7  ;;  %v4687_v22 = vadd.f32 %v5942_v53, %v4349_v10  ;;  %v4347_v20 = vadd.f32 %v4252_v54, %v7718_v49 }
 0x262   : > { %v5891_v50 = vpop.f32.mrf.mxu1 }
 0x263   : > { %v4606_v51 = vpop.f32.mrf.mxu0  ;;  %4761 = vst [vmem:[%s7784_s19 + $0x68] sm:$0xff] %v4725_v8  ;;  %v4730_v38 = vadd.f32 %v7778_v57, %v4687_v22  ;;  %v4685_v0 = vadd.f32 %v4590_v56, %v4347_v20  ;;  %v4350_v37 = vadd.f32 %v5891_v50, %v7721_v45 }
 0x264   : > { %v4255_v36 = vpop.f32.mrf.mxu1 }
 0x265   : > { %v5947_v19 = vpop.f32.mrf.mxu0  ;;  %4766 = vst [vmem:[%s7784_s19 + $0x90] sm:$0xff] %v4730_v38  ;;  %v4728_v42 = vadd.f32 %v7778_v57, %v4685_v0  ;;  %v4688_v6 = vadd.f32 %v5943_v12, %v4350_v37  ;;  %v4348_v28 = vadd.f32 %v4255_v36, %v7724_v46 }
 0x266   : > { %v5894_v41 = vpop.f32.mrf.mxu1 }
 0x267   : > { %v4609_v47 = vpop.f32.mrf.mxu0  ;;  %4764 = vst [vmem:[%s7784_s19 + $0x80] sm:$0xff] %v4728_v42  ;;  %v4731_v18 = vadd.f32 %v7778_v57, %v4688_v6  ;;  %v4686_v35 = vadd.f32 %v4593_v33, %v4348_v28  ;;  %v4353_v44 = vadd.f32 %v5894_v41, %v7727_v3 }
 0x268   : > { %v4268_v17 = vpop.f32.mrf.mxu1 }
 0x269   : > { %v5950_v49 = vpop.f32.mrf.mxu0  ;;  %4767 = vst [vmem:[%s7784_s19 + $0x98] sm:$0xff] %v4731_v18  ;;  %v4729_v53 = vadd.f32 %v7778_v57, %v4686_v35  ;;  %v4691_v2 = vadd.f32 %v5946_v61, %v4353_v44  ;;  %v4351_v34 = vadd.f32 %v4268_v17, %v7730_v15 }
 0x26a   : > { %v5895_v59 = vpop.f32.mrf.mxu1 }
 0x26b   : > { %v4622_v45 = vpop.f32.mrf.mxu0  ;;  %4765 = vst [vmem:[%s7784_s19 + $0x88] sm:$0xff] %v4729_v53  ;;  %v4734_v55 = vadd.f32 %v7778_v57, %v4691_v2  ;;  %v4689_v56 = vadd.f32 %v4606_v51, %v4351_v34  ;;  %v4354_v16 = vadd.f32 %v5895_v59, %v7733_v31 }
 0x26c   : > { %v4271_v4 = vpop.f32.mrf.mxu1 }
 0x26d   : > { %v5951_v46 = vpop.f32.mrf.mxu0  ;;  %4770 = vst [vmem:[%s7784_s19 + $0xb0] sm:$0xff] %v4734_v55  ;;  %v4732_v9 = vadd.f32 %v7778_v57, %v4689_v56  ;;  %v4692_v26 = vadd.f32 %v5947_v19, %v4354_v16  ;;  %v4352_v12 = vadd.f32 %v4271_v4, %v7736_v58 }
 0x26e   : > { %v5898_v5 = vpop.f32.mrf.mxu1 }
 0x26f   : > { %v4625_v3 = vpop.f32.mrf.mxu0  ;;  %4768 = vst [vmem:[%s7784_s19 + $0xa0] sm:$0xff] %v4732_v9  ;;  %v4735_v62 = vadd.f32 %v7778_v57, %v4692_v26  ;;  %v4690_v63 = vadd.f32 %v4609_v47, %v4352_v12  ;;  %v4357_v14 = vadd.f32 %v5898_v5, %v7739_v27 }
 0x270   : > { %v4284_v33 = vpop.f32.mrf.mxu1 }
 0x271   : > { %v5954_v15 = vpop.f32.mrf.mxu0  ;;  %4771 = vst [vmem:[%s7784_s19 + $0xb8] sm:$0xff] %v4735_v62  ;;  %v4733_v24 = vadd.f32 %v7778_v57, %v4690_v63  ;;  %v4695_v13 = vadd.f32 %v5950_v49, %v4357_v14  ;;  %v4355_v60 = vadd.f32 %v4284_v33, %v7742_v40 }
 0x272   : > { %v5899_v43 = vpop.f32.mrf.mxu1 }
 0x273   : > { %v4638_v31 = vpop.f32.mrf.mxu0  ;;  %4769 = vst [vmem:[%s7784_s19 + $0xa8] sm:$0xff] %v4733_v24  ;;  %v4738_v61 = vadd.f32 %v7778_v57, %v4695_v13  ;;  %v4693_v25 = vadd.f32 %v4622_v45, %v4355_v60  ;;  %v4358_v7 = vadd.f32 %v5899_v43, %v7745_v30 }
 0x274   : > { %v4287_v10 = vpop.f32.mrf.mxu1 }
 0x275   : > { %v5955_v58 = vpop.f32.mrf.mxu0  ;;  %4774 = vst [vmem:[%s7784_s19 + $0xd0] sm:$0xff] %v4738_v61  ;;  %v4736_v27 = vadd.f32 %v7778_v57, %v4693_v25  ;;  %v4696_v54 = vadd.f32 %v5951_v46, %v4358_v7  ;;  %v4356_v51 = vadd.f32 %v4287_v10, %v7748_v32 }
 0x276   : > { %v5902_v8 = vpop.f32.mrf.mxu1 }
 0x277   : > { %v4641_v22 = vpop.f32.mrf.mxu0  ;;  %4772 = vst [vmem:[%s7784_s19 + $0xc0] sm:$0xff] %v4736_v27  ;;  %v4739_v40 = vadd.f32 %v7778_v57, %v4696_v54  ;;  %v4694_v20 = vadd.f32 %v4625_v3, %v4356_v51  ;;  %v4361_v50 = vadd.f32 %v5902_v8, %v7751_v52 }
 0x278   : > { %v4300_v19 = vpop.f32.mrf.mxu1 }
 0x279   : > { %4775 = vst [vmem:[%s7784_s19 + $0xd8] sm:$0xff] %v4739_v40  ;;  %v4737_v30 = vadd.f32 %v7778_v57, %v4694_v20  ;;  %v4699_v38 = vadd.f32 %v5954_v15, %v4361_v50  ;;  %v4359_v0 = vadd.f32 %v4300_v19, %v7754_v21  ;;  %v5958_v36 = vpop.f32.mrf.mxu0 }
 0x27a   : > { %v5903_v37 = vpop.f32.mrf.mxu1 }
 0x27b   : > { %4773 = vst [vmem:[%s7784_s19 + $0xc8] sm:$0xff] %v4737_v30  ;;  %v4742_v32 = vadd.f32 %v7778_v57, %v4699_v38  ;;  %v4697_v47 = vadd.f32 %v4638_v31, %v4359_v0  ;;  %v4362_v42 = vadd.f32 %v5903_v37, %v7757_v29  ;;  %v4654_v49 = vpop.f32.mrf.mxu0 }
 0x27c   : > { %v4303_v6 = vpop.f32.mrf.mxu1 }
 0x27d   : > { %4778 = vst [vmem:[%s7784_s19 + $0xf0] sm:$0xff] %v4742_v32  ;;  %v4740_v52 = vadd.f32 %v7778_v57, %v4697_v47  ;;  %v4700_v28 = vadd.f32 %v5955_v58, %v4362_v42  ;;  %v4360_v41 = vadd.f32 %v4303_v6, %v7760_v39  ;;  %v5959_v2 = vpop.f32.mrf.mxu0 }
 0x27e   : > { %v5906_v18 = vpop.f32.mrf.mxu1 }
 0x27f   : > { %4776 = vst [vmem:[%s7784_s19 + $0xe0] sm:$0xff] %v4740_v52  ;;  %v4743_v21 = vadd.f32 %v7778_v57, %v4700_v28  ;;  %v4698_v35 = vadd.f32 %v4641_v22, %v4360_v41  ;;  %v4365_v44 = vadd.f32 %v5906_v18, %v7763_v23  ;;  %v4657_v4 = vpop.f32.mrf.mxu0 }
 0x280   : > { %v4316_v17 = vpop.f32.mrf.mxu1 }
 0x281   : > { %4779 = vst [vmem:[%s7784_s19 + $0xf8] sm:$0xff] %v4743_v21  ;;  %v4741_v29 = vadd.f32 %v7778_v57, %v4698_v35  ;;  %v4703_v45 = vadd.f32 %v5958_v36, %v4365_v44  ;;  %v4363_v53 = vadd.f32 %v4316_v17, %v7766_v48 }
 0x282   : > { %v5907_v39 = vpop.f32.mrf.mxu1 }
 0x283   : > { %4777 = vst [vmem:[%s7784_s19 + $0xe8] sm:$0xff] %v4741_v29  ;;  %v4746_v34 = vadd.f32 %v7778_v57, %v4703_v45  ;;  %v4701_v59 = vadd.f32 %v4654_v49, %v4363_v53  ;;  %v4366_v46 = vadd.f32 %v5907_v39, %v7769_v11 }
 0x284   : > { %v4319_v55 = vpop.f32.mrf.mxu1 }
 0x285   : > { %4782 = vst [vmem:[%s7784_s19 + $0x110] sm:$0xff] %v4746_v34  ;;  %v4744_v23 = vadd.f32 %v7778_v57, %v4701_v59  ;;  %v4704_v56 = vadd.f32 %v5959_v2, %v4366_v46  ;;  %v4364_v16 = vadd.f32 %v4319_v55, %v7773_v1 }
 0x287   : > { %4780 = vst [vmem:[%s7784_s19 + $0x100] sm:$0xff] %v4744_v23  ;;  %v4747_v48 = vadd.f32 %v7778_v57, %v4704_v56  ;;  %v4702_v3 = vadd.f32 %v4657_v4, %v4364_v16 }
 0x289   : > { %4783 = vst [vmem:[%s7784_s19 + $0x118] sm:$0xff] %v4747_v48  ;;  %v4745_v9 = vadd.f32 %v7778_v57, %v4702_v3 }
 0x28b   : > { %4781 = vst [vmem:[%s7784_s19 + $0x108] sm:$0xff] %v4745_v9 }
 0x28c PF: > { %s15_s18 = sadd.s32 1, %s6137_s18  }
 0x28d   : > { %p12_p4 = scmp.ge.s32.totalorder %s15_s18, 4  }
 0x28f   :  { %14 = sbr.rel (!%p12_p4) target bundleno = 1 (0x1), region = 78 }

</bundles_post_ra>
